<compile_context>
chip_gen: v7x
topology: tpu7x:2x2x1
jax: 0.10.0
libtpu: 0.0.40
codegen_flags: <defaults>
</compile_context>

<pallas_src>
import functools

import jax
import jax.numpy as jnp
from jax.experimental import pallas as pl
from jax.experimental.pallas import tpu as pltpu


def _round_up(x, m):
    return ((x + m - 1) // m) * m


# ----------------------------------------------------------------------------
# Fused Pallas kernel:  (rows, K) @ (K, tn)  +  bias  [+ InstanceNorm + LeakyReLU]
#   * bf16 operands on the MXU, f32 accumulation (preferred_element_type)
#   * K is a single full-extent block -> no K padding and no reduction grid axis,
#     so no accumulator scratch is needed (output tile written once, lane-dense)
#   * for the norm-fused path, one M tile holds exactly the H*W rows of one image,
#     so the InstanceNorm statistics are a per-column reduction over the tile
#   * grid = (images, channel tiles), both "parallel" -> megacore sharding on v7x
# ----------------------------------------------------------------------------
def _fused_conv_kernel(a_ref, b_ref, bias_ref, o_ref, *, fuse_norm):
    acc = jnp.dot(a_ref[...], b_ref[...], preferred_element_type=jnp.float32)
    acc = acc + bias_ref[...]                                  # (rows, tn) + (1, tn)
    if fuse_norm:
        mean = jnp.mean(acc, axis=0, keepdims=True)            # per-channel stats (f32)
        cen = acc - mean
        var = jnp.mean(cen * cen, axis=0, keepdims=True)       # biased variance
        y = cen * jax.lax.rsqrt(var + 1e-5)
        acc = jnp.where(y >= 0, y, 0.01 * y)                   # LeakyReLU(0.01)
    o_ref[...] = acc.astype(o_ref.dtype)


def fused_matmul(a, w_p, bias_p, *, rows_per_image, fuse_norm, out_cols, out_dtype):
    """a: (M, K) activations; w_p: (K, Np) bf16 pre-padded; bias_p: (1, Np) f32."""
    M, K = a.shape
    Kb, Np = w_p.shape
    assert K == Kb and M % rows_per_image == 0
    n_img = M // rows_per_image
    tn = 256 if Np % 256 == 0 else 128                         # 256-wide for v6e/v7x MXU

    out = pl.pallas_call(
        functools.partial(_fused_conv_kernel, fuse_norm=fuse_norm),
        out_shape=jax.ShapeDtypeStruct((M, Np), out_dtype),
        grid_spec=pltpu.PrefetchScalarGridSpec(
            num_scalar_prefetch=0,
            grid=(n_img, Np // tn),
            in_specs=[
                pl.BlockSpec((rows_per_image, K), lambda i, j: (i, 0)),
                pl.BlockSpec((K, tn), lambda i, j: (0, j)),
                pl.BlockSpec((1, tn), lambda i, j: (0, j)),
            ],
            out_specs=pl.BlockSpec((rows_per_image, tn), lambda i, j: (i, j)),
        ),
        compiler_params=pltpu.CompilerParams(
            dimension_semantics=("parallel", "parallel"),
            vmem_limit_bytes=32 * 1024 * 1024),
    )(a.astype(jnp.bfloat16), w_p, bias_p)
    return out[:, :out_cols]


# ----------------------------------------------------------------------------
# Conv wrappers (thin XLA glue; all heavy math + epilogue lives in the kernel)
# ----------------------------------------------------------------------------
def conv3x3_in_lrelu(x, w_p, b_p, cout):
    """3x3 SAME conv + bias + InstanceNorm + LeakyReLU, fully fused in one kernel."""
    N, H, W, Cin = x.shape
    xp = jnp.pad(x, ((0, 0), (1, 1), (1, 1), (0, 0)))
    # TODO(synk): im2col patches are still materialized by XLA (bf16, so half the old
    # bytes); moving the 3x3 tap gather in-kernel via a haloed VMEM tile is the
    # remaining bandwidth item.
    patches = jnp.concatenate(
        [xp[:, kh:kh + H, kw:kw + W, :] for kh in range(3) for kw in range(3)],
        axis=-1)
    a = patches.reshape(N * H * W, 9 * Cin)
    y = fused_matmul(a, w_p, b_p, rows_per_image=H * W, fuse_norm=True,
                     out_cols=cout, out_dtype=jnp.bfloat16)
    return y.reshape(N, H, W, cout)


def conv1x1(x, w_p, b_p, cout, out_dtype=jnp.float32):
    N, H, W, Cin = x.shape
    y = fused_matmul(x.reshape(N * H * W, Cin), w_p, b_p, rows_per_image=H * W,
                     fuse_norm=False, out_cols=cout, out_dtype=out_dtype)
    return y.reshape(N, H, W, cout)


def conv_transpose_2x2_s2(x, w_p, b_p, cout):
    """ConvTranspose2d(k=2, s=2); bias is fused into the matmul epilogue."""
    N, H, W, Cin = x.shape
    y = fused_matmul(x.reshape(N * H * W, Cin), w_p, b_p, rows_per_image=H * W,
                     fuse_norm=False, out_cols=cout * 4, out_dtype=jnp.bfloat16)
    y = y.reshape(N, H, W, cout, 2, 2)
    # TODO(synk): the 2x2 pixel-scatter transpose stays in XLA; could become strided
    # stores in the kernel epilogue.
    y = jnp.transpose(y, (0, 1, 4, 2, 5, 3)).reshape(N, 2 * H, 2 * W, cout)
    return y


def maxpool2(x):
    N, H, W, C = x.shape
    return x.reshape(N, H // 2, 2, W // 2, 2, C).max(axis=(2, 4))


# ----------------------------------------------------------------------------
# UNet forward (matches the PyTorch module semantics, eval mode)
# ----------------------------------------------------------------------------
def unet_conv_block(x, p, cout):
    x = conv3x3_in_lrelu(x, p["w1"], p["b1"], cout)
    x = conv3x3_in_lrelu(x, p["w2"], p["b2"], cout)
    return x


def unet_forward(params, x_nchw, *, feature_map, levels, out_channels):
    x = jnp.transpose(x_nchw, (0, 2, 3, 1)).astype(jnp.bfloat16)   # -> NHWC bf16
    enc_outs = []
    out = x
    # encoder
    for i in range(levels):
        cout = (2 ** i) * feature_map
        out = unet_conv_block(out, params["enc"][i], cout)
        # TODO(synk): nn.Dropout on the last encoder level is treated as identity
        # (eval-mode determinism).
        enc_outs.append(out)
        out = maxpool2(out)
    out = unet_conv_block(out, params["center"], (2 ** levels) * feature_map)
    # decoder
    for i in range(levels):
        c_out = 2 ** (levels - i - 1) * feature_map
        dp = params["dec"][i]
        up = conv_transpose_2x2_s2(out, dp["up_w"], dp["up_b"], c_out)
        out = jnp.concatenate([enc_outs[levels - 1 - i], up], axis=-1)  # cat([skip, up])
        out = unet_conv_block(out, dp, c_out)
    out = conv1x1(out, params["score_w"], params["score_b"], out_channels)
    return jnp.transpose(out, (0, 3, 1, 2))  # back to NCHW, f32


# ----------------------------------------------------------------------------
# Deterministic parameter construction; weights are packed ONCE at init into the
# exact (K, Cout_padded) bf16 / (1, Cout_padded) f32 layouts the kernel consumes.
# ----------------------------------------------------------------------------
def _prep_conv3x3(w, b):
    cout, cin = w.shape[0], w.shape[1]
    npad = _round_up(cout, 128)
    wr = jnp.transpose(w, (2, 3, 1, 0)).reshape(9 * cin, cout)
    wr = jnp.pad(wr, ((0, 0), (0, npad - cout))).astype(jnp.bfloat16)
    bp = jnp.pad(b, (0, npad - cout)).reshape(1, npad).astype(jnp.float32)
    return wr, bp


def _prep_conv1x1(w, b):
    cout, cin = w.shape[0], w.shape[1]
    npad = _round_up(cout, 128)
    wr = jnp.pad(w.reshape(cout, cin).T, ((0, 0), (0, npad - cout))).astype(jnp.bfloat16)
    bp = jnp.pad(b, (0, npad - cout)).reshape(1, npad).astype(jnp.float32)
    return wr, bp


def _prep_deconv(w, b):
    cin, cout = w.shape[0], w.shape[1]
    ncols = cout * 4
    npad = _round_up(ncols, 128)
    wr = jnp.pad(w.reshape(cin, ncols), ((0, 0), (0, npad - ncols))).astype(jnp.bfloat16)
    bp = jnp.pad(jnp.repeat(b, 4), (0, npad - ncols)).reshape(1, npad).astype(jnp.float32)
    return wr, bp


def init_params(key, in_channels, out_channels, fm, levels):
    keys = iter(jax.random.split(key, 256))

    def conv_w(cout, cin, k):
        return 0.1 * jax.random.normal(next(keys), (cout, cin, k, k), jnp.float32)

    def bias(c):
        return 0.01 * jax.random.normal(next(keys), (c,), jnp.float32)

    params = {"enc": [], "dec": []}
    cin = in_channels
    for i in range(levels):
        cout = (2 ** i) * fm
        w1p, b1p = _prep_conv3x3(conv_w(cout, cin, 3), bias(cout))
        w2p, b2p = _prep_conv3x3(conv_w(cout, cout, 3), bias(cout))
        params["enc"].append(dict(w1=w1p, b1=b1p, w2=w2p, b2=b2p))
        cin = cout
    cc = (2 ** levels) * fm
    w1p, b1p = _prep_conv3x3(conv_w(cc, cin, 3), bias(cc))
    w2p, b2p = _prep_conv3x3(conv_w(cc, cc, 3), bias(cc))
    params["center"] = dict(w1=w1p, b1=b1p, w2=w2p, b2=b2p)
    for i in range(levels):
        c_in = 2 ** (levels - i) * fm
        c_out = 2 ** (levels - i - 1) * fm
        up_w = 0.1 * jax.random.normal(next(keys), (c_in, c_out, 2, 2), jnp.float32)
        upwp, upbp = _prep_deconv(up_w, bias(c_out))
        w1p, b1p = _prep_conv3x3(conv_w(c_out, c_in, 3), bias(c_out))
        w2p, b2p = _prep_conv3x3(conv_w(c_out, c_out, 3), bias(c_out))
        params["dec"].append(dict(up_w=upwp, up_b=upbp,
                                  w1=w1p, b1=b1p, w2=w2p, b2=b2p))
    swp, sbp = _prep_conv1x1(conv_w(out_channels, fm, 1), bias(out_channels))
    params["score_w"] = swp
    params["score_b"] = sbp
    return params


if __name__ == "__main__":
    # Small, UNet-consistent shapes: batch=2, in_ch=2, out_ch=3, 16x16 spatial,
    # feature_map=8, levels=2 (spatial must be divisible by 2**levels).
    N, CIN, COUT, H, W = 2, 2, 3, 16, 16
    FM, LEVELS = 8, 2

    root = jax.random.PRNGKey(0)
    k_params, k_x = jax.random.split(root)
    params = init_params(k_params, CIN, COUT, FM, LEVELS)
    x = jax.random.normal(k_x, (N, CIN, H, W), jnp.float32)

    fwd = jax.jit(functools.partial(unet_forward, feature_map=FM, levels=LEVELS,
                                    out_channels=COUT))
    out = jax.block_until_ready(fwd(params, x))

    assert out.shape == (N, COUT, H, W), out.shape
    assert bool(jnp.all(jnp.isfinite(out)))
    print("KERNEL_OK")
</pallas_src>

<mosaic_0001>
module attributes {stable_mosaic.version = 11 : i64} {
  func.func @_fused_conv_kernel(%arg0: i32, %arg1: i32, %arg2: memref<256x18xbf16, #tpu.memory_space<vmem>>, %arg3: memref<18x128xbf16, #tpu.memory_space<vmem>>, %arg4: memref<1x128xf32, #tpu.memory_space<vmem>>, %arg5: memref<256x128xbf16, #tpu.memory_space<vmem>>) attributes {dimension_semantics = [#tpu.dimension_semantics<parallel>, #tpu.dimension_semantics<parallel>], iteration_bounds = array<i64: 2, 1>, scalar_prefetch = 0 : i64, scratch_operands = 0 : i64, tpu.core_type = #tpu.core_type<tc>, window_params = [{transform_indices = @transform_0, window_bounds = array<i64: 256, 18>}, {transform_indices = @transform_1, window_bounds = array<i64: 18, 128>}, {transform_indices = @transform_2, window_bounds = array<i64: 1, 128>}, {transform_indices = @transform_3, window_bounds = array<i64: 256, 128>}]} {
    %c0 = arith.constant 0 : index
    %c0_0 = arith.constant 0 : index
    %0 = vector.load %arg2[%c0, %c0_0] : memref<256x18xbf16, #tpu.memory_space<vmem>>, vector<256x18xbf16>
    %c0_1 = arith.constant 0 : index
    %c0_2 = arith.constant 0 : index
    %1 = vector.load %arg3[%c0_1, %c0_2] : memref<18x128xbf16, #tpu.memory_space<vmem>>, vector<18x128xbf16>
    %cst = arith.constant dense<0.000000e+00> : vector<256x128xf32>
    %2 = tpu.matmul %0, %1, %cst {dimension_numbers = #tpu.dot_dimension_numbers<[1], [0], [0], [1], [0, 0, 1, 1], [], []>} : vector<256x18xbf16>, vector<18x128xbf16>, vector<256x128xf32> -> vector<256x128xf32>
    %c0_3 = arith.constant 0 : index
    %c0_4 = arith.constant 0 : index
    %3 = vector.load %arg4[%c0_3, %c0_4] : memref<1x128xf32, #tpu.memory_space<vmem>>, vector<1x128xf32>
    %4 = vector.broadcast %3 : vector<1x128xf32> to vector<256x128xf32>
    %5 = arith.addf %2, %4 : vector<256x128xf32>
    %cst_5 = arith.constant dense<0.000000e+00> : vector<128xf32>
    %6 = vector.multi_reduction <add>, %5, %cst_5 [0] : vector<256x128xf32> to vector<128xf32>
    %7 = vector.shape_cast %6 : vector<128xf32> to vector<1x128xf32>
    %cst_6 = arith.constant 2.560000e+02 : f32
    %8 = vector.broadcast %cst_6 : f32 to vector<1x128xf32>
    %9 = arith.divf %7, %8 : vector<1x128xf32>
    %10 = vector.broadcast %9 : vector<1x128xf32> to vector<256x128xf32>
    %11 = arith.subf %5, %10 : vector<256x128xf32>
    %12 = arith.mulf %11, %11 : vector<256x128xf32>
    %cst_7 = arith.constant dense<0.000000e+00> : vector<128xf32>
    %13 = vector.multi_reduction <add>, %12, %cst_7 [0] : vector<256x128xf32> to vector<128xf32>
    %14 = vector.shape_cast %13 : vector<128xf32> to vector<1x128xf32>
    %cst_8 = arith.constant 2.560000e+02 : f32
    %15 = vector.broadcast %cst_8 : f32 to vector<1x128xf32>
    %16 = arith.divf %14, %15 : vector<1x128xf32>
    %cst_9 = arith.constant 9.99999974E-6 : f32
    %17 = vector.broadcast %cst_9 : f32 to vector<1x128xf32>
    %18 = arith.addf %16, %17 : vector<1x128xf32>
    %19 = math.rsqrt %18 : vector<1x128xf32>
    %20 = vector.broadcast %19 : vector<1x128xf32> to vector<256x128xf32>
    %21 = arith.mulf %11, %20 : vector<256x128xf32>
    %cst_10 = arith.constant 0.000000e+00 : f32
    %22 = vector.broadcast %cst_10 : f32 to vector<256x128xf32>
    %23 = arith.cmpf oge, %21, %22 : vector<256x128xf32>
    %cst_11 = arith.constant 0.00999999977 : f32
    %24 = vector.broadcast %cst_11 : f32 to vector<256x128xf32>
    %25 = arith.mulf %24, %21 : vector<256x128xf32>
    %26 = arith.select %23, %21, %25 : vector<256x128xi1>, vector<256x128xf32>
    %27 = arith.truncf %26 : vector<256x128xf32> to vector<256x128xbf16>
    %c0_12 = arith.constant 0 : index
    %c0_13 = arith.constant 0 : index
    %28 = vector.load %arg5[%c0_12, %c0_13] : memref<256x128xbf16, #tpu.memory_space<vmem>>, vector<256x128xbf16>
    tpu.vector_store %arg5[%c0_12, %c0_13], %27 {strides = array<i32>} : memref<256x128xbf16, #tpu.memory_space<vmem>>, vector<256x128xbf16>,
    return
  }
  func.func @transform_0(%arg0: i32, %arg1: i32) -> (i32, i32) {
    %c0_i32 = arith.constant 0 : i32
    %c0_i32_0 = arith.constant 0 : i32
    return %arg0, %c0_i32 : i32, i32
  }
  func.func @transform_1(%arg0: i32, %arg1: i32) -> (i32, i32) {
    %c0_i32 = arith.constant 0 : i32
    %c0_i32_0 = arith.constant 0 : i32
    return %c0_i32, %arg1 : i32, i32
  }
  func.func @transform_2(%arg0: i32, %arg1: i32) -> (i32, i32) {
    %c0_i32 = arith.constant 0 : i32
    %c0_i32_0 = arith.constant 0 : i32
    return %c0_i32, %arg1 : i32, i32
  }
  func.func @transform_3(%arg0: i32, %arg1: i32) -> (i32, i32) {
    %c0_i32 = arith.constant 0 : i32
    return %arg0, %arg1 : i32, i32
  }
}

module attributes {stable_mosaic.version = 11 : i64} {
  func.func @_fused_conv_kernel(%arg0: i32, %arg1: i32, %arg2: memref<256x72xbf16, #tpu.memory_space<vmem>>, %arg3: memref<72x128xbf16, #tpu.memory_space<vmem>>, %arg4: memref<1x128xf32, #tpu.memory_space<vmem>>, %arg5: memref<256x128xbf16, #tpu.memory_space<vmem>>) attributes {dimension_semantics = [#tpu.dimension_semantics<parallel>, #tpu.dimension_semantics<parallel>], iteration_bounds = array<i64: 2, 1>, scalar_prefetch = 0 : i64, scratch_operands = 0 : i64, tpu.core_type = #tpu.core_type<tc>, window_params = [{transform_indices = @transform_0, window_bounds = array<i64: 256, 72>}, {transform_indices = @transform_1, window_bounds = array<i64: 72, 128>}, {transform_indices = @transform_2, window_bounds = array<i64: 1, 128>}, {transform_indices = @transform_3, window_bounds = array<i64: 256, 128>}]} {
    %c0 = arith.constant 0 : index
    %c0_0 = arith.constant 0 : index
    %0 = vector.load %arg2[%c0, %c0_0] : memref<256x72xbf16, #tpu.memory_space<vmem>>, vector<256x72xbf16>
    %c0_1 = arith.constant 0 : index
    %c0_2 = arith.constant 0 : index
    %1 = vector.load %arg3[%c0_1, %c0_2] : memref<72x128xbf16, #tpu.memory_space<vmem>>, vector<72x128xbf16>
    %cst = arith.constant dense<0.000000e+00> : vector<256x128xf32>
    %2 = tpu.matmul %0, %1, %cst {dimension_numbers = #tpu.dot_dimension_numbers<[1], [0], [0], [1], [0, 0, 1, 1], [], []>} : vector<256x72xbf16>, vector<72x128xbf16>, vector<256x128xf32> -> vector<256x128xf32>
    %c0_3 = arith.constant 0 : index
    %c0_4 = arith.constant 0 : index
    %3 = vector.load %arg4[%c0_3, %c0_4] : memref<1x128xf32, #tpu.memory_space<vmem>>, vector<1x128xf32>
    %4 = vector.broadcast %3 : vector<1x128xf32> to vector<256x128xf32>
    %5 = arith.addf %2, %4 : vector<256x128xf32>
    %cst_5 = arith.constant dense<0.000000e+00> : vector<128xf32>
    %6 = vector.multi_reduction <add>, %5, %cst_5 [0] : vector<256x128xf32> to vector<128xf32>
    %7 = vector.shape_cast %6 : vector<128xf32> to vector<1x128xf32>
    %cst_6 = arith.constant 2.560000e+02 : f32
    %8 = vector.broadcast %cst_6 : f32 to vector<1x128xf32>
    %9 = arith.divf %7, %8 : vector<1x128xf32>
    %10 = vector.broadcast %9 : vector<1x128xf32> to vector<256x128xf32>
    %11 = arith.subf %5, %10 : vector<256x128xf32>
    %12 = arith.mulf %11, %11 : vector<256x128xf32>
    %cst_7 = arith.constant dense<0.000000e+00> : vector<128xf32>
    %13 = vector.multi_reduction <add>, %12, %cst_7 [0] : vector<256x128xf32> to vector<128xf32>
    %14 = vector.shape_cast %13 : vector<128xf32> to vector<1x128xf32>
    %cst_8 = arith.constant 2.560000e+02 : f32
    %15 = vector.broadcast %cst_8 : f32 to vector<1x128xf32>
    %16 = arith.divf %14, %15 : vector<1x128xf32>
    %cst_9 = arith.constant 9.99999974E-6 : f32
    %17 = vector.broadcast %cst_9 : f32 to vector<1x128xf32>
    %18 = arith.addf %16, %17 : vector<1x128xf32>
    %19 = math.rsqrt %18 : vector<1x128xf32>
    %20 = vector.broadcast %19 : vector<1x128xf32> to vector<256x128xf32>
    %21 = arith.mulf %11, %20 : vector<256x128xf32>
    %cst_10 = arith.constant 0.000000e+00 : f32
    %22 = vector.broadcast %cst_10 : f32 to vector<256x128xf32>
    %23 = arith.cmpf oge, %21, %22 : vector<256x128xf32>
    %cst_11 = arith.constant 0.00999999977 : f32
    %24 = vector.broadcast %cst_11 : f32 to vector<256x128xf32>
    %25 = arith.mulf %24, %21 : vector<256x128xf32>
    %26 = arith.select %23, %21, %25 : vector<256x128xi1>, vector<256x128xf32>
    %27 = arith.truncf %26 : vector<256x128xf32> to vector<256x128xbf16>
    %c0_12 = arith.constant 0 : index
    %c0_13 = arith.constant 0 : index
    %28 = vector.load %arg5[%c0_12, %c0_13] : memref<256x128xbf16, #tpu.memory_space<vmem>>, vector<256x128xbf16>
    tpu.vector_store %arg5[%c0_12, %c0_13], %27 {strides = array<i32>} : memref<256x128xbf16, #tpu.memory_space<vmem>>, vector<256x128xbf16>,
    return
  }
  func.func @transform_0(%arg0: i32, %arg1: i32) -> (i32, i32) {
    %c0_i32 = arith.constant 0 : i32
    %c0_i32_0 = arith.constant 0 : i32
    return %arg0, %c0_i32 : i32, i32
  }
  func.func @transform_1(%arg0: i32, %arg1: i32) -> (i32, i32) {
    %c0_i32 = arith.constant 0 : i32
    %c0_i32_0 = arith.constant 0 : i32
    return %c0_i32, %arg1 : i32, i32
  }
  func.func @transform_2(%arg0: i32, %arg1: i32) -> (i32, i32) {
    %c0_i32 = arith.constant 0 : i32
    %c0_i32_0 = arith.constant 0 : i32
    return %c0_i32, %arg1 : i32, i32
  }
  func.func @transform_3(%arg0: i32, %arg1: i32) -> (i32, i32) {
    %c0_i32 = arith.constant 0 : i32
    return %arg0, %arg1 : i32, i32
  }
}

module attributes {stable_mosaic.version = 11 : i64} {
  func.func @_fused_conv_kernel(%arg0: i32, %arg1: i32, %arg2: memref<64x72xbf16, #tpu.memory_space<vmem>>, %arg3: memref<72x128xbf16, #tpu.memory_space<vmem>>, %arg4: memref<1x128xf32, #tpu.memory_space<vmem>>, %arg5: memref<64x128xbf16, #tpu.memory_space<vmem>>) attributes {dimension_semantics = [#tpu.dimension_semantics<parallel>, #tpu.dimension_semantics<parallel>], iteration_bounds = array<i64: 2, 1>, scalar_prefetch = 0 : i64, scratch_operands = 0 : i64, tpu.core_type = #tpu.core_type<tc>, window_params = [{transform_indices = @transform_0, window_bounds = array<i64: 64, 72>}, {transform_indices = @transform_1, window_bounds = array<i64: 72, 128>}, {transform_indices = @transform_2, window_bounds = array<i64: 1, 128>}, {transform_indices = @transform_3, window_bounds = array<i64: 64, 128>}]} {
    %c0 = arith.constant 0 : index
    %c0_0 = arith.constant 0 : index
    %0 = vector.load %arg2[%c0, %c0_0] : memref<64x72xbf16, #tpu.memory_space<vmem>>, vector<64x72xbf16>
    %c0_1 = arith.constant 0 : index
    %c0_2 = arith.constant 0 : index
    %1 = vector.load %arg3[%c0_1, %c0_2] : memref<72x128xbf16, #tpu.memory_space<vmem>>, vector<72x128xbf16>
    %cst = arith.constant dense<0.000000e+00> : vector<64x128xf32>
    %2 = tpu.matmul %0, %1, %cst {dimension_numbers = #tpu.dot_dimension_numbers<[1], [0], [0], [1], [0, 0, 1, 1], [], []>} : vector<64x72xbf16>, vector<72x128xbf16>, vector<64x128xf32> -> vector<64x128xf32>
    %c0_3 = arith.constant 0 : index
    %c0_4 = arith.constant 0 : index
    %3 = vector.load %arg4[%c0_3, %c0_4] : memref<1x128xf32, #tpu.memory_space<vmem>>, vector<1x128xf32>
    %4 = vector.broadcast %3 : vector<1x128xf32> to vector<64x128xf32>
    %5 = arith.addf %2, %4 : vector<64x128xf32>
    %cst_5 = arith.constant dense<0.000000e+00> : vector<128xf32>
    %6 = vector.multi_reduction <add>, %5, %cst_5 [0] : vector<64x128xf32> to vector<128xf32>
    %7 = vector.shape_cast %6 : vector<128xf32> to vector<1x128xf32>
    %cst_6 = arith.constant 6.400000e+01 : f32
    %8 = vector.broadcast %cst_6 : f32 to vector<1x128xf32>
    %9 = arith.divf %7, %8 : vector<1x128xf32>
    %10 = vector.broadcast %9 : vector<1x128xf32> to vector<64x128xf32>
    %11 = arith.subf %5, %10 : vector<64x128xf32>
    %12 = arith.mulf %11, %11 : vector<64x128xf32>
    %cst_7 = arith.constant dense<0.000000e+00> : vector<128xf32>
    %13 = vector.multi_reduction <add>, %12, %cst_7 [0] : vector<64x128xf32> to vector<128xf32>
    %14 = vector.shape_cast %13 : vector<128xf32> to vector<1x128xf32>
    %cst_8 = arith.constant 6.400000e+01 : f32
    %15 = vector.broadcast %cst_8 : f32 to vector<1x128xf32>
    %16 = arith.divf %14, %15 : vector<1x128xf32>
    %cst_9 = arith.constant 9.99999974E-6 : f32
    %17 = vector.broadcast %cst_9 : f32 to vector<1x128xf32>
    %18 = arith.addf %16, %17 : vector<1x128xf32>
    %19 = math.rsqrt %18 : vector<1x128xf32>
    %20 = vector.broadcast %19 : vector<1x128xf32> to vector<64x128xf32>
    %21 = arith.mulf %11, %20 : vector<64x128xf32>
    %cst_10 = arith.constant 0.000000e+00 : f32
    %22 = vector.broadcast %cst_10 : f32 to vector<64x128xf32>
    %23 = arith.cmpf oge, %21, %22 : vector<64x128xf32>
    %cst_11 = arith.constant 0.00999999977 : f32
    %24 = vector.broadcast %cst_11 : f32 to vector<64x128xf32>
    %25 = arith.mulf %24, %21 : vector<64x128xf32>
    %26 = arith.select %23, %21, %25 : vector<64x128xi1>, vector<64x128xf32>
    %27 = arith.truncf %26 : vector<64x128xf32> to vector<64x128xbf16>
    %c0_12 = arith.constant 0 : index
    %c0_13 = arith.constant 0 : index
    %28 = vector.load %arg5[%c0_12, %c0_13] : memref<64x128xbf16, #tpu.memory_space<vmem>>, vector<64x128xbf16>
    tpu.vector_store %arg5[%c0_12, %c0_13], %27 {strides = array<i32>} : memref<64x128xbf16, #tpu.memory_space<vmem>>, vector<64x128xbf16>,
    return
  }
  func.func @transform_0(%arg0: i32, %arg1: i32) -> (i32, i32) {
    %c0_i32 = arith.constant 0 : i32
    %c0_i32_0 = arith.constant 0 : i32
    return %arg0, %c0_i32 : i32, i32
  }
  func.func @transform_1(%arg0: i32, %arg1: i32) -> (i32, i32) {
    %c0_i32 = arith.constant 0 : i32
    %c0_i32_0 = arith.constant 0 : i32
    return %c0_i32, %arg1 : i32, i32
  }
  func.func @transform_2(%arg0: i32, %arg1: i32) -> (i32, i32) {
    %c0_i32 = arith.constant 0 : i32
    %c0_i32_0 = arith.constant 0 : i32
    return %c0_i32, %arg1 : i32, i32
  }
  func.func @transform_3(%arg0: i32, %arg1: i32) -> (i32, i32) {
    %c0_i32 = arith.constant 0 : i32
    return %arg0, %arg1 : i32, i32
  }
}

module attributes {stable_mosaic.version = 11 : i64} {
  func.func @_fused_conv_kernel(%arg0: i32, %arg1: i32, %arg2: memref<64x144xbf16, #tpu.memory_space<vmem>>, %arg3: memref<144x128xbf16, #tpu.memory_space<vmem>>, %arg4: memref<1x128xf32, #tpu.memory_space<vmem>>, %arg5: memref<64x128xbf16, #tpu.memory_space<vmem>>) attributes {dimension_semantics = [#tpu.dimension_semantics<parallel>, #tpu.dimension_semantics<parallel>], iteration_bounds = array<i64: 2, 1>, scalar_prefetch = 0 : i64, scratch_operands = 0 : i64, tpu.core_type = #tpu.core_type<tc>, window_params = [{transform_indices = @transform_0, window_bounds = array<i64: 64, 144>}, {transform_indices = @transform_1, window_bounds = array<i64: 144, 128>}, {transform_indices = @transform_2, window_bounds = array<i64: 1, 128>}, {transform_indices = @transform_3, window_bounds = array<i64: 64, 128>}]} {
    %c0 = arith.constant 0 : index
    %c0_0 = arith.constant 0 : index
    %0 = vector.load %arg2[%c0, %c0_0] : memref<64x144xbf16, #tpu.memory_space<vmem>>, vector<64x144xbf16>
    %c0_1 = arith.constant 0 : index
    %c0_2 = arith.constant 0 : index
    %1 = vector.load %arg3[%c0_1, %c0_2] : memref<144x128xbf16, #tpu.memory_space<vmem>>, vector<144x128xbf16>
    %cst = arith.constant dense<0.000000e+00> : vector<64x128xf32>
    %2 = tpu.matmul %0, %1, %cst {dimension_numbers = #tpu.dot_dimension_numbers<[1], [0], [0], [1], [0, 0, 1, 1], [], []>} : vector<64x144xbf16>, vector<144x128xbf16>, vector<64x128xf32> -> vector<64x128xf32>
    %c0_3 = arith.constant 0 : index
    %c0_4 = arith.constant 0 : index
    %3 = vector.load %arg4[%c0_3, %c0_4] : memref<1x128xf32, #tpu.memory_space<vmem>>, vector<1x128xf32>
    %4 = vector.broadcast %3 : vector<1x128xf32> to vector<64x128xf32>
    %5 = arith.addf %2, %4 : vector<64x128xf32>
    %cst_5 = arith.constant dense<0.000000e+00> : vector<128xf32>
    %6 = vector.multi_reduction <add>, %5, %cst_5 [0] : vector<64x128xf32> to vector<128xf32>
    %7 = vector.shape_cast %6 : vector<128xf32> to vector<1x128xf32>
    %cst_6 = arith.constant 6.400000e+01 : f32
    %8 = vector.broadcast %cst_6 : f32 to vector<1x128xf32>
    %9 = arith.divf %7, %8 : vector<1x128xf32>
    %10 = vector.broadcast %9 : vector<1x128xf32> to vector<64x128xf32>
    %11 = arith.subf %5, %10 : vector<64x128xf32>
    %12 = arith.mulf %11, %11 : vector<64x128xf32>
    %cst_7 = arith.constant dense<0.000000e+00> : vector<128xf32>
    %13 = vector.multi_reduction <add>, %12, %cst_7 [0] : vector<64x128xf32> to vector<128xf32>
    %14 = vector.shape_cast %13 : vector<128xf32> to vector<1x128xf32>
    %cst_8 = arith.constant 6.400000e+01 : f32
    %15 = vector.broadcast %cst_8 : f32 to vector<1x128xf32>
    %16 = arith.divf %14, %15 : vector<1x128xf32>
    %cst_9 = arith.constant 9.99999974E-6 : f32
    %17 = vector.broadcast %cst_9 : f32 to vector<1x128xf32>
    %18 = arith.addf %16, %17 : vector<1x128xf32>
    %19 = math.rsqrt %18 : vector<1x128xf32>
    %20 = vector.broadcast %19 : vector<1x128xf32> to vector<64x128xf32>
    %21 = arith.mulf %11, %20 : vector<64x128xf32>
    %cst_10 = arith.constant 0.000000e+00 : f32
    %22 = vector.broadcast %cst_10 : f32 to vector<64x128xf32>
    %23 = arith.cmpf oge, %21, %22 : vector<64x128xf32>
    %cst_11 = arith.constant 0.00999999977 : f32
    %24 = vector.broadcast %cst_11 : f32 to vector<64x128xf32>
    %25 = arith.mulf %24, %21 : vector<64x128xf32>
    %26 = arith.select %23, %21, %25 : vector<64x128xi1>, vector<64x128xf32>
    %27 = arith.truncf %26 : vector<64x128xf32> to vector<64x128xbf16>
    %c0_12 = arith.constant 0 : index
    %c0_13 = arith.constant 0 : index
    %28 = vector.load %arg5[%c0_12, %c0_13] : memref<64x128xbf16, #tpu.memory_space<vmem>>, vector<64x128xbf16>
    tpu.vector_store %arg5[%c0_12, %c0_13], %27 {strides = array<i32>} : memref<64x128xbf16, #tpu.memory_space<vmem>>, vector<64x128xbf16>,
    return
  }
  func.func @transform_0(%arg0: i32, %arg1: i32) -> (i32, i32) {
    %c0_i32 = arith.constant 0 : i32
    %c0_i32_0 = arith.constant 0 : i32
    return %arg0, %c0_i32 : i32, i32
  }
  func.func @transform_1(%arg0: i32, %arg1: i32) -> (i32, i32) {
    %c0_i32 = arith.constant 0 : i32
    %c0_i32_0 = arith.constant 0 : i32
    return %c0_i32, %arg1 : i32, i32
  }
  func.func @transform_2(%arg0: i32, %arg1: i32) -> (i32, i32) {
    %c0_i32 = arith.constant 0 : i32
    %c0_i32_0 = arith.constant 0 : i32
    return %c0_i32, %arg1 : i32, i32
  }
  func.func @transform_3(%arg0: i32, %arg1: i32) -> (i32, i32) {
    %c0_i32 = arith.constant 0 : i32
    return %arg0, %arg1 : i32, i32
  }
}

module attributes {stable_mosaic.version = 11 : i64} {
  func.func @_fused_conv_kernel(%arg0: i32, %arg1: i32, %arg2: memref<16x144xbf16, #tpu.memory_space<vmem>>, %arg3: memref<144x128xbf16, #tpu.memory_space<vmem>>, %arg4: memref<1x128xf32, #tpu.memory_space<vmem>>, %arg5: memref<16x128xbf16, #tpu.memory_space<vmem>>) attributes {dimension_semantics = [#tpu.dimension_semantics<parallel>, #tpu.dimension_semantics<parallel>], iteration_bounds = array<i64: 2, 1>, scalar_prefetch = 0 : i64, scratch_operands = 0 : i64, tpu.core_type = #tpu.core_type<tc>, window_params = [{transform_indices = @transform_0, window_bounds = array<i64: 16, 144>}, {transform_indices = @transform_1, window_bounds = array<i64: 144, 128>}, {transform_indices = @transform_2, window_bounds = array<i64: 1, 128>}, {transform_indices = @transform_3, window_bounds = array<i64: 16, 128>}]} {
    %c0 = arith.constant 0 : index
    %c0_0 = arith.constant 0 : index
    %0 = vector.load %arg2[%c0, %c0_0] : memref<16x144xbf16, #tpu.memory_space<vmem>>, vector<16x144xbf16>
    %c0_1 = arith.constant 0 : index
    %c0_2 = arith.constant 0 : index
    %1 = vector.load %arg3[%c0_1, %c0_2] : memref<144x128xbf16, #tpu.memory_space<vmem>>, vector<144x128xbf16>
    %cst = arith.constant dense<0.000000e+00> : vector<16x128xf32>
    %2 = tpu.matmul %0, %1, %cst {dimension_numbers = #tpu.dot_dimension_numbers<[1], [0], [0], [1], [0, 0, 1, 1], [], []>} : vector<16x144xbf16>, vector<144x128xbf16>, vector<16x128xf32> -> vector<16x128xf32>
    %c0_3 = arith.constant 0 : index
    %c0_4 = arith.constant 0 : index
    %3 = vector.load %arg4[%c0_3, %c0_4] : memref<1x128xf32, #tpu.memory_space<vmem>>, vector<1x128xf32>
    %4 = vector.broadcast %3 : vector<1x128xf32> to vector<16x128xf32>
    %5 = arith.addf %2, %4 : vector<16x128xf32>
    %cst_5 = arith.constant dense<0.000000e+00> : vector<128xf32>
    %6 = vector.multi_reduction <add>, %5, %cst_5 [0] : vector<16x128xf32> to vector<128xf32>
    %7 = vector.shape_cast %6 : vector<128xf32> to vector<1x128xf32>
    %cst_6 = arith.constant 1.600000e+01 : f32
    %8 = vector.broadcast %cst_6 : f32 to vector<1x128xf32>
    %9 = arith.divf %7, %8 : vector<1x128xf32>
    %10 = vector.broadcast %9 : vector<1x128xf32> to vector<16x128xf32>
    %11 = arith.subf %5, %10 : vector<16x128xf32>
    %12 = arith.mulf %11, %11 : vector<16x128xf32>
    %cst_7 = arith.constant dense<0.000000e+00> : vector<128xf32>
    %13 = vector.multi_reduction <add>, %12, %cst_7 [0] : vector<16x128xf32> to vector<128xf32>
    %14 = vector.shape_cast %13 : vector<128xf32> to vector<1x128xf32>
    %cst_8 = arith.constant 1.600000e+01 : f32
    %15 = vector.broadcast %cst_8 : f32 to vector<1x128xf32>
    %16 = arith.divf %14, %15 : vector<1x128xf32>
    %cst_9 = arith.constant 9.99999974E-6 : f32
    %17 = vector.broadcast %cst_9 : f32 to vector<1x128xf32>
    %18 = arith.addf %16, %17 : vector<1x128xf32>
    %19 = math.rsqrt %18 : vector<1x128xf32>
    %20 = vector.broadcast %19 : vector<1x128xf32> to vector<16x128xf32>
    %21 = arith.mulf %11, %20 : vector<16x128xf32>
    %cst_10 = arith.constant 0.000000e+00 : f32
    %22 = vector.broadcast %cst_10 : f32 to vector<16x128xf32>
    %23 = arith.cmpf oge, %21, %22 : vector<16x128xf32>
    %cst_11 = arith.constant 0.00999999977 : f32
    %24 = vector.broadcast %cst_11 : f32 to vector<16x128xf32>
    %25 = arith.mulf %24, %21 : vector<16x128xf32>
    %26 = arith.select %23, %21, %25 : vector<16x128xi1>, vector<16x128xf32>
    %27 = arith.truncf %26 : vector<16x128xf32> to vector<16x128xbf16>
    %c0_12 = arith.constant 0 : index
    %c0_13 = arith.constant 0 : index
    %28 = vector.load %arg5[%c0_12, %c0_13] : memref<16x128xbf16, #tpu.memory_space<vmem>>, vector<16x128xbf16>
    tpu.vector_store %arg5[%c0_12, %c0_13], %27 {strides = array<i32>} : memref<16x128xbf16, #tpu.memory_space<vmem>>, vector<16x128xbf16>,
    return
  }
  func.func @transform_0(%arg0: i32, %arg1: i32) -> (i32, i32) {
    %c0_i32 = arith.constant 0 : i32
    %c0_i32_0 = arith.constant 0 : i32
    return %arg0, %c0_i32 : i32, i32
  }
  func.func @transform_1(%arg0: i32, %arg1: i32) -> (i32, i32) {
    %c0_i32 = arith.constant 0 : i32
    %c0_i32_0 = arith.constant 0 : i32
    return %c0_i32, %arg1 : i32, i32
  }
  func.func @transform_2(%arg0: i32, %arg1: i32) -> (i32, i32) {
    %c0_i32 = arith.constant 0 : i32
    %c0_i32_0 = arith.constant 0 : i32
    return %c0_i32, %arg1 : i32, i32
  }
  func.func @transform_3(%arg0: i32, %arg1: i32) -> (i32, i32) {
    %c0_i32 = arith.constant 0 : i32
    return %arg0, %arg1 : i32, i32
  }
}

module attributes {stable_mosaic.version = 11 : i64} {
  func.func @_fused_conv_kernel(%arg0: i32, %arg1: i32, %arg2: memref<16x288xbf16, #tpu.memory_space<vmem>>, %arg3: memref<288x128xbf16, #tpu.memory_space<vmem>>, %arg4: memref<1x128xf32, #tpu.memory_space<vmem>>, %arg5: memref<16x128xbf16, #tpu.memory_space<vmem>>) attributes {dimension_semantics = [#tpu.dimension_semantics<parallel>, #tpu.dimension_semantics<parallel>], iteration_bounds = array<i64: 2, 1>, scalar_prefetch = 0 : i64, scratch_operands = 0 : i64, tpu.core_type = #tpu.core_type<tc>, window_params = [{transform_indices = @transform_0, window_bounds = array<i64: 16, 288>}, {transform_indices = @transform_1, window_bounds = array<i64: 288, 128>}, {transform_indices = @transform_2, window_bounds = array<i64: 1, 128>}, {transform_indices = @transform_3, window_bounds = array<i64: 16, 128>}]} {
    %c0 = arith.constant 0 : index
    %c0_0 = arith.constant 0 : index
    %0 = vector.load %arg2[%c0, %c0_0] : memref<16x288xbf16, #tpu.memory_space<vmem>>, vector<16x288xbf16>
    %c0_1 = arith.constant 0 : index
    %c0_2 = arith.constant 0 : index
    %1 = vector.load %arg3[%c0_1, %c0_2] : memref<288x128xbf16, #tpu.memory_space<vmem>>, vector<288x128xbf16>
    %cst = arith.constant dense<0.000000e+00> : vector<16x128xf32>
    %2 = tpu.matmul %0, %1, %cst {dimension_numbers = #tpu.dot_dimension_numbers<[1], [0], [0], [1], [0, 0, 1, 1], [], []>} : vector<16x288xbf16>, vector<288x128xbf16>, vector<16x128xf32> -> vector<16x128xf32>
    %c0_3 = arith.constant 0 : index
    %c0_4 = arith.constant 0 : index
    %3 = vector.load %arg4[%c0_3, %c0_4] : memref<1x128xf32, #tpu.memory_space<vmem>>, vector<1x128xf32>
    %4 = vector.broadcast %3 : vector<1x128xf32> to vector<16x128xf32>
    %5 = arith.addf %2, %4 : vector<16x128xf32>
    %cst_5 = arith.constant dense<0.000000e+00> : vector<128xf32>
    %6 = vector.multi_reduction <add>, %5, %cst_5 [0] : vector<16x128xf32> to vector<128xf32>
    %7 = vector.shape_cast %6 : vector<128xf32> to vector<1x128xf32>
    %cst_6 = arith.constant 1.600000e+01 : f32
    %8 = vector.broadcast %cst_6 : f32 to vector<1x128xf32>
    %9 = arith.divf %7, %8 : vector<1x128xf32>
    %10 = vector.broadcast %9 : vector<1x128xf32> to vector<16x128xf32>
    %11 = arith.subf %5, %10 : vector<16x128xf32>
    %12 = arith.mulf %11, %11 : vector<16x128xf32>
    %cst_7 = arith.constant dense<0.000000e+00> : vector<128xf32>
    %13 = vector.multi_reduction <add>, %12, %cst_7 [0] : vector<16x128xf32> to vector<128xf32>
    %14 = vector.shape_cast %13 : vector<128xf32> to vector<1x128xf32>
    %cst_8 = arith.constant 1.600000e+01 : f32
    %15 = vector.broadcast %cst_8 : f32 to vector<1x128xf32>
    %16 = arith.divf %14, %15 : vector<1x128xf32>
    %cst_9 = arith.constant 9.99999974E-6 : f32
    %17 = vector.broadcast %cst_9 : f32 to vector<1x128xf32>
    %18 = arith.addf %16, %17 : vector<1x128xf32>
    %19 = math.rsqrt %18 : vector<1x128xf32>
    %20 = vector.broadcast %19 : vector<1x128xf32> to vector<16x128xf32>
    %21 = arith.mulf %11, %20 : vector<16x128xf32>
    %cst_10 = arith.constant 0.000000e+00 : f32
    %22 = vector.broadcast %cst_10 : f32 to vector<16x128xf32>
    %23 = arith.cmpf oge, %21, %22 : vector<16x128xf32>
    %cst_11 = arith.constant 0.00999999977 : f32
    %24 = vector.broadcast %cst_11 : f32 to vector<16x128xf32>
    %25 = arith.mulf %24, %21 : vector<16x128xf32>
    %26 = arith.select %23, %21, %25 : vector<16x128xi1>, vector<16x128xf32>
    %27 = arith.truncf %26 : vector<16x128xf32> to vector<16x128xbf16>
    %c0_12 = arith.constant 0 : index
    %c0_13 = arith.constant 0 : index
    %28 = vector.load %arg5[%c0_12, %c0_13] : memref<16x128xbf16, #tpu.memory_space<vmem>>, vector<16x128xbf16>
    tpu.vector_store %arg5[%c0_12, %c0_13], %27 {strides = array<i32>} : memref<16x128xbf16, #tpu.memory_space<vmem>>, vector<16x128xbf16>,
    return
  }
  func.func @transform_0(%arg0: i32, %arg1: i32) -> (i32, i32) {
    %c0_i32 = arith.constant 0 : i32
    %c0_i32_0 = arith.constant 0 : i32
    return %arg0, %c0_i32 : i32, i32
  }
  func.func @transform_1(%arg0: i32, %arg1: i32) -> (i32, i32) {
    %c0_i32 = arith.constant 0 : i32
    %c0_i32_0 = arith.constant 0 : i32
    return %c0_i32, %arg1 : i32, i32
  }
  func.func @transform_2(%arg0: i32, %arg1: i32) -> (i32, i32) {
    %c0_i32 = arith.constant 0 : i32
    %c0_i32_0 = arith.constant 0 : i32
    return %c0_i32, %arg1 : i32, i32
  }
  func.func @transform_3(%arg0: i32, %arg1: i32) -> (i32, i32) {
    %c0_i32 = arith.constant 0 : i32
    return %arg0, %arg1 : i32, i32
  }
}

module attributes {stable_mosaic.version = 11 : i64} {
  func.func @_fused_conv_kernel(%arg0: i32, %arg1: i32, %arg2: memref<16x32xbf16, #tpu.memory_space<vmem>>, %arg3: memref<32x128xbf16, #tpu.memory_space<vmem>>, %arg4: memref<1x128xf32, #tpu.memory_space<vmem>>, %arg5: memref<16x128xbf16, #tpu.memory_space<vmem>>) attributes {dimension_semantics = [#tpu.dimension_semantics<parallel>, #tpu.dimension_semantics<parallel>], iteration_bounds = array<i64: 2, 1>, scalar_prefetch = 0 : i64, scratch_operands = 0 : i64, tpu.core_type = #tpu.core_type<tc>, window_params = [{transform_indices = @transform_0, window_bounds = array<i64: 16, 32>}, {transform_indices = @transform_1, window_bounds = array<i64: 32, 128>}, {transform_indices = @transform_2, window_bounds = array<i64: 1, 128>}, {transform_indices = @transform_3, window_bounds = array<i64: 16, 128>}]} {
    %c0 = arith.constant 0 : index
    %c0_0 = arith.constant 0 : index
    %0 = vector.load %arg2[%c0, %c0_0] : memref<16x32xbf16, #tpu.memory_space<vmem>>, vector<16x32xbf16>
    %c0_1 = arith.constant 0 : index
    %c0_2 = arith.constant 0 : index
    %1 = vector.load %arg3[%c0_1, %c0_2] : memref<32x128xbf16, #tpu.memory_space<vmem>>, vector<32x128xbf16>
    %cst = arith.constant dense<0.000000e+00> : vector<16x128xf32>
    %2 = tpu.matmul %0, %1, %cst {dimension_numbers = #tpu.dot_dimension_numbers<[1], [0], [0], [1], [0, 0, 1, 1], [], []>} : vector<16x32xbf16>, vector<32x128xbf16>, vector<16x128xf32> -> vector<16x128xf32>
    %c0_3 = arith.constant 0 : index
    %c0_4 = arith.constant 0 : index
    %3 = vector.load %arg4[%c0_3, %c0_4] : memref<1x128xf32, #tpu.memory_space<vmem>>, vector<1x128xf32>
    %4 = vector.broadcast %3 : vector<1x128xf32> to vector<16x128xf32>
    %5 = arith.addf %2, %4 : vector<16x128xf32>
    %6 = arith.truncf %5 : vector<16x128xf32> to vector<16x128xbf16>
    %c0_5 = arith.constant 0 : index
    %c0_6 = arith.constant 0 : index
    %7 = vector.load %arg5[%c0_5, %c0_6] : memref<16x128xbf16, #tpu.memory_space<vmem>>, vector<16x128xbf16>
    tpu.vector_store %arg5[%c0_5, %c0_6], %6 {strides = array<i32>} : memref<16x128xbf16, #tpu.memory_space<vmem>>, vector<16x128xbf16>,
    return
  }
  func.func @transform_0(%arg0: i32, %arg1: i32) -> (i32, i32) {
    %c0_i32 = arith.constant 0 : i32
    %c0_i32_0 = arith.constant 0 : i32
    return %arg0, %c0_i32 : i32, i32
  }
  func.func @transform_1(%arg0: i32, %arg1: i32) -> (i32, i32) {
    %c0_i32 = arith.constant 0 : i32
    %c0_i32_0 = arith.constant 0 : i32
    return %c0_i32, %arg1 : i32, i32
  }
  func.func @transform_2(%arg0: i32, %arg1: i32) -> (i32, i32) {
    %c0_i32 = arith.constant 0 : i32
    %c0_i32_0 = arith.constant 0 : i32
    return %c0_i32, %arg1 : i32, i32
  }
  func.func @transform_3(%arg0: i32, %arg1: i32) -> (i32, i32) {
    %c0_i32 = arith.constant 0 : i32
    return %arg0, %arg1 : i32, i32
  }
}

module attributes {stable_mosaic.version = 11 : i64} {
  func.func @_fused_conv_kernel(%arg0: i32, %arg1: i32, %arg2: memref<64x288xbf16, #tpu.memory_space<vmem>>, %arg3: memref<288x128xbf16, #tpu.memory_space<vmem>>, %arg4: memref<1x128xf32, #tpu.memory_space<vmem>>, %arg5: memref<64x128xbf16, #tpu.memory_space<vmem>>) attributes {dimension_semantics = [#tpu.dimension_semantics<parallel>, #tpu.dimension_semantics<parallel>], iteration_bounds = array<i64: 2, 1>, scalar_prefetch = 0 : i64, scratch_operands = 0 : i64, tpu.core_type = #tpu.core_type<tc>, window_params = [{transform_indices = @transform_0, window_bounds = array<i64: 64, 288>}, {transform_indices = @transform_1, window_bounds = array<i64: 288, 128>}, {transform_indices = @transform_2, window_bounds = array<i64: 1, 128>}, {transform_indices = @transform_3, window_bounds = array<i64: 64, 128>}]} {
    %c0 = arith.constant 0 : index
    %c0_0 = arith.constant 0 : index
    %0 = vector.load %arg2[%c0, %c0_0] : memref<64x288xbf16, #tpu.memory_space<vmem>>, vector<64x288xbf16>
    %c0_1 = arith.constant 0 : index
    %c0_2 = arith.constant 0 : index
    %1 = vector.load %arg3[%c0_1, %c0_2] : memref<288x128xbf16, #tpu.memory_space<vmem>>, vector<288x128xbf16>
    %cst = arith.constant dense<0.000000e+00> : vector<64x128xf32>
    %2 = tpu.matmul %0, %1, %cst {dimension_numbers = #tpu.dot_dimension_numbers<[1], [0], [0], [1], [0, 0, 1, 1], [], []>} : vector<64x288xbf16>, vector<288x128xbf16>, vector<64x128xf32> -> vector<64x128xf32>
    %c0_3 = arith.constant 0 : index
    %c0_4 = arith.constant 0 : index
    %3 = vector.load %arg4[%c0_3, %c0_4] : memref<1x128xf32, #tpu.memory_space<vmem>>, vector<1x128xf32>
    %4 = vector.broadcast %3 : vector<1x128xf32> to vector<64x128xf32>
    %5 = arith.addf %2, %4 : vector<64x128xf32>
    %cst_5 = arith.constant dense<0.000000e+00> : vector<128xf32>
    %6 = vector.multi_reduction <add>, %5, %cst_5 [0] : vector<64x128xf32> to vector<128xf32>
    %7 = vector.shape_cast %6 : vector<128xf32> to vector<1x128xf32>
    %cst_6 = arith.constant 6.400000e+01 : f32
    %8 = vector.broadcast %cst_6 : f32 to vector<1x128xf32>
    %9 = arith.divf %7, %8 : vector<1x128xf32>
    %10 = vector.broadcast %9 : vector<1x128xf32> to vector<64x128xf32>
    %11 = arith.subf %5, %10 : vector<64x128xf32>
    %12 = arith.mulf %11, %11 : vector<64x128xf32>
    %cst_7 = arith.constant dense<0.000000e+00> : vector<128xf32>
    %13 = vector.multi_reduction <add>, %12, %cst_7 [0] : vector<64x128xf32> to vector<128xf32>
    %14 = vector.shape_cast %13 : vector<128xf32> to vector<1x128xf32>
    %cst_8 = arith.constant 6.400000e+01 : f32
    %15 = vector.broadcast %cst_8 : f32 to vector<1x128xf32>
    %16 = arith.divf %14, %15 : vector<1x128xf32>
    %cst_9 = arith.constant 9.99999974E-6 : f32
    %17 = vector.broadcast %cst_9 : f32 to vector<1x128xf32>
    %18 = arith.addf %16, %17 : vector<1x128xf32>
    %19 = math.rsqrt %18 : vector<1x128xf32>
    %20 = vector.broadcast %19 : vector<1x128xf32> to vector<64x128xf32>
    %21 = arith.mulf %11, %20 : vector<64x128xf32>
    %cst_10 = arith.constant 0.000000e+00 : f32
    %22 = vector.broadcast %cst_10 : f32 to vector<64x128xf32>
    %23 = arith.cmpf oge, %21, %22 : vector<64x128xf32>
    %cst_11 = arith.constant 0.00999999977 : f32
    %24 = vector.broadcast %cst_11 : f32 to vector<64x128xf32>
    %25 = arith.mulf %24, %21 : vector<64x128xf32>
    %26 = arith.select %23, %21, %25 : vector<64x128xi1>, vector<64x128xf32>
    %27 = arith.truncf %26 : vector<64x128xf32> to vector<64x128xbf16>
    %c0_12 = arith.constant 0 : index
    %c0_13 = arith.constant 0 : index
    %28 = vector.load %arg5[%c0_12, %c0_13] : memref<64x128xbf16, #tpu.memory_space<vmem>>, vector<64x128xbf16>
    tpu.vector_store %arg5[%c0_12, %c0_13], %27 {strides = array<i32>} : memref<64x128xbf16, #tpu.memory_space<vmem>>, vector<64x128xbf16>,
    return
  }
  func.func @transform_0(%arg0: i32, %arg1: i32) -> (i32, i32) {
    %c0_i32 = arith.constant 0 : i32
    %c0_i32_0 = arith.constant 0 : i32
    return %arg0, %c0_i32 : i32, i32
  }
  func.func @transform_1(%arg0: i32, %arg1: i32) -> (i32, i32) {
    %c0_i32 = arith.constant 0 : i32
    %c0_i32_0 = arith.constant 0 : i32
    return %c0_i32, %arg1 : i32, i32
  }
  func.func @transform_2(%arg0: i32, %arg1: i32) -> (i32, i32) {
    %c0_i32 = arith.constant 0 : i32
    %c0_i32_0 = arith.constant 0 : i32
    return %c0_i32, %arg1 : i32, i32
  }
  func.func @transform_3(%arg0: i32, %arg1: i32) -> (i32, i32) {
    %c0_i32 = arith.constant 0 : i32
    return %arg0, %arg1 : i32, i32
  }
}

module attributes {stable_mosaic.version = 11 : i64} {
  func.func @_fused_conv_kernel(%arg0: i32, %arg1: i32, %arg2: memref<64x16xbf16, #tpu.memory_space<vmem>>, %arg3: memref<16x128xbf16, #tpu.memory_space<vmem>>, %arg4: memref<1x128xf32, #tpu.memory_space<vmem>>, %arg5: memref<64x128xbf16, #tpu.memory_space<vmem>>) attributes {dimension_semantics = [#tpu.dimension_semantics<parallel>, #tpu.dimension_semantics<parallel>], iteration_bounds = array<i64: 2, 1>, scalar_prefetch = 0 : i64, scratch_operands = 0 : i64, tpu.core_type = #tpu.core_type<tc>, window_params = [{transform_indices = @transform_0, window_bounds = array<i64: 64, 16>}, {transform_indices = @transform_1, window_bounds = array<i64: 16, 128>}, {transform_indices = @transform_2, window_bounds = array<i64: 1, 128>}, {transform_indices = @transform_3, window_bounds = array<i64: 64, 128>}]} {
    %c0 = arith.constant 0 : index
    %c0_0 = arith.constant 0 : index
    %0 = vector.load %arg2[%c0, %c0_0] : memref<64x16xbf16, #tpu.memory_space<vmem>>, vector<64x16xbf16>
    %c0_1 = arith.constant 0 : index
    %c0_2 = arith.constant 0 : index
    %1 = vector.load %arg3[%c0_1, %c0_2] : memref<16x128xbf16, #tpu.memory_space<vmem>>, vector<16x128xbf16>
    %cst = arith.constant dense<0.000000e+00> : vector<64x128xf32>
    %2 = tpu.matmul %0, %1, %cst {dimension_numbers = #tpu.dot_dimension_numbers<[1], [0], [0], [1], [0, 0, 1, 1], [], []>} : vector<64x16xbf16>, vector<16x128xbf16>, vector<64x128xf32> -> vector<64x128xf32>
    %c0_3 = arith.constant 0 : index
    %c0_4 = arith.constant 0 : index
    %3 = vector.load %arg4[%c0_3, %c0_4] : memref<1x128xf32, #tpu.memory_space<vmem>>, vector<1x128xf32>
    %4 = vector.broadcast %3 : vector<1x128xf32> to vector<64x128xf32>
    %5 = arith.addf %2, %4 : vector<64x128xf32>
    %6 = arith.truncf %5 : vector<64x128xf32> to vector<64x128xbf16>
    %c0_5 = arith.constant 0 : index
    %c0_6 = arith.constant 0 : index
    %7 = vector.load %arg5[%c0_5, %c0_6] : memref<64x128xbf16, #tpu.memory_space<vmem>>, vector<64x128xbf16>
    tpu.vector_store %arg5[%c0_5, %c0_6], %6 {strides = array<i32>} : memref<64x128xbf16, #tpu.memory_space<vmem>>, vector<64x128xbf16>,
    return
  }
  func.func @transform_0(%arg0: i32, %arg1: i32) -> (i32, i32) {
    %c0_i32 = arith.constant 0 : i32
    %c0_i32_0 = arith.constant 0 : i32
    return %arg0, %c0_i32 : i32, i32
  }
  func.func @transform_1(%arg0: i32, %arg1: i32) -> (i32, i32) {
    %c0_i32 = arith.constant 0 : i32
    %c0_i32_0 = arith.constant 0 : i32
    return %c0_i32, %arg1 : i32, i32
  }
  func.func @transform_2(%arg0: i32, %arg1: i32) -> (i32, i32) {
    %c0_i32 = arith.constant 0 : i32
    %c0_i32_0 = arith.constant 0 : i32
    return %c0_i32, %arg1 : i32, i32
  }
  func.func @transform_3(%arg0: i32, %arg1: i32) -> (i32, i32) {
    %c0_i32 = arith.constant 0 : i32
    return %arg0, %arg1 : i32, i32
  }
}

module attributes {stable_mosaic.version = 11 : i64} {
  func.func @_fused_conv_kernel(%arg0: i32, %arg1: i32, %arg2: memref<256x144xbf16, #tpu.memory_space<vmem>>, %arg3: memref<144x128xbf16, #tpu.memory_space<vmem>>, %arg4: memref<1x128xf32, #tpu.memory_space<vmem>>, %arg5: memref<256x128xbf16, #tpu.memory_space<vmem>>) attributes {dimension_semantics = [#tpu.dimension_semantics<parallel>, #tpu.dimension_semantics<parallel>], iteration_bounds = array<i64: 2, 1>, scalar_prefetch = 0 : i64, scratch_operands = 0 : i64, tpu.core_type = #tpu.core_type<tc>, window_params = [{transform_indices = @transform_0, window_bounds = array<i64: 256, 144>}, {transform_indices = @transform_1, window_bounds = array<i64: 144, 128>}, {transform_indices = @transform_2, window_bounds = array<i64: 1, 128>}, {transform_indices = @transform_3, window_bounds = array<i64: 256, 128>}]} {
    %c0 = arith.constant 0 : index
    %c0_0 = arith.constant 0 : index
    %0 = vector.load %arg2[%c0, %c0_0] : memref<256x144xbf16, #tpu.memory_space<vmem>>, vector<256x144xbf16>
    %c0_1 = arith.constant 0 : index
    %c0_2 = arith.constant 0 : index
    %1 = vector.load %arg3[%c0_1, %c0_2] : memref<144x128xbf16, #tpu.memory_space<vmem>>, vector<144x128xbf16>
    %cst = arith.constant dense<0.000000e+00> : vector<256x128xf32>
    %2 = tpu.matmul %0, %1, %cst {dimension_numbers = #tpu.dot_dimension_numbers<[1], [0], [0], [1], [0, 0, 1, 1], [], []>} : vector<256x144xbf16>, vector<144x128xbf16>, vector<256x128xf32> -> vector<256x128xf32>
    %c0_3 = arith.constant 0 : index
    %c0_4 = arith.constant 0 : index
    %3 = vector.load %arg4[%c0_3, %c0_4] : memref<1x128xf32, #tpu.memory_space<vmem>>, vector<1x128xf32>
    %4 = vector.broadcast %3 : vector<1x128xf32> to vector<256x128xf32>
    %5 = arith.addf %2, %4 : vector<256x128xf32>
    %cst_5 = arith.constant dense<0.000000e+00> : vector<128xf32>
    %6 = vector.multi_reduction <add>, %5, %cst_5 [0] : vector<256x128xf32> to vector<128xf32>
    %7 = vector.shape_cast %6 : vector<128xf32> to vector<1x128xf32>
    %cst_6 = arith.constant 2.560000e+02 : f32
    %8 = vector.broadcast %cst_6 : f32 to vector<1x128xf32>
    %9 = arith.divf %7, %8 : vector<1x128xf32>
    %10 = vector.broadcast %9 : vector<1x128xf32> to vector<256x128xf32>
    %11 = arith.subf %5, %10 : vector<256x128xf32>
    %12 = arith.mulf %11, %11 : vector<256x128xf32>
    %cst_7 = arith.constant dense<0.000000e+00> : vector<128xf32>
    %13 = vector.multi_reduction <add>, %12, %cst_7 [0] : vector<256x128xf32> to vector<128xf32>
    %14 = vector.shape_cast %13 : vector<128xf32> to vector<1x128xf32>
    %cst_8 = arith.constant 2.560000e+02 : f32
    %15 = vector.broadcast %cst_8 : f32 to vector<1x128xf32>
    %16 = arith.divf %14, %15 : vector<1x128xf32>
    %cst_9 = arith.constant 9.99999974E-6 : f32
    %17 = vector.broadcast %cst_9 : f32 to vector<1x128xf32>
    %18 = arith.addf %16, %17 : vector<1x128xf32>
    %19 = math.rsqrt %18 : vector<1x128xf32>
    %20 = vector.broadcast %19 : vector<1x128xf32> to vector<256x128xf32>
    %21 = arith.mulf %11, %20 : vector<256x128xf32>
    %cst_10 = arith.constant 0.000000e+00 : f32
    %22 = vector.broadcast %cst_10 : f32 to vector<256x128xf32>
    %23 = arith.cmpf oge, %21, %22 : vector<256x128xf32>
    %cst_11 = arith.constant 0.00999999977 : f32
    %24 = vector.broadcast %cst_11 : f32 to vector<256x128xf32>
    %25 = arith.mulf %24, %21 : vector<256x128xf32>
    %26 = arith.select %23, %21, %25 : vector<256x128xi1>, vector<256x128xf32>
    %27 = arith.truncf %26 : vector<256x128xf32> to vector<256x128xbf16>
    %c0_12 = arith.constant 0 : index
    %c0_13 = arith.constant 0 : index
    %28 = vector.load %arg5[%c0_12, %c0_13] : memref<256x128xbf16, #tpu.memory_space<vmem>>, vector<256x128xbf16>
    tpu.vector_store %arg5[%c0_12, %c0_13], %27 {strides = array<i32>} : memref<256x128xbf16, #tpu.memory_space<vmem>>, vector<256x128xbf16>,
    return
  }
  func.func @transform_0(%arg0: i32, %arg1: i32) -> (i32, i32) {
    %c0_i32 = arith.constant 0 : i32
    %c0_i32_0 = arith.constant 0 : i32
    return %arg0, %c0_i32 : i32, i32
  }
  func.func @transform_1(%arg0: i32, %arg1: i32) -> (i32, i32) {
    %c0_i32 = arith.constant 0 : i32
    %c0_i32_0 = arith.constant 0 : i32
    return %c0_i32, %arg1 : i32, i32
  }
  func.func @transform_2(%arg0: i32, %arg1: i32) -> (i32, i32) {
    %c0_i32 = arith.constant 0 : i32
    %c0_i32_0 = arith.constant 0 : i32
    return %c0_i32, %arg1 : i32, i32
  }
  func.func @transform_3(%arg0: i32, %arg1: i32) -> (i32, i32) {
    %c0_i32 = arith.constant 0 : i32
    return %arg0, %arg1 : i32, i32
  }
}

module attributes {stable_mosaic.version = 11 : i64} {
  func.func @_fused_conv_kernel(%arg0: i32, %arg1: i32, %arg2: memref<256x8xbf16, #tpu.memory_space<vmem>>, %arg3: memref<8x128xbf16, #tpu.memory_space<vmem>>, %arg4: memref<1x128xf32, #tpu.memory_space<vmem>>, %arg5: memref<256x128xf32, #tpu.memory_space<vmem>>) attributes {dimension_semantics = [#tpu.dimension_semantics<parallel>, #tpu.dimension_semantics<parallel>], iteration_bounds = array<i64: 2, 1>, scalar_prefetch = 0 : i64, scratch_operands = 0 : i64, tpu.core_type = #tpu.core_type<tc>, window_params = [{transform_indices = @transform_0, window_bounds = array<i64: 256, 8>}, {transform_indices = @transform_1, window_bounds = array<i64: 8, 128>}, {transform_indices = @transform_2, window_bounds = array<i64: 1, 128>}, {transform_indices = @transform_3, window_bounds = array<i64: 256, 128>}]} {
    %c0 = arith.constant 0 : index
    %c0_0 = arith.constant 0 : index
    %0 = vector.load %arg2[%c0, %c0_0] : memref<256x8xbf16, #tpu.memory_space<vmem>>, vector<256x8xbf16>
    %c0_1 = arith.constant 0 : index
    %c0_2 = arith.constant 0 : index
    %1 = vector.load %arg3[%c0_1, %c0_2] : memref<8x128xbf16, #tpu.memory_space<vmem>>, vector<8x128xbf16>
    %cst = arith.constant dense<0.000000e+00> : vector<256x128xf32>
    %2 = tpu.matmul %0, %1, %cst {dimension_numbers = #tpu.dot_dimension_numbers<[1], [0], [0], [1], [0, 0, 1, 1], [], []>} : vector<256x8xbf16>, vector<8x128xbf16>, vector<256x128xf32> -> vector<256x128xf32>
    %c0_3 = arith.constant 0 : index
    %c0_4 = arith.constant 0 : index
    %3 = vector.load %arg4[%c0_3, %c0_4] : memref<1x128xf32, #tpu.memory_space<vmem>>, vector<1x128xf32>
    %4 = vector.broadcast %3 : vector<1x128xf32> to vector<256x128xf32>
    %5 = arith.addf %2, %4 : vector<256x128xf32>
    %c0_5 = arith.constant 0 : index
    %c0_6 = arith.constant 0 : index
    %6 = vector.load %arg5[%c0_5, %c0_6] : memref<256x128xf32, #tpu.memory_space<vmem>>, vector<256x128xf32>
    tpu.vector_store %arg5[%c0_5, %c0_6], %5 {strides = array<i32>} : memref<256x128xf32, #tpu.memory_space<vmem>>, vector<256x128xf32>,
    return
  }
  func.func @transform_0(%arg0: i32, %arg1: i32) -> (i32, i32) {
    %c0_i32 = arith.constant 0 : i32
    %c0_i32_0 = arith.constant 0 : i32
    return %arg0, %c0_i32 : i32, i32
  }
  func.func @transform_1(%arg0: i32, %arg1: i32) -> (i32, i32) {
    %c0_i32 = arith.constant 0 : i32
    %c0_i32_0 = arith.constant 0 : i32
    return %c0_i32, %arg1 : i32, i32
  }
  func.func @transform_2(%arg0: i32, %arg1: i32) -> (i32, i32) {
    %c0_i32 = arith.constant 0 : i32
    %c0_i32_0 = arith.constant 0 : i32
    return %c0_i32, %arg1 : i32, i32
  }
  func.func @transform_3(%arg0: i32, %arg1: i32) -> (i32, i32) {
    %c0_i32 = arith.constant 0 : i32
    return %arg0, %arg1 : i32, i32
  }
}

</mosaic_0001>

<bundles_post_ra>
// kernel: unet_forward.13
= control target key start
LH: loop header
LB: loop body
LE: loop exit
PB: predicated region body
PF: predicated region fallthrough
CT: control target
= control target key end

     0   :  { %s1459_s12 = smov 0   ;;  %s1461_s13 = smov 0   ;;  %s2014_s0 = inlined_call_operand.vmem [shape: bf16[512,18], index: 0, kind: input, shape index: {}]   ;;  %s2015_s1 = inlined_call_operand.vmem [shape: bf16[18,128], index: 1, kind: input, shape index: {}]   ;;  %s2016_s2 = inlined_call_operand.vmem [shape: f32[1,128], index: 2, kind: input, shape index: {}]   ;;  %s2017_s3 = inlined_call_operand.vmem [shape: bf16[512,128], index: 3, kind: output, shape index: {}]  }
   0x1   :  { %s1463_s14 = smov 0  }
   0x2 LB: > { %s25_s15 = sadd.s32 1, %s1433_s13  ;;  %p1110_p0 = scmp.ge.s32.totalorder %s1437_s14, 1  ;;  %s1437_s14 = sphi %s1463_s14, %s13_s14   ;;  %s1433_s13 = sphi %s1461_s13, %s2033_s13   ;;  %s1429_s12 = sphi %s1459_s12, %s2032_s12  }
   0x3   : > { %p27_p1 = scmp.ge.s32.totalorder %s25_s15, 2  ;;  %p169_p2 = scmp.lt.s32.totalorder %s1437_s14, 3 }
   0x5   : > { %s2035_s15 = smov (%p27_p1, %s25_s15), 0  ;;  %p170_p3 = pnand %p1110_p0, %p169_p2 }
   0x6   : > { %v1395_v0 = vld [vmem:[%s2015_s1] sm:$0xff] (!%p170_p3)   ;;  %vm406_vm0 = vcmask (!%p170_p3), 1040384   ;;  %v1396_v1 = vld [vmem:[%s2015_s1 + $0x8] ss:$0 sps:$4 sm:$0x11] (!%p170_p3)   ;;  %s1111_s20 = sshll.u32 (!%p170_p3), %s1429_s12, 5 }
   0x7   : > { %173 = sbr.rel (%p170_p3) target bundleno = 453 (0x1c5), region = 32  ;;  %1329 = vmatprep.subr.bf16.mxu0 (!%p170_p3), %v1395_v0  ;;  %p204_p4 = scmp.lt.s32.totalorder (!%p170_p3), %s1111_s20, 63  ;;  %1365 = vmatprep.subr.bf16.mxu1 (!%p170_p3), %v1395_v0  ;;  %v408_v2 = vsel (!%p170_p3), %vm406_vm0, %v1396_v1, 0  ;;  %vm357_vm1 = vcmask (!%p170_p3), 146432   ;;  %v1528_v20 = vld [vmem:[%s2016_s2] ss:$0 sm:$0xff] (!%p170_p3) }
   0x8   : > { %1330 = vmatpush3.bf16.msra.mxu0 (!%p170_p3), %v1395_v0  ;;  %1367 = vmatpush3.bf16.msra.mxu1 (!%p170_p3), %v1395_v0 }
   0x9   : > { %1369 = vmatprep.subr.msk.bf16.mxu0 (!%p170_p3), %vm406_vm0, %v1396_v1  ;;  %1370 = vmatprep.subr.msk.bf16.mxu1 (!%p170_p3), %vm406_vm0, %v1396_v1 }
   0xc   : > { %1332 = vmatpush3.bf16.msra.mxu0 (!%p170_p3), %v408_v2  ;;  %1368 = vmatpush3.bf16.msra.mxu1 (!%p170_p3), %v408_v2 }
   0xe   : > { %s2037_s20 = smov (!%p204_p4, %s1111_s20), 63 }
   0xf   : > { %s1112_s21 = sshll.u32 %s2037_s20, 2 }
  0x10   : > { %s1491_s24 = scalar_lea.vmem %s2014_s0, %s1112_s21  ;;  %s1967_s29 = scalar_lea.vmem %s2017_s3, %s1112_s21 }
  0x11   : > { %v1397_v3 = vld [vmem:[%s1491_s24] sm:$0xff]   ;;  %v1398_v4 = vld [vmem:[%s1491_s24 + $0x8] sm:$0xff]   ;;  %v1399_v5 = vld [vmem:[%s1491_s24 + $0x10] sm:$0xff]  }
  0x12   : > { %1333 = vmatprep.mubr.msk.bf16.mxu0 %vm357_vm1, %v1397_v3  ;;  %v1400_v6 = vld [vmem:[%s1491_s24 + $0x18] sm:$0xff]   ;;  %v1401_v7 = vld [vmem:[%s1491_s24 + $0x20] sm:$0xff]   ;;  %v1406_v9 = vld [vmem:[%s1491_s24 + $0x48] sm:$0xff]  }
  0x13   : > { %1334 = vmatmul.mubr.msk.bf16.vlgmr.msra.gmra.mrb[0].mxu0 %vm357_vm1, %v1398_v4  ;;  %v1405_v8 = vld [vmem:[%s1491_s24 + $0x40] sm:$0xff]   ;;  %v1407_v10 = vld [vmem:[%s1491_s24 + $0x50] sm:$0xff]   ;;  %v1402_v11 = vld [vmem:[%s1491_s24 + $0x28] sm:$0xff]  }
  0x14   : > { %1337 = vmatprep.mubr.msk.bf16.mxu0 %vm357_vm1, %v1399_v5  ;;  %1349 = vmatprep.mubr.msk.bf16.mxu1 %vm357_vm1, %v1405_v8  ;;  %v1408_v12 = vld [vmem:[%s1491_s24 + $0x58] sm:$0xff]   ;;  %v1403_v13 = vld [vmem:[%s1491_s24 + $0x30] sm:$0xff]   ;;  %v1409_v14 = vld [vmem:[%s1491_s24 + $0x60] sm:$0xff]  }
  0x15   : > { %1350 = vmatmul.mubr.msk.bf16.vlgmr.msra.gmra.mrb[0].mxu1 %vm357_vm1, %v1406_v9  ;;  %v1404_v15 = vld [vmem:[%s1491_s24 + $0x38] sm:$0xff]   ;;  %v1410_v16 = vld [vmem:[%s1491_s24 + $0x68] sm:$0xff]   ;;  %v1411_v17 = vld [vmem:[%s1491_s24 + $0x70] sm:$0xff]  }
  0x16   : > { %1353 = vmatprep.mubr.msk.bf16.mxu1 %vm357_vm1, %v1407_v10  ;;  %v1412_v18 = vld [vmem:[%s1491_s24 + $0x78] sm:$0xff]  }
  0x1b   : > { %1338 = vmatmul.mubr.msk.bf16.gmra.mrb[4].mxu0 %vm357_vm1, %v1400_v6 }
  0x1c   : > { %1341 = vmatprep.mubr.msk.bf16.mxu0 %vm357_vm1, %v1401_v7 }
  0x1d   : > { %1354 = vmatmul.mubr.msk.bf16.gmra.mrb[4].mxu1 %vm357_vm1, %v1408_v12 }
  0x1e   : > { %1357 = vmatprep.mubr.msk.bf16.mxu1 %vm357_vm1, %v1409_v14 }
  0x23   : > { %1342 = vmatmul.mubr.msk.bf16.gmra.mrb[8].mxu0 %vm357_vm1, %v1402_v11 }
  0x24   : > { %1345 = vmatprep.mubr.msk.bf16.mxu0 %vm357_vm1, %v1403_v13 }
  0x25   : > { %1358 = vmatmul.mubr.msk.bf16.gmra.mrb[8].mxu1 %vm357_vm1, %v1410_v16 }
  0x26   : > { %1361 = vmatprep.mubr.msk.bf16.mxu1 %vm357_vm1, %v1411_v17 }
  0x2b   : > { %1346 = vmatmul.mubr.msk.bf16.gmra.mrb[12].mxu0 %vm357_vm1, %v1404_v15 }
  0x2d   : > { %1362 = vmatmul.mubr.msk.bf16.gmra.mrb[12].mxu1 %vm357_vm1, %v1412_v18 }
  0xe6   : > { %v1335_v19 = vpop.f32.mrb[0].mxu0 }
  0xe7   : > { %v444_v21 = vpop.f32.mrb[1].mxu0  ;;  %v1537_v26 = vadd.f32 %v1335_v19, %v1528_v20 }
  0xe8   : > { %v1336_v22 = vpop.f32.mrb[2].mxu0  ;;  %v1531_v24 = vadd.f32 %v1528_v20, %v444_v21  ;;  %v1351_v31 = vpop.f32.mrb[0].mxu1 }
  0xe9   : > { %v447_v23 = vpop.f32.mrb[3].mxu0  ;;  %v1542_v28 = vadd.f32 %v1336_v22, %v1528_v20  ;;  %v508_v33 = vpop.f32.mrb[1].mxu1 }
  0xea   : > { %v1534_v25 = vadd.f32 %v1528_v20, %v447_v23  ;;  %v1352_v37 = vpop.f32.mrb[2].mxu1  ;;  %v509_v14 = vadd.f32 %v1528_v20, %v508_v33  ;;  %v517_v23 = vadd.f32 %v1351_v31, %v1528_v20 }
  0xeb   : > { %v511_v39 = vpop.f32.mrb[3].mxu1 }
  0xec   : > { %v571_v27 = vadd.f32 %v1534_v25, %v1531_v24  ;;  %v512_v22 = vadd.f32 %v1528_v20, %v511_v39 }
  0xee   : > { %v572_v29 = vadd.f32 %v571_v27, %v1537_v26  ;;  %v1339_v30 = vpop.f32.mrb[4].mxu0 }
  0xef   : > { %v460_v32 = vpop.f32.mrb[5].mxu0  ;;  %v1554_v42 = vadd.f32 %v1339_v30, %v1528_v20 }
  0xf0   : > { %v1546_v34 = vadd.f32 %v1528_v20, %v460_v32  ;;  %v573_v35 = vadd.f32 %v572_v29, %v1542_v28  ;;  %v1340_v36 = vpop.f32.mrb[6].mxu0  ;;  %v1355_v47 = vpop.f32.mrb[4].mxu1  ;;  %v520_v29 = vadd.f32 %v1352_v37, %v1528_v20 }
  0xf1   : > { %v463_v38 = vpop.f32.mrb[7].mxu0  ;;  %v1558_v44 = vadd.f32 %v1340_v36, %v1528_v20  ;;  %v524_v49 = vpop.f32.mrb[5].mxu1 }
  0xf2   : > { %v574_v40 = vadd.f32 %v573_v35, %v1546_v34  ;;  %v1551_v41 = vadd.f32 %v1528_v20, %v463_v38  ;;  %v1356_v53 = vpop.f32.mrb[6].mxu1  ;;  %v525_v32 = vadd.f32 %v1528_v20, %v524_v49  ;;  %v533_v38 = vadd.f32 %v1355_v47, %v1528_v20 }
  0xf3   : > { %v527_v55 = vpop.f32.mrb[7].mxu1 }
  0xf4   : > { %v575_v43 = vadd.f32 %v574_v40, %v1551_v41  ;;  %v528_v33 = vadd.f32 %v1528_v20, %v527_v55 }
  0xf6   : > { %v576_v45 = vadd.f32 %v575_v43, %v1554_v42  ;;  %v1343_v46 = vpop.f32.mrb[8].mxu0  ;;  %v536_v43 = vadd.f32 %v1356_v53, %v1528_v20 }
  0xf7   : > { %v476_v48 = vpop.f32.mrb[9].mxu0  ;;  %v1570_v58 = vadd.f32 %v1343_v46, %v1528_v20 }
  0xf8   : > { %v1562_v50 = vadd.f32 %v1528_v20, %v476_v48  ;;  %v577_v51 = vadd.f32 %v576_v45, %v1558_v44  ;;  %v1344_v52 = vpop.f32.mrb[10].mxu0  ;;  %v1359_v63 = vpop.f32.mrb[8].mxu1 }
  0xf9   : > { %v479_v54 = vpop.f32.mrb[11].mxu0  ;;  %v1574_v60 = vadd.f32 %v1344_v52, %v1528_v20  ;;  %v540_v1 = vpop.f32.mrb[9].mxu1  ;;  %v549_v37 = vadd.f32 %v1359_v63, %v1528_v20 }
  0xfa   : > { %v578_v56 = vadd.f32 %v577_v51, %v1562_v50  ;;  %v1567_v57 = vadd.f32 %v1528_v20, %v479_v54  ;;  %v1360_v5 = vpop.f32.mrb[10].mxu1  ;;  %v541_v39 = vadd.f32 %v1528_v20, %v540_v1 }
  0xfb   : > { %v543_v7 = vpop.f32.mrb[11].mxu1  ;;  %v552_v49 = vadd.f32 %v1360_v5, %v1528_v20 }
  0xfc   : > { %v579_v59 = vadd.f32 %v578_v56, %v1567_v57  ;;  %v544_v48 = vadd.f32 %v1528_v20, %v543_v7 }
  0xfe   : > { %v580_v61 = vadd.f32 %v579_v59, %v1570_v58  ;;  %v1347_v62 = vpop.f32.mrb[12].mxu0 }
  0xff   : > { %v492_v0 = vpop.f32.mrb[13].mxu0  ;;  %v501_v10 = vadd.f32 %v1347_v62, %v1528_v20 }
 0x100   : > { %v493_v2 = vadd.f32 %v1528_v20, %v492_v0  ;;  %v581_v3 = vadd.f32 %v580_v61, %v1574_v60  ;;  %v1348_v4 = vpop.f32.mrb[14].mxu0  ;;  %v1363_v15 = vpop.f32.mrb[12].mxu1 }
 0x101   : > { %v495_v6 = vpop.f32.mrb[15].mxu0  ;;  %v504_v12 = vadd.f32 %v1348_v4, %v1528_v20  ;;  %v556_v16 = vpop.f32.mrb[13].mxu1  ;;  %v565_v53 = vadd.f32 %v1363_v15, %v1528_v20 }
 0x102   : > { %v582_v8 = vadd.f32 %v581_v3, %v493_v2  ;;  %v496_v9 = vadd.f32 %v1528_v20, %v495_v6  ;;  %v1364_v18 = vpop.f32.mrb[14].mxu1  ;;  %v557_v54 = vadd.f32 %v1528_v20, %v556_v16 }
 0x103   : > { %v559_v19 = vpop.f32.mrb[15].mxu1  ;;  %v568_v61 = vadd.f32 %v1364_v18, %v1528_v20 }
 0x104   : > { %v583_v11 = vadd.f32 %v582_v8, %v496_v9  ;;  %v560_v56 = vadd.f32 %v1528_v20, %v559_v19 }
 0x106   : > { %v584_v13 = vadd.f32 %v583_v11, %v501_v10 }
 0x108   : > { %v585_v17 = vadd.f32 %v584_v13, %v504_v12 }
 0x10a   : > { %v586_v21 = vadd.f32 %v585_v17, %v509_v14 }
 0x10c   : > { %v587_v27 = vadd.f32 %v586_v21, %v512_v22 }
 0x10e   : > { %v588_v30 = vadd.f32 %v587_v27, %v517_v23 }
 0x110   : > { %v589_v35 = vadd.f32 %v588_v30, %v520_v29 }
 0x112   : > { %v590_v36 = vadd.f32 %v589_v35, %v525_v32 }
 0x114   : > { %v591_v40 = vadd.f32 %v590_v36, %v528_v33 }
 0x116   : > { %v592_v45 = vadd.f32 %v591_v40, %v533_v38 }
 0x118   : > { %v593_v46 = vadd.f32 %v592_v45, %v536_v43 }
 0x11a   : > { %v594_v31 = vadd.f32 %v593_v46, %v541_v39 }
 0x11c   : > { %v595_v51 = vadd.f32 %v594_v31, %v544_v48 }
 0x11e   : > { %v596_v52 = vadd.f32 %v595_v51, %v549_v37 }
 0x120   : > { %v597_v55 = vadd.f32 %v596_v52, %v552_v49 }
 0x122   : > { %v598_v47 = vadd.f32 %v597_v55, %v557_v54 }
 0x124   : > { %v599_v59 = vadd.f32 %v598_v47, %v560_v56 }
 0x126   : > { %v600_v62 = vadd.f32 %v599_v59, %v565_v53 }
 0x128   : > { %v601_v0 = vadd.f32 %v600_v62, %v568_v61 }
 0x12a   : > { %v602_v1 = vrot.slane %v601_v0, 4 }
 0x12c   : > { %v603_v3 = vadd.f32 %v602_v1, %v601_v0 }
 0x12e   : > { %v604_v63 = vrot.slane %v603_v3, 2 }
 0x130   : > { %v605_v4 = vadd.f32 %v604_v63, %v603_v3 }
 0x132   : > { %v606_v6 = vrot.slane %v605_v4, 1 }
 0x134   : > { %v607_v5 = vadd.f32 %v606_v6, %v605_v4 }
 0x136   : > { %v609_v7 = vmul.f32 0.00390625, %v607_v5 }
 0x138   : > { %v1599_v8 = vsub.f32 %v1562_v50, %v609_v7  ;;  %v1602_v11 = vsub.f32 %v1567_v57, %v609_v7  ;;  %v1605_v13 = vsub.f32 %v1570_v58, %v609_v7  ;;  %v1608_v20 = vsub.f32 %v1574_v60, %v609_v7 }
 0x139   : > { %v1610_v15 = vsub.f32 %v493_v2, %v609_v7  ;;  %v1612_v16 = vsub.f32 %v496_v9, %v609_v7  ;;  %v1614_v17 = vsub.f32 %v501_v10, %v609_v7  ;;  %v1616_v18 = vsub.f32 %v504_v12, %v609_v7 }
 0x13a   : > { %v1618_v19 = vsub.f32 %v509_v14, %v609_v7  ;;  %v1620_v50 = vsub.f32 %v512_v22, %v609_v7  ;;  %v1622_v57 = vsub.f32 %v517_v23, %v609_v7  ;;  %v1624_v21 = vsub.f32 %v520_v29, %v609_v7 }
 0x13b   : > { %v1626_v58 = vsub.f32 %v525_v32, %v609_v7  ;;  %v1628_v60 = vsub.f32 %v528_v33, %v609_v7  ;;  %v1630_v2 = vsub.f32 %v533_v38, %v609_v7  ;;  %v1632_v9 = vsub.f32 %v536_v43, %v609_v7 }
 0x13c   : > { %v1634_v10 = vsub.f32 %v541_v39, %v609_v7  ;;  %v1636_v12 = vsub.f32 %v544_v48, %v609_v7  ;;  %v1638_v14 = vsub.f32 %v549_v37, %v609_v7  ;;  %v1640_v22 = vsub.f32 %v552_v49, %v609_v7 }
 0x13d   : > { %v1642_v23 = vsub.f32 %v557_v54, %v609_v7  ;;  %v1644_v27 = vsub.f32 %v560_v56, %v609_v7  ;;  %v1646_v29 = vsub.f32 %v565_v53, %v609_v7  ;;  %v1648_v30 = vsub.f32 %v568_v61, %v609_v7 }
 0x13e   : > { %v1651_v32 = vsub.f32 %v1531_v24, %v609_v7  ;;  %v1654_v35 = vsub.f32 %v1534_v25, %v609_v7  ;;  %v1657_v36 = vsub.f32 %v1537_v26, %v609_v7  ;;  %v1664_v40 = vsub.f32 %v1542_v28, %v609_v7 }
 0x13f   : > { %v1667_v43 = vsub.f32 %v1546_v34, %v609_v7  ;;  %v1672_v45 = vsub.f32 %v1551_v41, %v609_v7  ;;  %v1677_v46 = vsub.f32 %v1554_v42, %v609_v7  ;;  %v1682_v34 = vsub.f32 %v1558_v44, %v609_v7 }
 0x140   : > { %v642_v33 = vmul.f32 %v1651_v32, %v1651_v32  ;;  %v643_v38 = vmul.f32 %v1654_v35, %v1654_v35  ;;  %v644_v24 = vmul.f32 %v1657_v36, %v1657_v36  ;;  %v645_v26 = vmul.f32 %v1664_v40, %v1664_v40 }
 0x141   : > { %v646_v28 = vmul.f32 %v1667_v43, %v1667_v43  ;;  %v647_v48 = vmul.f32 %v1672_v45, %v1672_v45  ;;  %v648_v41 = vmul.f32 %v1677_v46, %v1677_v46  ;;  %v649_v49 = vmul.f32 %v1682_v34, %v1682_v34 }
 0x142   : > { %v674_v25 = vadd.f32 %v643_v38, %v642_v33  ;;  %v650_v52 = vmul.f32 %v1599_v8, %v1599_v8  ;;  %v651_v44 = vmul.f32 %v1602_v11, %v1602_v11  ;;  %v652_v47 = vmul.f32 %v1605_v13, %v1605_v13 }
 0x143   : > { %v653_v53 = vmul.f32 %v1608_v20, %v1608_v20  ;;  %v654_v61 = vmul.f32 %v1610_v15, %v1610_v15  ;;  %v655_v0 = vmul.f32 %v1612_v16, %v1612_v16  ;;  %v656_v3 = vmul.f32 %v1614_v17, %v1614_v17 }
 0x144   : > { %v675_v39 = vadd.f32 %v674_v25, %v644_v24  ;;  %v657_v4 = vmul.f32 %v1616_v18, %v1616_v18  ;;  %v658_v5 = vmul.f32 %v1618_v19, %v1618_v19  ;;  %v659_v33 = vmul.f32 %v1620_v50, %v1620_v50 }
 0x145   : > { %v660_v24 = vmul.f32 %v1622_v57, %v1622_v57 }
 0x146   : > { %v676_v31 = vadd.f32 %v675_v39, %v645_v26  ;;  %v661_v26 = vmul.f32 %v1624_v21, %v1624_v21 }
 0x148   : > { %v677_v37 = vadd.f32 %v676_v31, %v646_v28  ;;  %v662_v28 = vmul.f32 %v1626_v58, %v1626_v58 }
 0x14a   : > { %v678_v51 = vadd.f32 %v677_v37, %v647_v48  ;;  %v663_v48 = vmul.f32 %v1628_v60, %v1628_v60 }
 0x14c   : > { %v679_v42 = vadd.f32 %v678_v51, %v648_v41  ;;  %v664_v41 = vmul.f32 %v1630_v2, %v1630_v2 }
 0x14e   : > { %v680_v54 = vadd.f32 %v679_v42, %v649_v49  ;;  %v665_v49 = vmul.f32 %v1632_v9, %v1632_v9 }
 0x150   : > { %v681_v55 = vadd.f32 %v680_v54, %v650_v52  ;;  %v666_v52 = vmul.f32 %v1634_v10, %v1634_v10 }
 0x152   : > { %v682_v56 = vadd.f32 %v681_v55, %v651_v44  ;;  %v667_v44 = vmul.f32 %v1636_v12, %v1636_v12 }
 0x154   : > { %v683_v59 = vadd.f32 %v682_v56, %v652_v47  ;;  %v668_v47 = vmul.f32 %v1638_v14, %v1638_v14 }
 0x156   : > { %v684_v62 = vadd.f32 %v683_v59, %v653_v53  ;;  %v669_v53 = vmul.f32 %v1640_v22, %v1640_v22 }
 0x158   : > { %v685_v1 = vadd.f32 %v684_v62, %v654_v61  ;;  %v670_v61 = vmul.f32 %v1642_v23, %v1642_v23 }
 0x15a   : > { %v686_v63 = vadd.f32 %v685_v1, %v655_v0  ;;  %v671_v0 = vmul.f32 %v1644_v27, %v1644_v27 }
 0x15c   : > { %v687_v6 = vadd.f32 %v686_v63, %v656_v3  ;;  %v672_v3 = vmul.f32 %v1646_v29, %v1646_v29 }
 0x15e   : > { %v688_v7 = vadd.f32 %v687_v6, %v657_v4  ;;  %v673_v4 = vmul.f32 %v1648_v30, %v1648_v30 }
 0x160   : > { %v689_v38 = vadd.f32 %v688_v7, %v658_v5 }
 0x162   : > { %v690_v25 = vadd.f32 %v689_v38, %v659_v33 }
 0x164   : > { %v691_v39 = vadd.f32 %v690_v25, %v660_v24 }
 0x166   : > { %v692_v31 = vadd.f32 %v691_v39, %v661_v26 }
 0x168   : > { %v693_v37 = vadd.f32 %v692_v31, %v662_v28 }
 0x16a   : > { %v694_v51 = vadd.f32 %v693_v37, %v663_v48 }
 0x16c   : > { %v695_v42 = vadd.f32 %v694_v51, %v664_v41 }
 0x16e   : > { %v696_v54 = vadd.f32 %v695_v42, %v665_v49 }
 0x170   : > { %v697_v55 = vadd.f32 %v696_v54, %v666_v52 }
 0x172   : > { %v698_v56 = vadd.f32 %v697_v55, %v667_v44 }
 0x174   : > { %v699_v59 = vadd.f32 %v698_v56, %v668_v47 }
 0x176   : > { %v700_v62 = vadd.f32 %v699_v59, %v669_v53 }
 0x178   : > { %v701_v1 = vadd.f32 %v700_v62, %v670_v61 }
 0x17a   : > { %v702_v63 = vadd.f32 %v701_v1, %v671_v0 }
 0x17c   : > { %v703_v6 = vadd.f32 %v702_v63, %v672_v3 }
 0x17e   : > { %v704_v5 = vadd.f32 %v703_v6, %v673_v4 }
 0x180   : > { %v705_v7 = vrot.slane %v704_v5, 4 }
 0x182   : > { %v706_v33 = vadd.f32 %v705_v7, %v704_v5 }
 0x184   : > { %v707_v38 = vrot.slane %v706_v33, 2 }
 0x186   : > { %v708_v24 = vadd.f32 %v707_v38, %v706_v33 }
 0x188   : > { %v709_v25 = vrot.slane %v708_v24, 1 }
 0x18a   : > { %v710_v26 = vadd.f32 %v709_v25, %v708_v24 }
 0x18c   : > { %v711_v39 = vmul.f32 0.00390625, %v710_v26 }
 0x18e   : > { %v712_v28 = vadd.f32 1e-05, %v711_v39 }
 0x190   : > { %1413 = vrsqrt.f32 %v712_v28 }
 0x19a   : > { %v1414_v31 = vpop.eup %1413 }
 0x19b   : > { %v1739_v48 = vmul.f32 %v1414_v31, %v1618_v19  ;;  %v1742_v37 = vmul.f32 %v1414_v31, %v1620_v50  ;;  %v1745_v41 = vmul.f32 %v1414_v31, %v1622_v57  ;;  %v1748_v51 = vmul.f32 %v1414_v31, %v1624_v21 }
 0x19c   : > { %v1751_v49 = vmul.f32 %v1414_v31, %v1626_v58  ;;  %v1754_v42 = vmul.f32 %v1414_v31, %v1628_v60  ;;  %v1757_v52 = vmul.f32 %v1414_v31, %v1630_v2  ;;  %v1760_v19 = vmul.f32 %v1414_v31, %v1632_v9 }
 0x19d   : > { %v1763_v50 = vmul.f32 %v1414_v31, %v1634_v10  ;;  %v1766_v57 = vmul.f32 %v1414_v31, %v1636_v12  ;;  %v1769_v21 = vmul.f32 %v1414_v31, %v1638_v14  ;;  %v1772_v58 = vmul.f32 %v1414_v31, %v1640_v22 }
 0x19e   : > { %v1775_v60 = vmul.f32 %v1414_v31, %v1642_v23  ;;  %v1778_v2 = vmul.f32 %v1414_v31, %v1644_v27  ;;  %v1781_v9 = vmul.f32 %v1414_v31, %v1646_v29  ;;  %v1784_v10 = vmul.f32 %v1414_v31, %v1648_v30 }
 0x19f   : > { %v714_v12 = vmul.f32 %v1414_v31, %v1651_v32  ;;  %v715_v14 = vmul.f32 %v1414_v31, %v1654_v35  ;;  %v716_v54 = vmul.f32 %v1414_v31, %v1657_v36  ;;  %v1790_v22 = vmul.f32 %v1414_v31, %v1664_v40 }
 0x1a0   : > { %v1793_v23 = vmul.f32 %v1414_v31, %v1667_v43  ;;  %v1796_v27 = vmul.f32 %v1414_v31, %v1672_v45  ;;  %v1799_v29 = vmul.f32 %v1414_v31, %v1677_v46  ;;  %v1802_v30 = vmul.f32 %v1414_v31, %v1682_v34 }
 0x1a1   : > { %v1805_v32 = vmul.f32 %v1414_v31, %v1599_v8  ;;  %v1808_v35 = vmul.f32 %v1414_v31, %v1602_v11  ;;  %v1811_v36 = vmul.f32 %v1414_v31, %v1605_v13  ;;  %v1814_v40 = vmul.f32 %v1414_v31, %v1608_v20 }
 0x1a2   : > { %v1817_v43 = vmul.f32 %v1414_v31, %v1610_v15  ;;  %v1820_v45 = vmul.f32 %v1414_v31, %v1612_v16  ;;  %v1823_v46 = vmul.f32 %v1414_v31, %v1614_v17  ;;  %v1826_v8 = vmul.f32 %v1414_v31, %v1616_v18 }
 0x1a3   : > { %vm746_vm2 = vcmp.ge.f32.partialorder %v714_v12, 0.0  ;;  %vm747_vm3 = vcmp.ge.f32.partialorder %v715_v14, 0.0  ;;  %vm748_vm4 = vcmp.ge.f32.partialorder %v716_v54, 0.0  ;;  %vm749_vm5 = vcmp.ge.f32.partialorder %v1790_v22, 0.0 }
 0x1a4   : > { %vm750_vm6 = vcmp.ge.f32.partialorder %v1793_v23, 0.0  ;;  %vm751_vm7 = vcmp.ge.f32.partialorder %v1796_v27, 0.0  ;;  %vm752_vm8 = vcmp.ge.f32.partialorder %v1799_v29, 0.0  ;;  %vm755_vm11 = vcmp.ge.f32.partialorder %v1808_v35, 0.0 }
 0x1a5   : > { %vm756_vm12 = vcmp.ge.f32.partialorder %v1811_v36, 0.0  ;;  %v778_v11 = vmul.f32 0.01, %v714_v12  ;;  %v779_v13 = vmul.f32 0.01, %v715_v14  ;;  %vm761_vm1 = vcmp.ge.f32.partialorder %v1826_v8, 0.0 }
 0x1a6   : > { %v780_v20 = vmul.f32 0.01, %v716_v54  ;;  %v781_v15 = vmul.f32 0.01, %v1790_v22  ;;  %v782_v16 = vmul.f32 0.01, %v1793_v23 }
 0x1a7   : > { %v783_v17 = vmul.f32 0.01, %v1796_v27  ;;  %vm766_vm13 = vcmp.ge.f32.partialorder %v1751_v49, 0.0  ;;  %v784_v18 = vmul.f32 0.01, %v1799_v29  ;;  %v1854_v55 = vsel %vm746_vm2, %v714_v12, %v778_v11 }
 0x1a8   : > { %v785_v34 = vmul.f32 0.01, %v1802_v30  ;;  %v786_v44 = vmul.f32 0.01, %v1805_v32  ;;  %vm770_vm14 = vcmp.ge.f32.partialorder %v1763_v50, 0.0  ;;  %v1864_v59 = vsel %vm747_vm3, %v715_v14, %v779_v13 }
 0x1a9   : > { %v787_v47 = vmul.f32 0.01, %v1808_v35  ;;  %v788_v56 = vmul.f32 0.01, %v1811_v36  ;;  %v789_v53 = vmul.f32 0.01, %v1814_v40  ;;  %v812_v1 = vsel %vm748_vm4, %v716_v54, %v780_v20 }
 0x1aa   : > { %vm772_vm2 = vcmp.ge.f32.partialorder %v1769_v21, 0.0  ;;  %vm773_vm0 = vcmp.ge.f32.partialorder %v1772_v58, 0.0  ;;  %vm774_vm10 = vcmp.ge.f32.partialorder %v1775_v60, 0.0  ;;  %vm775_vm9 = vcmp.ge.f32.partialorder %v1778_v2, 0.0 }
 0x1ab   : > { %v790_v61 = vmul.f32 0.01, %v1817_v43  ;;  %v791_v62 = vmul.f32 0.01, %v1820_v45  ;;  %v792_v0 = vmul.f32 0.01, %v1823_v46  ;;  %v813_v6 = vsel %vm749_vm5, %v1790_v22, %v781_v15 }
 0x1ac   : > { %vm776_vm15 = vcmp.ge.f32.partialorder %v1781_v9, 0.0  ;;  %vm777_vm3 = vcmp.ge.f32.partialorder %v1784_v10, 0.0  ;;  %v793_v3 = vmul.f32 0.01, %v1826_v8  ;;  %v794_v63 = vmul.f32 0.01, %v1739_v48 }
 0x1ad   : > { %v795_v4 = vmul.f32 0.01, %v1742_v37  ;;  %v796_v5 = vmul.f32 0.01, %v1745_v41  ;;  %v797_v7 = vmul.f32 0.01, %v1748_v51  ;;  %v814_v38 = vsel %vm750_vm6, %v1793_v23, %v782_v16 }
 0x1ae   : > { %v798_v33 = vmul.f32 0.01, %v1751_v49  ;;  %v799_v24 = vmul.f32 0.01, %v1754_v42  ;;  %v800_v25 = vmul.f32 0.01, %v1757_v52  ;;  %v815_v39 = vsel %vm751_vm7, %v1796_v27, %v783_v17 }
 0x1af   : > { %v801_v26 = vmul.f32 0.01, %v1760_v19  ;;  %v802_v28 = vmul.f32 0.01, %v1763_v50  ;;  %v803_v31 = vmul.f32 0.01, %v1766_v57  ;;  %v816_v14 = vsel %vm752_vm8, %v1799_v29, %v784_v18 }
 0x1b0   : > { %v804_v12 = vmul.f32 0.01, %v1769_v21  ;;  %v805_v54 = vmul.f32 0.01, %v1772_v58  ;;  %v806_v22 = vmul.f32 0.01, %v1775_v60  ;;  %v819_v29 = vsel %vm755_vm11, %v1808_v35, %v787_v47 }
 0x1b1   : > { %v807_v23 = vmul.f32 0.01, %v1778_v2  ;;  %vm2018_vm4 = vcmp.ge.f32.partialorder %v1802_v30, 0.0  ;;  %v808_v11 = vmul.f32 0.01, %v1781_v9  ;;  %vm2019_vm5 = vcmp.ge.f32.partialorder %v1805_v32, 0.0 }
 0x1b2   : > { %v817_v27 = vsel %vm2018_vm4, %v1802_v30, %v785_v34  ;;  %v809_v13 = vmul.f32 0.01, %v1784_v10  ;;  %v818_v20 = vsel %vm2019_vm5, %v1805_v32, %v786_v44  ;;  %v820_v15 = vsel %vm756_vm12, %v1811_v36, %v788_v56 }
 0x1b3   : > { %vm2020_vm6 = vcmp.ge.f32.partialorder %v1814_v40, 0.0  ;;  %vm2021_vm7 = vcmp.ge.f32.partialorder %v1817_v43, 0.0  ;;  %vm2022_vm8 = vcmp.ge.f32.partialorder %v1820_v45, 0.0  ;;  %vm2023_vm11 = vcmp.ge.f32.partialorder %v1823_v46, 0.0 }
 0x1b4   : > { %v821_v30 = vsel %vm2020_vm6, %v1814_v40, %v789_v53  ;;  %v822_v16 = vsel %vm2021_vm7, %v1817_v43, %v790_v61  ;;  %v823_v32 = vsel %vm2022_vm8, %v1820_v45, %v791_v62  ;;  %v824_v35 = vsel %vm2023_vm11, %v1823_v46, %v792_v0 }
 0x1b5   : > { %v825_v36 = vsel %vm761_vm1, %v1826_v8, %v793_v3  ;;  %vm2024_vm12 = vcmp.ge.f32.partialorder %v1739_v48, 0.0  ;;  %vm2025_vm4 = vcmp.ge.f32.partialorder %v1742_v37, 0.0  ;;  %vm2026_vm5 = vcmp.ge.f32.partialorder %v1745_v41, 0.0 }
 0x1b6   : > { %v826_v40 = vsel %vm2024_vm12, %v1739_v48, %v794_v63  ;;  %v827_v43 = vsel %vm2025_vm4, %v1742_v37, %v795_v4  ;;  %v828_v45 = vsel %vm2026_vm5, %v1745_v41, %v796_v5  ;;  %vm2027_vm6 = vcmp.ge.f32.partialorder %v1748_v51, 0.0 }
 0x1b7   : > { %v829_v46 = vsel %vm2027_vm6, %v1748_v51, %v797_v7  ;;  %v830_v8 = vsel %vm766_vm13, %v1751_v49, %v798_v33  ;;  %vm2028_vm1 = vcmp.ge.f32.partialorder %v1754_v42, 0.0  ;;  %vm2029_vm7 = vcmp.ge.f32.partialorder %v1757_v52, 0.0 }
 0x1b8   : > { %v831_v48 = vsel %vm2028_vm1, %v1754_v42, %v799_v24  ;;  %v832_v37 = vsel %vm2029_vm7, %v1757_v52, %v800_v25  ;;  %vm2030_vm8 = vcmp.ge.f32.partialorder %v1760_v19, 0.0  ;;  %v834_v51 = vsel %vm770_vm14, %v1763_v50, %v802_v28 }
 0x1b9   : > { %v833_v41 = vsel %vm2030_vm8, %v1760_v19, %v801_v26  ;;  %vm2031_vm11 = vcmp.ge.f32.partialorder %v1766_v57, 0.0  ;;  %v836_v42 = vsel %vm772_vm2, %v1769_v21, %v804_v12  ;;  %v837_v52 = vsel %vm773_vm0, %v1772_v58, %v805_v54 }
 0x1ba   : > { %v835_v49 = vsel %vm2031_vm11, %v1766_v57, %v803_v31  ;;  %v838_v19 = vsel %vm774_vm10, %v1775_v60, %v806_v22  ;;  %v839_v50 = vsel %vm775_vm9, %v1778_v2, %v807_v23  ;;  %v840_v57 = vsel %vm776_vm15, %v1781_v9, %v808_v11 }
 0x1bb   : > { %v841_v21 = vsel %vm777_vm3, %v1784_v10, %v809_v13  ;;  %v1219_v58 = vpack.c.bf16 %v1864_v59, %v1854_v55  ;;  %v1224_v60 = vpack.c.bf16 %v813_v6, %v812_v1  ;;  %v1229_v17 = vpack.c.bf16 %v815_v39, %v814_v38 }
 0x1bc   : > { %v1234_v18 = vpack.c.bf16 %v817_v27, %v816_v14  ;;  %v1239_v34 = vpack.c.bf16 %v819_v29, %v818_v20  ;;  %v1244_v2 = vpack.c.bf16 %v821_v30, %v820_v15  ;;  %v1249_v9 = vpack.c.bf16 %v823_v32, %v822_v16 }
 0x1bd   : > { %1220 = vst [vmem:[%s1967_s29] sm:$0xff] %v1219_v58   ;;  %1296 = vst [vmem:[%s1967_s29 + $0x8] sm:$0xff] %v1224_v60   ;;  %v1254_v44 = vpack.c.bf16 %v825_v36, %v824_v35  ;;  %v1259_v47 = vpack.c.bf16 %v827_v43, %v826_v40  ;;  %v1264_v10 = vpack.c.bf16 %v829_v46, %v828_v45 }
 0x1be   : > { %1297 = vst [vmem:[%s1967_s29 + $0x10] sm:$0xff] %v1229_v17   ;;  %1298 = vst [vmem:[%s1967_s29 + $0x18] sm:$0xff] %v1234_v18   ;;  %v1269_v55 = vpack.c.bf16 %v831_v48, %v830_v8  ;;  %v1274_v56 = vpack.c.bf16 %v833_v41, %v832_v37  ;;  %v1279_v53 = vpack.c.bf16 %v835_v49, %v834_v51 }
 0x1bf   : > { %1299 = vst [vmem:[%s1967_s29 + $0x20] sm:$0xff] %v1239_v34   ;;  %1300 = vst [vmem:[%s1967_s29 + $0x28] sm:$0xff] %v1244_v2   ;;  %v1284_v59 = vpack.c.bf16 %v837_v52, %v836_v42  ;;  %v1289_v61 = vpack.c.bf16 %v839_v50, %v838_v19  ;;  %v1294_v62 = vpack.c.bf16 %v841_v21, %v840_v57 }
 0x1c0   : > { %1301 = vst [vmem:[%s1967_s29 + $0x30] sm:$0xff] %v1249_v9   ;;  %1302 = vst [vmem:[%s1967_s29 + $0x38] sm:$0xff] %v1254_v44  }
 0x1c1   : > { %1303 = vst [vmem:[%s1967_s29 + $0x40] sm:$0xff] %v1259_v47   ;;  %1304 = vst [vmem:[%s1967_s29 + $0x48] sm:$0xff] %v1264_v10  }
 0x1c2   : > { %1305 = vst [vmem:[%s1967_s29 + $0x50] sm:$0xff] %v1269_v55   ;;  %1306 = vst [vmem:[%s1967_s29 + $0x58] sm:$0xff] %v1274_v56  }
 0x1c3   : > { %1307 = vst [vmem:[%s1967_s29 + $0x60] sm:$0xff] %v1279_v53   ;;  %1308 = vst [vmem:[%s1967_s29 + $0x68] sm:$0xff] %v1284_v59  }
 0x1c4   : > { %1309 = vst [vmem:[%s1967_s29 + $0x70] sm:$0xff] %v1289_v61   ;;  %1310 = vst [vmem:[%s1967_s29 + $0x78] sm:$0xff] %v1294_v62  }
 0x1c5 PF: > { %s13_s14 = sadd.s32 1, %s1437_s14   ;;  %s2032_s12 = smov %s1433_s13 }
 0x1c6   : > { %p10_p5 = scmp.ge.s32.totalorder %s13_s14, 4   ;;  %s2033_s13 = smov %s2035_s15 }
 0x1c8   :  { %12 = sbr.rel (!%p10_p5) target bundleno = 2 (0x2), region = 68 }

// kernel: unet_forward.14
= control target key start
LH: loop header
LB: loop body
LE: loop exit
PB: predicated region body
PF: predicated region fallthrough
CT: control target
= control target key end

     0   :  { %s1504_s12 = smov 0   ;;  %s1506_s13 = smov 0   ;;  %s2062_s0 = inlined_call_operand.vmem [shape: bf16[512,72], index: 0, kind: input, shape index: {}]   ;;  %s2063_s1 = inlined_call_operand.vmem [shape: bf16[72,128], index: 1, kind: input, shape index: {}]   ;;  %s2064_s2 = inlined_call_operand.vmem [shape: f32[1,128], index: 2, kind: input, shape index: {}]   ;;  %s2065_s3 = inlined_call_operand.vmem [shape: bf16[512,128], index: 3, kind: output, shape index: {}]  }
   0x1   :  { %s1508_s14 = smov 0  }
   0x2 LB: > { %s25_s15 = sadd.s32 1, %s1478_s13  ;;  %p1134_p0 = scmp.ge.s32.totalorder %s1482_s14, 1  ;;  %s1482_s14 = sphi %s1508_s14, %s13_s14   ;;  %s1478_s13 = sphi %s1506_s13, %s2081_s13   ;;  %s1474_s12 = sphi %s1504_s12, %s2080_s12  }
   0x3   : > { %p27_p1 = scmp.ge.s32.totalorder %s25_s15, 2  ;;  %p169_p2 = scmp.lt.s32.totalorder %s1482_s14, 3 }
   0x5   : > { %s2083_s15 = smov (%p27_p1, %s25_s15), 0  ;;  %p170_p3 = pnand %p1134_p0, %p169_p2 }
   0x6   : > { %v1437_v0 = vld [vmem:[%s2063_s1] sm:$0xff] (!%p170_p3)   ;;  %v1438_v1 = vld [vmem:[%s2063_s1 + $0x8] sm:$0xff] (!%p170_p3)   ;;  %s1135_s20 = sshll.u32 (!%p170_p3), %s1474_s12, 5  ;;  %v1439_v2 = vld [vmem:[%s2063_s1 + $0x10] sm:$0xff] (!%p170_p3)   ;;  %vm381_vm0 = vcmask (!%p170_p3), 588800   ;;  %vm430_vm1 = vcmask (!%p170_p3), 1043456  }
   0x7   : > { %173 = sbr.rel (%p170_p3) target bundleno = 461 (0x1cd), region = 32  ;;  %1359 = vmatprep.subr.bf16.mxu0 (!%p170_p3), %v1437_v0  ;;  %p204_p4 = scmp.lt.s32.totalorder (!%p170_p3), %s1135_s20, 63  ;;  %1401 = vmatprep.subr.bf16.mxu1 (!%p170_p3), %v1437_v0  ;;  %v1440_v3 = vld [vmem:[%s2063_s1 + $0x18] sm:$0xff] (!%p170_p3)   ;;  %v1441_v5 = vld [vmem:[%s2063_s1 + $0x20] ss:$0 sps:$4 sm:$0xff] (!%p170_p3)  }
   0x8   : > { %1360 = vmatpush3.bf16.msra.mxu0 (!%p170_p3), %v1437_v0  ;;  %1406 = vmatpush3.bf16.msra.mxu1 (!%p170_p3), %v1437_v0  ;;  %v432_v6 = vsel (!%p170_p3), %vm430_vm1, %v1441_v5, 0  ;;  %v1584_v24 = vld [vmem:[%s2064_s2] ss:$0 sm:$0xff] (!%p170_p3) }
   0x9   : > { %1361 = vmatprep.subr.bf16.mxu0 (!%p170_p3), %v1438_v1  ;;  %1402 = vmatprep.subr.bf16.mxu1 (!%p170_p3), %v1438_v1 }
   0xc   : > { %1362 = vmatpush3.bf16.msra.mxu0 (!%p170_p3), %v1438_v1  ;;  %1407 = vmatpush3.bf16.msra.mxu1 (!%p170_p3), %v1438_v1 }
   0xd   : > { %1363 = vmatprep.subr.bf16.mxu0 (!%p170_p3), %v1439_v2  ;;  %1403 = vmatprep.subr.bf16.mxu1 (!%p170_p3), %v1439_v2 }
   0xe   : > { %s2085_s20 = smov (!%p204_p4, %s1135_s20), 63 }
   0xf   : > { %s1136_s23 = sshll.u32 %s2085_s20, 2 }
  0x10   : > { %s1542_s28 = scalar_lea.vmem %s2062_s0, %s1136_s23  ;;  %1364 = vmatpush3.bf16.msra.mxu0 %v1439_v2  ;;  %1408 = vmatpush3.bf16.msra.mxu1 %v1439_v2  ;;  %s2015_s8 = scalar_lea.vmem %s2065_s3, %s1136_s23 }
  0x11   : > { %v1442_v4 = vld [vmem:[%s1542_s28] sm:$0xff]   ;;  %1365 = vmatprep.subr.bf16.mxu0 %v1440_v3  ;;  %1404 = vmatprep.subr.bf16.mxu1 %v1440_v3  ;;  %v1443_v7 = vld [vmem:[%s1542_s28 + $0x8] sm:$0xff]   ;;  %v1444_v9 = vld [vmem:[%s1542_s28 + $0x10] sm:$0xff]  }
  0x12   : > { %1369 = vmatprep.mubr.msk.bf16.mxu0 %vm381_vm0, %v1442_v4  ;;  %v1450_v8 = vld [vmem:[%s1542_s28 + $0x40] sm:$0xff]   ;;  %v1451_v10 = vld [vmem:[%s1542_s28 + $0x48] sm:$0xff]   ;;  %v1452_v11 = vld [vmem:[%s1542_s28 + $0x50] sm:$0xff]  }
  0x13   : > { %1385 = vmatprep.mubr.msk.bf16.mxu1 %vm381_vm0, %v1450_v8  ;;  %v1445_v12 = vld [vmem:[%s1542_s28 + $0x18] sm:$0xff]   ;;  %v1446_v14 = vld [vmem:[%s1542_s28 + $0x20] sm:$0xff]   ;;  %v1447_v16 = vld [vmem:[%s1542_s28 + $0x28] sm:$0xff]  }
  0x14   : > { %1366 = vmatpush3.bf16.msra.mxu0 %v1440_v3  ;;  %1409 = vmatpush3.bf16.msra.mxu1 %v1440_v3  ;;  %v1453_v13 = vld [vmem:[%s1542_s28 + $0x58] sm:$0xff]   ;;  %v1454_v15 = vld [vmem:[%s1542_s28 + $0x60] sm:$0xff]   ;;  %v1455_v17 = vld [vmem:[%s1542_s28 + $0x68] sm:$0xff]  }
  0x15   : > { %1411 = vmatprep.subr.msk.bf16.mxu0 %vm430_vm1, %v1441_v5  ;;  %1412 = vmatprep.subr.msk.bf16.mxu1 %vm430_vm1, %v1441_v5  ;;  %v1448_v18 = vld [vmem:[%s1542_s28 + $0x30] sm:$0xff]   ;;  %v1449_v20 = vld [vmem:[%s1542_s28 + $0x38] sm:$0xff]  }
  0x16   : > { %v1456_v19 = vld [vmem:[%s1542_s28 + $0x70] sm:$0xff]   ;;  %v1457_v21 = vld [vmem:[%s1542_s28 + $0x78] sm:$0xff]  }
  0x18   : > { %1368 = vmatpush3.bf16.msra.mxu0 %v432_v6  ;;  %1410 = vmatpush3.bf16.msra.mxu1 %v432_v6 }
  0x1b   : > { %1370 = vmatmul.mubr.msk.bf16.vlgmr.msra.gmra.mrb[0].mxu0 %vm381_vm0, %v1443_v7  ;;  %1386 = vmatmul.mubr.msk.bf16.vlgmr.msra.gmra.mrb[0].mxu1 %vm381_vm0, %v1451_v10 }
  0x1c   : > { %1373 = vmatprep.mubr.msk.bf16.mxu0 %vm381_vm0, %v1444_v9  ;;  %1389 = vmatprep.mubr.msk.bf16.mxu1 %vm381_vm0, %v1452_v11 }
  0x23   : > { %1374 = vmatmul.mubr.msk.bf16.gmra.mrb[4].mxu0 %vm381_vm0, %v1445_v12  ;;  %1390 = vmatmul.mubr.msk.bf16.gmra.mrb[4].mxu1 %vm381_vm0, %v1453_v13 }
  0x24   : > { %1377 = vmatprep.mubr.msk.bf16.mxu0 %vm381_vm0, %v1446_v14  ;;  %1393 = vmatprep.mubr.msk.bf16.mxu1 %vm381_vm0, %v1454_v15 }
  0x2b   : > { %1378 = vmatmul.mubr.msk.bf16.gmra.mrb[8].mxu0 %vm381_vm0, %v1447_v16  ;;  %1394 = vmatmul.mubr.msk.bf16.gmra.mrb[8].mxu1 %vm381_vm0, %v1455_v17 }
  0x2c   : > { %1381 = vmatprep.mubr.msk.bf16.mxu0 %vm381_vm0, %v1448_v18  ;;  %1397 = vmatprep.mubr.msk.bf16.mxu1 %vm381_vm0, %v1456_v19 }
  0x33   : > { %1382 = vmatmul.mubr.msk.bf16.gmra.mrb[12].mxu0 %vm381_vm0, %v1449_v20  ;;  %1398 = vmatmul.mubr.msk.bf16.gmra.mrb[12].mxu1 %vm381_vm0, %v1457_v21 }
  0xee   : > { %v1371_v22 = vpop.f32.mrb[0].mxu0  ;;  %v1579_v23 = vpop.f32.mrb[0].mxu1 }
  0xef   : > { %v468_v25 = vpop.f32.mrb[1].mxu0  ;;  %v532_v26 = vpop.f32.mrb[1].mxu1  ;;  %v1595_v33 = vadd.f32 %v1371_v22, %v1584_v24 }
  0xf0   : > { %v1372_v27 = vpop.f32.mrb[2].mxu0  ;;  %v1586_v28 = vpop.f32.mrb[2].mxu1  ;;  %v1589_v31 = vadd.f32 %v1584_v24, %v468_v25  ;;  %v533_v21 = vadd.f32 %v1584_v24, %v532_v26 }
  0xf1   : > { %v471_v29 = vpop.f32.mrb[3].mxu0  ;;  %v535_v30 = vpop.f32.mrb[3].mxu1  ;;  %v1600_v35 = vadd.f32 %v1372_v27, %v1584_v24 }
  0xf2   : > { %v1592_v32 = vadd.f32 %v1584_v24, %v471_v29  ;;  %v536_v27 = vadd.f32 %v1584_v24, %v535_v30  ;;  %v541_v29 = vadd.f32 %v1579_v23, %v1584_v24 }
  0xf4   : > { %v595_v34 = vadd.f32 %v1592_v32, %v1589_v31 }
  0xf6   : > { %v596_v36 = vadd.f32 %v595_v34, %v1595_v33  ;;  %v1375_v37 = vpop.f32.mrb[4].mxu0  ;;  %v1391_v38 = vpop.f32.mrb[4].mxu1 }
  0xf7   : > { %v484_v39 = vpop.f32.mrb[5].mxu0  ;;  %v548_v40 = vpop.f32.mrb[5].mxu1  ;;  %v1612_v49 = vadd.f32 %v1375_v37, %v1584_v24  ;;  %v557_v26 = vadd.f32 %v1391_v38, %v1584_v24 }
  0xf8   : > { %v1604_v41 = vadd.f32 %v1584_v24, %v484_v39  ;;  %v597_v42 = vadd.f32 %v596_v36, %v1600_v35  ;;  %v1376_v43 = vpop.f32.mrb[6].mxu0  ;;  %v1392_v44 = vpop.f32.mrb[6].mxu1  ;;  %v544_v36 = vadd.f32 %v1586_v28, %v1584_v24  ;;  %v549_v39 = vadd.f32 %v1584_v24, %v548_v40 }
  0xf9   : > { %v487_v45 = vpop.f32.mrb[7].mxu0  ;;  %v551_v46 = vpop.f32.mrb[7].mxu1  ;;  %v1616_v51 = vadd.f32 %v1376_v43, %v1584_v24 }
  0xfa   : > { %v598_v47 = vadd.f32 %v597_v42, %v1604_v41  ;;  %v1609_v48 = vadd.f32 %v1584_v24, %v487_v45  ;;  %v552_v45 = vadd.f32 %v1584_v24, %v551_v46 }
  0xfc   : > { %v599_v50 = vadd.f32 %v598_v47, %v1609_v48 }
  0xfe   : > { %v600_v52 = vadd.f32 %v599_v50, %v1612_v49  ;;  %v1379_v53 = vpop.f32.mrb[8].mxu0  ;;  %v1395_v54 = vpop.f32.mrb[8].mxu1  ;;  %v560_v50 = vadd.f32 %v1392_v44, %v1584_v24 }
  0xff   : > { %v500_v55 = vpop.f32.mrb[9].mxu0  ;;  %v564_v56 = vpop.f32.mrb[9].mxu1  ;;  %v509_v1 = vadd.f32 %v1379_v53, %v1584_v24  ;;  %v573_v28 = vadd.f32 %v1395_v54, %v1584_v24 }
 0x100   : > { %v1620_v57 = vadd.f32 %v1584_v24, %v500_v55  ;;  %v601_v58 = vadd.f32 %v600_v52, %v1616_v51  ;;  %v1380_v59 = vpop.f32.mrb[10].mxu0  ;;  %v1396_v60 = vpop.f32.mrb[10].mxu1  ;;  %v565_v52 = vadd.f32 %v1584_v24, %v564_v56 }
 0x101   : > { %v503_v61 = vpop.f32.mrb[11].mxu0  ;;  %v567_v62 = vpop.f32.mrb[11].mxu1  ;;  %v512_v3 = vadd.f32 %v1380_v59, %v1584_v24  ;;  %v576_v40 = vadd.f32 %v1396_v60, %v1584_v24 }
 0x102   : > { %v602_v63 = vadd.f32 %v601_v58, %v1620_v57  ;;  %v504_v0 = vadd.f32 %v1584_v24, %v503_v61  ;;  %v568_v55 = vadd.f32 %v1584_v24, %v567_v62 }
 0x104   : > { %v603_v2 = vadd.f32 %v602_v63, %v504_v0 }
 0x106   : > { %v604_v4 = vadd.f32 %v603_v2, %v509_v1  ;;  %v1383_v5 = vpop.f32.mrb[12].mxu0  ;;  %v1399_v6 = vpop.f32.mrb[12].mxu1 }
 0x107   : > { %v516_v7 = vpop.f32.mrb[13].mxu0  ;;  %v580_v8 = vpop.f32.mrb[13].mxu1  ;;  %v525_v17 = vadd.f32 %v1383_v5, %v1584_v24  ;;  %v589_v44 = vadd.f32 %v1399_v6, %v1584_v24 }
 0x108   : > { %v517_v9 = vadd.f32 %v1584_v24, %v516_v7  ;;  %v605_v10 = vadd.f32 %v604_v4, %v512_v3  ;;  %v1384_v11 = vpop.f32.mrb[14].mxu0  ;;  %v1400_v12 = vpop.f32.mrb[14].mxu1  ;;  %v581_v46 = vadd.f32 %v1584_v24, %v580_v8 }
 0x109   : > { %v519_v13 = vpop.f32.mrb[15].mxu0  ;;  %v583_v14 = vpop.f32.mrb[15].mxu1  ;;  %v528_v19 = vadd.f32 %v1384_v11, %v1584_v24  ;;  %v592_v56 = vadd.f32 %v1400_v12, %v1584_v24 }
 0x10a   : > { %v606_v15 = vadd.f32 %v605_v10, %v517_v9  ;;  %v520_v16 = vadd.f32 %v1584_v24, %v519_v13  ;;  %v584_v63 = vadd.f32 %v1584_v24, %v583_v14 }
 0x10c   : > { %v607_v18 = vadd.f32 %v606_v15, %v520_v16 }
 0x10e   : > { %v608_v20 = vadd.f32 %v607_v18, %v525_v17 }
 0x110   : > { %v609_v22 = vadd.f32 %v608_v20, %v528_v19 }
 0x112   : > { %v610_v25 = vadd.f32 %v609_v22, %v533_v21 }
 0x114   : > { %v611_v34 = vadd.f32 %v610_v25, %v536_v27 }
 0x116   : > { %v612_v37 = vadd.f32 %v611_v34, %v541_v29 }
 0x118   : > { %v613_v42 = vadd.f32 %v612_v37, %v544_v36 }
 0x11a   : > { %v614_v43 = vadd.f32 %v613_v42, %v549_v39 }
 0x11c   : > { %v615_v47 = vadd.f32 %v614_v43, %v552_v45 }
 0x11e   : > { %v616_v30 = vadd.f32 %v615_v47, %v557_v26 }
 0x120   : > { %v617_v23 = vadd.f32 %v616_v30, %v560_v50 }
 0x122   : > { %v618_v53 = vadd.f32 %v617_v23, %v565_v52 }
 0x124   : > { %v619_v58 = vadd.f32 %v618_v53, %v568_v55 }
 0x126   : > { %v620_v59 = vadd.f32 %v619_v58, %v573_v28 }
 0x128   : > { %v621_v61 = vadd.f32 %v620_v59, %v576_v40 }
 0x12a   : > { %v622_v38 = vadd.f32 %v621_v61, %v581_v46 }
 0x12c   : > { %v623_v2 = vadd.f32 %v622_v38, %v584_v63 }
 0x12e   : > { %v624_v4 = vadd.f32 %v623_v2, %v589_v44 }
 0x130   : > { %v625_v5 = vadd.f32 %v624_v4, %v592_v56 }
 0x132   : > { %v626_v62 = vrot.slane %v625_v5, 4 }
 0x134   : > { %v627_v7 = vadd.f32 %v626_v62, %v625_v5 }
 0x136   : > { %v628_v54 = vrot.slane %v627_v7, 2 }
 0x138   : > { %v629_v10 = vadd.f32 %v628_v54, %v627_v7 }
 0x13a   : > { %v630_v11 = vrot.slane %v629_v10, 1 }
 0x13c   : > { %v631_v60 = vadd.f32 %v630_v11, %v629_v10 }
 0x13e   : > { %v633_v13 = vmul.f32 0.00390625, %v631_v60 }
 0x140   : > { %v1650_v8 = vsub.f32 %v1620_v57, %v633_v13  ;;  %v1652_v15 = vsub.f32 %v504_v0, %v633_v13  ;;  %v1654_v14 = vsub.f32 %v509_v1, %v633_v13  ;;  %v1656_v6 = vsub.f32 %v512_v3, %v633_v13 }
 0x141   : > { %v1658_v18 = vsub.f32 %v517_v9, %v633_v13  ;;  %v1660_v24 = vsub.f32 %v520_v16, %v633_v13  ;;  %v1662_v12 = vsub.f32 %v525_v17, %v633_v13  ;;  %v1664_v20 = vsub.f32 %v528_v19, %v633_v13 }
 0x142   : > { %v1666_v22 = vsub.f32 %v533_v21, %v633_v13  ;;  %v1668_v25 = vsub.f32 %v536_v27, %v633_v13  ;;  %v1670_v57 = vsub.f32 %v541_v29, %v633_v13  ;;  %v1672_v0 = vsub.f32 %v544_v36, %v633_v13 }
 0x143   : > { %v1674_v1 = vsub.f32 %v549_v39, %v633_v13  ;;  %v1676_v3 = vsub.f32 %v552_v45, %v633_v13  ;;  %v1678_v9 = vsub.f32 %v557_v26, %v633_v13  ;;  %v1680_v16 = vsub.f32 %v560_v50, %v633_v13 }
 0x144   : > { %v1682_v17 = vsub.f32 %v565_v52, %v633_v13  ;;  %v1684_v19 = vsub.f32 %v568_v55, %v633_v13  ;;  %v1686_v21 = vsub.f32 %v573_v28, %v633_v13  ;;  %v1688_v27 = vsub.f32 %v576_v40, %v633_v13 }
 0x145   : > { %v1690_v29 = vsub.f32 %v581_v46, %v633_v13  ;;  %v1692_v34 = vsub.f32 %v584_v63, %v633_v13  ;;  %v1694_v36 = vsub.f32 %v589_v44, %v633_v13  ;;  %v1696_v37 = vsub.f32 %v592_v56, %v633_v13 }
 0x146   : > { %v1699_v39 = vsub.f32 %v1589_v31, %v633_v13  ;;  %v1702_v42 = vsub.f32 %v1592_v32, %v633_v13  ;;  %v1705_v43 = vsub.f32 %v1595_v33, %v633_v13  ;;  %v1712_v47 = vsub.f32 %v1600_v35, %v633_v13 }
 0x147   : > { %v1715_v50 = vsub.f32 %v1604_v41, %v633_v13  ;;  %v1720_v30 = vsub.f32 %v1609_v48, %v633_v13  ;;  %v1725_v23 = vsub.f32 %v1612_v49, %v633_v13  ;;  %v1730_v41 = vsub.f32 %v1616_v51, %v633_v13 }
 0x148   : > { %v666_v45 = vmul.f32 %v1699_v39, %v1699_v39  ;;  %v667_v26 = vmul.f32 %v1702_v42, %v1702_v42  ;;  %v668_v31 = vmul.f32 %v1705_v43, %v1705_v43  ;;  %v669_v33 = vmul.f32 %v1712_v47, %v1712_v47 }
 0x149   : > { %v670_v35 = vmul.f32 %v1715_v50, %v1715_v50  ;;  %v671_v55 = vmul.f32 %v1720_v30, %v1720_v30  ;;  %v672_v48 = vmul.f32 %v1725_v23, %v1725_v23  ;;  %v673_v40 = vmul.f32 %v1730_v41, %v1730_v41 }
 0x14a   : > { %v698_v32 = vadd.f32 %v667_v26, %v666_v45  ;;  %v674_v59 = vmul.f32 %v1650_v8, %v1650_v8  ;;  %v675_v51 = vmul.f32 %v1652_v15, %v1652_v15  ;;  %v676_v38 = vmul.f32 %v1654_v14, %v1654_v14 }
 0x14b   : > { %v677_v44 = vmul.f32 %v1656_v6, %v1656_v6  ;;  %v678_v56 = vmul.f32 %v1658_v18, %v1658_v18  ;;  %v679_v5 = vmul.f32 %v1660_v24, %v1660_v24  ;;  %v680_v7 = vmul.f32 %v1662_v12, %v1662_v12 }
 0x14c   : > { %v699_v52 = vadd.f32 %v698_v32, %v668_v31  ;;  %v681_v10 = vmul.f32 %v1664_v20, %v1664_v20  ;;  %v682_v60 = vmul.f32 %v1666_v22, %v1666_v22  ;;  %v683_v45 = vmul.f32 %v1668_v25, %v1668_v25 }
 0x14d   : > { %v684_v31 = vmul.f32 %v1670_v57, %v1670_v57 }
 0x14e   : > { %v700_v53 = vadd.f32 %v699_v52, %v669_v33  ;;  %v685_v33 = vmul.f32 %v1672_v0, %v1672_v0 }
 0x150   : > { %v701_v28 = vadd.f32 %v700_v53, %v670_v35  ;;  %v686_v35 = vmul.f32 %v1674_v1, %v1674_v1 }
 0x152   : > { %v702_v58 = vadd.f32 %v701_v28, %v671_v55  ;;  %v687_v55 = vmul.f32 %v1676_v3, %v1676_v3 }
 0x154   : > { %v703_v49 = vadd.f32 %v702_v58, %v672_v48  ;;  %v688_v48 = vmul.f32 %v1678_v9, %v1678_v9 }
 0x156   : > { %v704_v46 = vadd.f32 %v703_v49, %v673_v40  ;;  %v689_v40 = vmul.f32 %v1680_v16, %v1680_v16 }
 0x158   : > { %v705_v61 = vadd.f32 %v704_v46, %v674_v59  ;;  %v690_v59 = vmul.f32 %v1682_v17, %v1682_v17 }
 0x15a   : > { %v706_v63 = vadd.f32 %v705_v61, %v675_v51  ;;  %v691_v51 = vmul.f32 %v1684_v19, %v1684_v19 }
 0x15c   : > { %v707_v2 = vadd.f32 %v706_v63, %v676_v38  ;;  %v692_v38 = vmul.f32 %v1686_v21, %v1686_v21 }
 0x15e   : > { %v708_v4 = vadd.f32 %v707_v2, %v677_v44  ;;  %v693_v44 = vmul.f32 %v1688_v27, %v1688_v27 }
 0x160   : > { %v709_v62 = vadd.f32 %v708_v4, %v678_v56  ;;  %v694_v56 = vmul.f32 %v1690_v29, %v1690_v29 }
 0x162   : > { %v710_v54 = vadd.f32 %v709_v62, %v679_v5  ;;  %v695_v5 = vmul.f32 %v1692_v34, %v1692_v34 }
 0x164   : > { %v711_v11 = vadd.f32 %v710_v54, %v680_v7  ;;  %v696_v7 = vmul.f32 %v1694_v36, %v1694_v36 }
 0x166   : > { %v712_v13 = vadd.f32 %v711_v11, %v681_v10  ;;  %v697_v10 = vmul.f32 %v1696_v37, %v1696_v37 }
 0x168   : > { %v713_v26 = vadd.f32 %v712_v13, %v682_v60 }
 0x16a   : > { %v714_v32 = vadd.f32 %v713_v26, %v683_v45 }
 0x16c   : > { %v715_v52 = vadd.f32 %v714_v32, %v684_v31 }
 0x16e   : > { %v716_v53 = vadd.f32 %v715_v52, %v685_v33 }
 0x170   : > { %v717_v28 = vadd.f32 %v716_v53, %v686_v35 }
 0x172   : > { %v718_v58 = vadd.f32 %v717_v28, %v687_v55 }
 0x174   : > { %v719_v49 = vadd.f32 %v718_v58, %v688_v48 }
 0x176   : > { %v720_v46 = vadd.f32 %v719_v49, %v689_v40 }
 0x178   : > { %v721_v61 = vadd.f32 %v720_v46, %v690_v59 }
 0x17a   : > { %v722_v63 = vadd.f32 %v721_v61, %v691_v51 }
 0x17c   : > { %v723_v2 = vadd.f32 %v722_v63, %v692_v38 }
 0x17e   : > { %v724_v4 = vadd.f32 %v723_v2, %v693_v44 }
 0x180   : > { %v725_v62 = vadd.f32 %v724_v4, %v694_v56 }
 0x182   : > { %v726_v54 = vadd.f32 %v725_v62, %v695_v5 }
 0x184   : > { %v727_v11 = vadd.f32 %v726_v54, %v696_v7 }
 0x186   : > { %v728_v60 = vadd.f32 %v727_v11, %v697_v10 }
 0x188   : > { %v729_v13 = vrot.slane %v728_v60, 4 }
 0x18a   : > { %v730_v45 = vadd.f32 %v729_v13, %v728_v60 }
 0x18c   : > { %v731_v26 = vrot.slane %v730_v45, 2 }
 0x18e   : > { %v732_v31 = vadd.f32 %v731_v26, %v730_v45 }
 0x190   : > { %v733_v32 = vrot.slane %v732_v31, 1 }
 0x192   : > { %v734_v33 = vadd.f32 %v733_v32, %v732_v31 }
 0x194   : > { %v735_v52 = vmul.f32 0.00390625, %v734_v33 }
 0x196   : > { %v736_v35 = vadd.f32 1e-05, %v735_v52 }
 0x198   : > { %1458 = vrsqrt.f32 %v736_v35 }
 0x1a2   : > { %v1459_v53 = vpop.eup %1458 }
 0x1a3   : > { %v1787_v55 = vmul.f32 %v1459_v53, %v1666_v22  ;;  %v1790_v28 = vmul.f32 %v1459_v53, %v1668_v25  ;;  %v1793_v48 = vmul.f32 %v1459_v53, %v1670_v57  ;;  %v1796_v58 = vmul.f32 %v1459_v53, %v1672_v0 }
 0x1a4   : > { %v1799_v40 = vmul.f32 %v1459_v53, %v1674_v1  ;;  %v1802_v49 = vmul.f32 %v1459_v53, %v1676_v3  ;;  %v1805_v59 = vmul.f32 %v1459_v53, %v1678_v9  ;;  %v1808_v22 = vmul.f32 %v1459_v53, %v1680_v16 }
 0x1a5   : > { %v1811_v25 = vmul.f32 %v1459_v53, %v1682_v17  ;;  %v1814_v57 = vmul.f32 %v1459_v53, %v1684_v19  ;;  %v1817_v0 = vmul.f32 %v1459_v53, %v1686_v21  ;;  %v1820_v1 = vmul.f32 %v1459_v53, %v1688_v27 }
 0x1a6   : > { %v1823_v3 = vmul.f32 %v1459_v53, %v1690_v29  ;;  %v1826_v9 = vmul.f32 %v1459_v53, %v1692_v34  ;;  %v1829_v16 = vmul.f32 %v1459_v53, %v1694_v36  ;;  %v1832_v17 = vmul.f32 %v1459_v53, %v1696_v37 }
 0x1a7   : > { %v738_v19 = vmul.f32 %v1459_v53, %v1699_v39  ;;  %v739_v21 = vmul.f32 %v1459_v53, %v1702_v42  ;;  %v740_v46 = vmul.f32 %v1459_v53, %v1705_v43  ;;  %v1838_v27 = vmul.f32 %v1459_v53, %v1712_v47 }
 0x1a8   : > { %v1841_v29 = vmul.f32 %v1459_v53, %v1715_v50  ;;  %v1844_v34 = vmul.f32 %v1459_v53, %v1720_v30  ;;  %v1847_v36 = vmul.f32 %v1459_v53, %v1725_v23  ;;  %v1850_v37 = vmul.f32 %v1459_v53, %v1730_v41 }
 0x1a9   : > { %v1853_v39 = vmul.f32 %v1459_v53, %v1650_v8  ;;  %v1856_v42 = vmul.f32 %v1459_v53, %v1652_v15  ;;  %v1859_v43 = vmul.f32 %v1459_v53, %v1654_v14  ;;  %v1862_v47 = vmul.f32 %v1459_v53, %v1656_v6 }
 0x1aa   : > { %v1865_v50 = vmul.f32 %v1459_v53, %v1658_v18  ;;  %v1868_v30 = vmul.f32 %v1459_v53, %v1660_v24  ;;  %v1871_v23 = vmul.f32 %v1459_v53, %v1662_v12  ;;  %v1874_v8 = vmul.f32 %v1459_v53, %v1664_v20 }
 0x1ab   : > { %vm770_vm2 = vcmp.ge.f32.partialorder %v738_v19, 0.0  ;;  %vm771_vm3 = vcmp.ge.f32.partialorder %v739_v21, 0.0  ;;  %vm772_vm4 = vcmp.ge.f32.partialorder %v740_v46, 0.0  ;;  %vm773_vm5 = vcmp.ge.f32.partialorder %v1838_v27, 0.0 }
 0x1ac   : > { %vm774_vm6 = vcmp.ge.f32.partialorder %v1841_v29, 0.0  ;;  %vm775_vm7 = vcmp.ge.f32.partialorder %v1844_v34, 0.0  ;;  %vm776_vm8 = vcmp.ge.f32.partialorder %v1847_v36, 0.0  ;;  %vm779_vm11 = vcmp.ge.f32.partialorder %v1856_v42, 0.0 }
 0x1ad   : > { %vm780_vm12 = vcmp.ge.f32.partialorder %v1859_v43, 0.0  ;;  %v802_v15 = vmul.f32 0.01, %v738_v19  ;;  %v803_v14 = vmul.f32 0.01, %v739_v21  ;;  %vm785_vm1 = vcmp.ge.f32.partialorder %v1874_v8, 0.0 }
 0x1ae   : > { %v804_v6 = vmul.f32 0.01, %v740_v46  ;;  %v805_v18 = vmul.f32 0.01, %v1838_v27  ;;  %v806_v24 = vmul.f32 0.01, %v1841_v29 }
 0x1af   : > { %v807_v12 = vmul.f32 0.01, %v1844_v34  ;;  %vm790_vm13 = vcmp.ge.f32.partialorder %v1799_v40, 0.0  ;;  %v808_v20 = vmul.f32 0.01, %v1847_v36  ;;  %v1902_v61 = vsel %vm770_vm2, %v738_v19, %v802_v15 }
 0x1b0   : > { %v809_v41 = vmul.f32 0.01, %v1850_v37  ;;  %v810_v51 = vmul.f32 0.01, %v1853_v39  ;;  %vm794_vm14 = vcmp.ge.f32.partialorder %v1811_v25, 0.0  ;;  %v1912_v2 = vsel %vm771_vm3, %v739_v21, %v803_v14 }
 0x1b1   : > { %v811_v38 = vmul.f32 0.01, %v1856_v42  ;;  %v812_v63 = vmul.f32 0.01, %v1859_v43  ;;  %v813_v44 = vmul.f32 0.01, %v1862_v47  ;;  %v836_v62 = vsel %vm772_vm4, %v740_v46, %v804_v6 }
 0x1b2   : > { %vm796_vm2 = vcmp.ge.f32.partialorder %v1817_v0, 0.0  ;;  %vm797_vm0 = vcmp.ge.f32.partialorder %v1820_v1, 0.0  ;;  %vm798_vm10 = vcmp.ge.f32.partialorder %v1823_v3, 0.0  ;;  %vm799_vm9 = vcmp.ge.f32.partialorder %v1826_v9, 0.0 }
 0x1b3   : > { %v814_v56 = vmul.f32 0.01, %v1865_v50  ;;  %v815_v4 = vmul.f32 0.01, %v1868_v30  ;;  %v816_v5 = vmul.f32 0.01, %v1871_v23  ;;  %v837_v11 = vsel %vm773_vm5, %v1838_v27, %v805_v18 }
 0x1b4   : > { %vm800_vm15 = vcmp.ge.f32.partialorder %v1829_v16, 0.0  ;;  %vm801_vm3 = vcmp.ge.f32.partialorder %v1832_v17, 0.0  ;;  %v817_v7 = vmul.f32 0.01, %v1874_v8  ;;  %v818_v54 = vmul.f32 0.01, %v1787_v55 }
 0x1b5   : > { %v819_v10 = vmul.f32 0.01, %v1790_v28  ;;  %v820_v60 = vmul.f32 0.01, %v1793_v48  ;;  %v821_v13 = vmul.f32 0.01, %v1796_v58  ;;  %v838_v26 = vsel %vm774_vm6, %v1841_v29, %v806_v24 }
 0x1b6   : > { %v822_v45 = vmul.f32 0.01, %v1799_v40  ;;  %v823_v31 = vmul.f32 0.01, %v1802_v49  ;;  %v824_v32 = vmul.f32 0.01, %v1805_v59  ;;  %v839_v52 = vsel %vm775_vm7, %v1844_v34, %v807_v12 }
 0x1b7   : > { %v825_v33 = vmul.f32 0.01, %v1808_v22  ;;  %v826_v35 = vmul.f32 0.01, %v1811_v25  ;;  %v827_v53 = vmul.f32 0.01, %v1814_v57  ;;  %v840_v21 = vsel %vm776_vm8, %v1847_v36, %v808_v20 }
 0x1b8   : > { %v828_v19 = vmul.f32 0.01, %v1817_v0  ;;  %v829_v46 = vmul.f32 0.01, %v1820_v1  ;;  %v830_v27 = vmul.f32 0.01, %v1823_v3  ;;  %v843_v36 = vsel %vm779_vm11, %v1856_v42, %v811_v38 }
 0x1b9   : > { %v831_v29 = vmul.f32 0.01, %v1826_v9  ;;  %vm2066_vm4 = vcmp.ge.f32.partialorder %v1850_v37, 0.0  ;;  %v832_v15 = vmul.f32 0.01, %v1829_v16  ;;  %vm2067_vm5 = vcmp.ge.f32.partialorder %v1853_v39, 0.0 }
 0x1ba   : > { %v841_v34 = vsel %vm2066_vm4, %v1850_v37, %v809_v41  ;;  %v833_v14 = vmul.f32 0.01, %v1832_v17  ;;  %v842_v6 = vsel %vm2067_vm5, %v1853_v39, %v810_v51  ;;  %v844_v18 = vsel %vm780_vm12, %v1859_v43, %v812_v63 }
 0x1bb   : > { %vm2068_vm6 = vcmp.ge.f32.partialorder %v1862_v47, 0.0  ;;  %vm2069_vm7 = vcmp.ge.f32.partialorder %v1865_v50, 0.0  ;;  %vm2070_vm8 = vcmp.ge.f32.partialorder %v1868_v30, 0.0  ;;  %vm2071_vm11 = vcmp.ge.f32.partialorder %v1871_v23, 0.0 }
 0x1bc   : > { %v845_v37 = vsel %vm2068_vm6, %v1862_v47, %v813_v44  ;;  %v846_v24 = vsel %vm2069_vm7, %v1865_v50, %v814_v56  ;;  %v847_v39 = vsel %vm2070_vm8, %v1868_v30, %v815_v4  ;;  %v848_v42 = vsel %vm2071_vm11, %v1871_v23, %v816_v5 }
 0x1bd   : > { %v849_v43 = vsel %vm785_vm1, %v1874_v8, %v817_v7  ;;  %vm2072_vm12 = vcmp.ge.f32.partialorder %v1787_v55, 0.0  ;;  %vm2073_vm4 = vcmp.ge.f32.partialorder %v1790_v28, 0.0  ;;  %vm2074_vm5 = vcmp.ge.f32.partialorder %v1793_v48, 0.0 }
 0x1be   : > { %v850_v47 = vsel %vm2072_vm12, %v1787_v55, %v818_v54  ;;  %v851_v50 = vsel %vm2073_vm4, %v1790_v28, %v819_v10  ;;  %v852_v30 = vsel %vm2074_vm5, %v1793_v48, %v820_v60  ;;  %vm2075_vm6 = vcmp.ge.f32.partialorder %v1796_v58, 0.0 }
 0x1bf   : > { %v853_v23 = vsel %vm2075_vm6, %v1796_v58, %v821_v13  ;;  %v854_v8 = vsel %vm790_vm13, %v1799_v40, %v822_v45  ;;  %vm2076_vm1 = vcmp.ge.f32.partialorder %v1802_v49, 0.0  ;;  %vm2077_vm7 = vcmp.ge.f32.partialorder %v1805_v59, 0.0 }
 0x1c0   : > { %v855_v55 = vsel %vm2076_vm1, %v1802_v49, %v823_v31  ;;  %v856_v28 = vsel %vm2077_vm7, %v1805_v59, %v824_v32  ;;  %vm2078_vm8 = vcmp.ge.f32.partialorder %v1808_v22, 0.0  ;;  %v858_v58 = vsel %vm794_vm14, %v1811_v25, %v826_v35 }
 0x1c1   : > { %v857_v48 = vsel %vm2078_vm8, %v1808_v22, %v825_v33  ;;  %vm2079_vm11 = vcmp.ge.f32.partialorder %v1814_v57, 0.0  ;;  %v860_v49 = vsel %vm796_vm2, %v1817_v0, %v828_v19  ;;  %v861_v59 = vsel %vm797_vm0, %v1820_v1, %v829_v46 }
 0x1c2   : > { %v859_v40 = vsel %vm2079_vm11, %v1814_v57, %v827_v53  ;;  %v862_v22 = vsel %vm798_vm10, %v1823_v3, %v830_v27  ;;  %v863_v25 = vsel %vm799_vm9, %v1826_v9, %v831_v29  ;;  %v864_v57 = vsel %vm800_vm15, %v1829_v16, %v832_v15 }
 0x1c3   : > { %v865_v0 = vsel %vm801_vm3, %v1832_v17, %v833_v14  ;;  %v1246_v1 = vpack.c.bf16 %v1912_v2, %v1902_v61  ;;  %v1251_v3 = vpack.c.bf16 %v837_v11, %v836_v62  ;;  %v1256_v12 = vpack.c.bf16 %v839_v52, %v838_v26 }
 0x1c4   : > { %v1261_v20 = vpack.c.bf16 %v841_v34, %v840_v21  ;;  %v1266_v41 = vpack.c.bf16 %v843_v36, %v842_v6  ;;  %v1271_v9 = vpack.c.bf16 %v845_v37, %v844_v18  ;;  %v1276_v16 = vpack.c.bf16 %v847_v39, %v846_v24 }
 0x1c5   : > { %1247 = vst [vmem:[%s2015_s8] sm:$0xff] %v1246_v1   ;;  %1323 = vst [vmem:[%s2015_s8 + $0x8] sm:$0xff] %v1251_v3   ;;  %v1281_v51 = vpack.c.bf16 %v849_v43, %v848_v42  ;;  %v1286_v38 = vpack.c.bf16 %v851_v50, %v850_v47  ;;  %v1291_v17 = vpack.c.bf16 %v853_v23, %v852_v30 }
 0x1c6   : > { %1324 = vst [vmem:[%s2015_s8 + $0x10] sm:$0xff] %v1256_v12   ;;  %1325 = vst [vmem:[%s2015_s8 + $0x18] sm:$0xff] %v1261_v20   ;;  %v1296_v61 = vpack.c.bf16 %v855_v55, %v854_v8  ;;  %v1301_v63 = vpack.c.bf16 %v857_v48, %v856_v28  ;;  %v1306_v44 = vpack.c.bf16 %v859_v40, %v858_v58 }
 0x1c7   : > { %1326 = vst [vmem:[%s2015_s8 + $0x20] sm:$0xff] %v1266_v41   ;;  %1327 = vst [vmem:[%s2015_s8 + $0x28] sm:$0xff] %v1271_v9   ;;  %v1311_v2 = vpack.c.bf16 %v861_v59, %v860_v49  ;;  %v1316_v56 = vpack.c.bf16 %v863_v25, %v862_v22  ;;  %v1321_v4 = vpack.c.bf16 %v865_v0, %v864_v57 }
 0x1c8   : > { %1328 = vst [vmem:[%s2015_s8 + $0x30] sm:$0xff] %v1276_v16   ;;  %1329 = vst [vmem:[%s2015_s8 + $0x38] sm:$0xff] %v1281_v51  }
 0x1c9   : > { %1330 = vst [vmem:[%s2015_s8 + $0x40] sm:$0xff] %v1286_v38   ;;  %1331 = vst [vmem:[%s2015_s8 + $0x48] sm:$0xff] %v1291_v17  }
 0x1ca   : > { %1332 = vst [vmem:[%s2015_s8 + $0x50] sm:$0xff] %v1296_v61   ;;  %1333 = vst [vmem:[%s2015_s8 + $0x58] sm:$0xff] %v1301_v63  }
 0x1cb   : > { %1334 = vst [vmem:[%s2015_s8 + $0x60] sm:$0xff] %v1306_v44   ;;  %1335 = vst [vmem:[%s2015_s8 + $0x68] sm:$0xff] %v1311_v2  }
 0x1cc   : > { %1336 = vst [vmem:[%s2015_s8 + $0x70] sm:$0xff] %v1316_v56   ;;  %1337 = vst [vmem:[%s2015_s8 + $0x78] sm:$0xff] %v1321_v4  }
 0x1cd PF: > { %s13_s14 = sadd.s32 1, %s1482_s14   ;;  %s2080_s12 = smov %s1478_s13 }
 0x1ce   : > { %p10_p5 = scmp.ge.s32.totalorder %s13_s14, 4   ;;  %s2081_s13 = smov %s2083_s15 }
 0x1d0   :  { %12 = sbr.rel (!%p10_p5) target bundleno = 2 (0x2), region = 68 }

// kernel: unet_forward.15
= control target key start
LH: loop header
LB: loop body
LE: loop exit
PB: predicated region body
PF: predicated region fallthrough
CT: control target
= control target key end

     0   :  { %s784_s12 = smov 0   ;;  %s786_s13 = smov 0   ;;  %s854_s0 = inlined_call_operand.vmem [shape: bf16[128,72], index: 0, kind: input, shape index: {}]   ;;  %s855_s1 = inlined_call_operand.vmem [shape: bf16[72,128], index: 1, kind: input, shape index: {}]   ;;  %s856_s2 = inlined_call_operand.vmem [shape: f32[1,128], index: 2, kind: input, shape index: {}]   ;;  %s857_s3 = inlined_call_operand.vmem [shape: bf16[128,128], index: 3, kind: output, shape index: {}]  }
   0x1   :  { %s788_s14 = smov 0  }
   0x2 LB: > { %s25_s15 = sadd.s32 1, %s758_s13  ;;  %p606_p0 = scmp.ge.s32.totalorder %s762_s14, 1  ;;  %s762_s14 = sphi %s788_s14, %s13_s14   ;;  %s758_s13 = sphi %s786_s13, %s859_s13   ;;  %s754_s12 = sphi %s784_s12, %s858_s12  }
   0x3   : > { %p27_p1 = scmp.ge.s32.totalorder %s25_s15, 2  ;;  %p169_p2 = scmp.lt.s32.totalorder %s762_s14, 3 }
   0x5   : > { %s861_s15 = smov (%p27_p1, %s25_s15), 0  ;;  %p170_p3 = pnand %p606_p0, %p169_p2 }
   0x6   : > { %v729_v0 = vld [vmem:[%s855_s1] sm:$0xff] (!%p170_p3)   ;;  %v730_v1 = vld [vmem:[%s855_s1 + $0x8] sm:$0xff] (!%p170_p3)   ;;  %s607_s20 = sshll.u32 (!%p170_p3), %s754_s12, 3  ;;  %v731_v2 = vld [vmem:[%s855_s1 + $0x10] sm:$0xff] (!%p170_p3)   ;;  %vm297_vm0 = vcmask (!%p170_p3), 588800   ;;  %vm310_vm1 = vcmask (!%p170_p3), 1043456  }
   0x7   : > { %173 = sbr.rel (%p170_p3) target bundleno = 329 (0x149), region = 32  ;;  %675 = vmatprep.subr.bf16.mxu0 (!%p170_p3), %v729_v0  ;;  %693 = vmatprep.subr.bf16.mxu1 (!%p170_p3), %v729_v0  ;;  %p204_p4 = scmp.lt.s32.totalorder (!%p170_p3), %s607_s20, 15  ;;  %v732_v3 = vld [vmem:[%s855_s1 + $0x18] sm:$0xff] (!%p170_p3)   ;;  %v733_v6 = vld [vmem:[%s855_s1 + $0x20] ss:$0 sps:$4 sm:$0xff] (!%p170_p3)  }
   0x8   : > { %676 = vmatpush3.bf16.msra.mxu0 (!%p170_p3), %v729_v0  ;;  %698 = vmatpush3.bf16.msra.mxu1 (!%p170_p3), %v729_v0  ;;  %v312_v7 = vsel (!%p170_p3), %vm310_vm1, %v733_v6, 0  ;;  %v611_v12 = vld [vmem:[%s856_s2] ss:$0 sm:$0xff] (!%p170_p3) }
   0x9   : > { %677 = vmatprep.subr.bf16.mxu0 (!%p170_p3), %v730_v1  ;;  %694 = vmatprep.subr.bf16.mxu1 (!%p170_p3), %v730_v1 }
   0xc   : > { %678 = vmatpush3.bf16.msra.mxu0 (!%p170_p3), %v730_v1  ;;  %699 = vmatpush3.bf16.msra.mxu1 (!%p170_p3), %v730_v1 }
   0xd   : > { %679 = vmatprep.subr.bf16.mxu0 (!%p170_p3), %v731_v2  ;;  %695 = vmatprep.subr.bf16.mxu1 (!%p170_p3), %v731_v2 }
   0xe   : > { %s863_s20 = smov (!%p204_p4, %s607_s20), 15 }
   0xf   : > { %s608_s23 = sshll.u32 %s863_s20, 2 }
  0x10   : > { %s207_s28 = scalar_lea.vmem %s854_s0, %s608_s23  ;;  %680 = vmatpush3.bf16.msra.mxu0 %v731_v2  ;;  %700 = vmatpush3.bf16.msra.mxu1 %v731_v2  ;;  %s223_s8 = scalar_lea.vmem %s857_s3, %s608_s23 }
  0x11   : > { %v734_v4 = vld [vmem:[%s207_s28] sm:$0xff]   ;;  %v736_v5 = vld [vmem:[%s207_s28 + $0x10] sm:$0xff]   ;;  %681 = vmatprep.subr.bf16.mxu0 %v732_v3  ;;  %696 = vmatprep.subr.bf16.mxu1 %v732_v3  ;;  %v735_v8 = vld [vmem:[%s207_s28 + $0x8] sm:$0xff]  }
  0x12   : > { %685 = vmatprep.mubr.msk.bf16.mxu0 %vm297_vm0, %v734_v4  ;;  %689 = vmatprep.mubr.msk.bf16.mxu1 %vm297_vm0, %v736_v5  ;;  %v737_v9 = vld [vmem:[%s207_s28 + $0x18] sm:$0xff]  }
  0x14   : > { %682 = vmatpush3.bf16.msra.mxu0 %v732_v3  ;;  %701 = vmatpush3.bf16.msra.mxu1 %v732_v3 }
  0x15   : > { %703 = vmatprep.subr.msk.bf16.mxu0 %vm310_vm1, %v733_v6  ;;  %704 = vmatprep.subr.msk.bf16.mxu1 %vm310_vm1, %v733_v6 }
  0x18   : > { %684 = vmatpush3.bf16.msra.mxu0 %v312_v7  ;;  %702 = vmatpush3.bf16.msra.mxu1 %v312_v7 }
  0x1b   : > { %686 = vmatmul.mubr.msk.bf16.vlgmr.msra.gmra.mrb[0].mxu0 %vm297_vm0, %v735_v8  ;;  %690 = vmatmul.mubr.msk.bf16.vlgmr.msra.gmra.mrb[0].mxu1 %vm297_vm0, %v737_v9 }
  0xee   : > { %v687_v10 = vpop.f32.mrb[0].mxu0  ;;  %v691_v11 = vpop.f32.mrb[0].mxu1 }
  0xef   : > { %v348_v13 = vpop.f32.mrb[1].mxu0  ;;  %v364_v14 = vpop.f32.mrb[1].mxu1  ;;  %v357_v21 = vadd.f32 %v687_v10, %v611_v12  ;;  %v373_v29 = vadd.f32 %v691_v11, %v611_v12 }
  0xf0   : > { %v688_v15 = vpop.f32.mrb[2].mxu0  ;;  %v692_v16 = vpop.f32.mrb[2].mxu1  ;;  %v349_v19 = vadd.f32 %v611_v12, %v348_v13  ;;  %v365_v25 = vadd.f32 %v611_v12, %v364_v14 }
  0xf1   : > { %v351_v17 = vpop.f32.mrb[3].mxu0  ;;  %v367_v18 = vpop.f32.mrb[3].mxu1  ;;  %v360_v23 = vadd.f32 %v688_v15, %v611_v12  ;;  %v376_v31 = vadd.f32 %v692_v16, %v611_v12 }
  0xf2   : > { %v352_v20 = vadd.f32 %v611_v12, %v351_v17  ;;  %v368_v28 = vadd.f32 %v611_v12, %v367_v18 }
  0xf4   : > { %v379_v22 = vadd.f32 %v352_v20, %v349_v19 }
  0xf6   : > { %v380_v24 = vadd.f32 %v379_v22, %v357_v21 }
  0xf8   : > { %v381_v26 = vadd.f32 %v380_v24, %v360_v23 }
  0xfa   : > { %v382_v27 = vadd.f32 %v381_v26, %v365_v25 }
  0xfc   : > { %v383_v30 = vadd.f32 %v382_v27, %v368_v28 }
  0xfe   : > { %v384_v32 = vadd.f32 %v383_v30, %v373_v29 }
 0x100   : > { %v385_v33 = vadd.f32 %v384_v32, %v376_v31 }
 0x102   : > { %v386_v34 = vrot.slane %v385_v33, 4 }
 0x104   : > { %v387_v35 = vadd.f32 %v386_v34, %v385_v33 }
 0x106   : > { %v388_v36 = vrot.slane %v387_v35, 2 }
 0x108   : > { %v389_v37 = vadd.f32 %v388_v36, %v387_v35 }
 0x10a   : > { %v390_v38 = vrot.slane %v389_v37, 1 }
 0x10c   : > { %v391_v39 = vadd.f32 %v390_v38, %v389_v37 }
 0x10e   : > { %v393_v40 = vmul.f32 0.015625, %v391_v39 }
 0x110   : > { %v394_v41 = vsub.f32 %v349_v19, %v393_v40  ;;  %v395_v42 = vsub.f32 %v352_v20, %v393_v40  ;;  %v396_v43 = vsub.f32 %v357_v21, %v393_v40  ;;  %v397_v44 = vsub.f32 %v360_v23, %v393_v40 }
 0x111   : > { %v398_v45 = vsub.f32 %v365_v25, %v393_v40  ;;  %v399_v46 = vsub.f32 %v368_v28, %v393_v40  ;;  %v400_v47 = vsub.f32 %v373_v29, %v393_v40  ;;  %v401_v48 = vsub.f32 %v376_v31, %v393_v40 }
 0x112   : > { %v402_v49 = vmul.f32 %v394_v41, %v394_v41  ;;  %v403_v50 = vmul.f32 %v395_v42, %v395_v42  ;;  %v404_v51 = vmul.f32 %v396_v43, %v396_v43  ;;  %v405_v53 = vmul.f32 %v397_v44, %v397_v44 }
 0x113   : > { %v406_v55 = vmul.f32 %v398_v45, %v398_v45  ;;  %v407_v57 = vmul.f32 %v399_v46, %v399_v46  ;;  %v408_v59 = vmul.f32 %v400_v47, %v400_v47  ;;  %v409_v61 = vmul.f32 %v401_v48, %v401_v48 }
 0x114   : > { %v410_v52 = vadd.f32 %v403_v50, %v402_v49 }
 0x116   : > { %v411_v54 = vadd.f32 %v410_v52, %v404_v51 }
 0x118   : > { %v412_v56 = vadd.f32 %v411_v54, %v405_v53 }
 0x11a   : > { %v413_v58 = vadd.f32 %v412_v56, %v406_v55 }
 0x11c   : > { %v414_v60 = vadd.f32 %v413_v58, %v407_v57 }
 0x11e   : > { %v415_v62 = vadd.f32 %v414_v60, %v408_v59 }
 0x120   : > { %v416_v63 = vadd.f32 %v415_v62, %v409_v61 }
 0x122   : > { %v417_v0 = vrot.slane %v416_v63, 4 }
 0x124   : > { %v418_v1 = vadd.f32 %v417_v0, %v416_v63 }
 0x126   : > { %v419_v2 = vrot.slane %v418_v1, 2 }
 0x128   : > { %v420_v3 = vadd.f32 %v419_v2, %v418_v1 }
 0x12a   : > { %v421_v4 = vrot.slane %v420_v3, 1 }
 0x12c   : > { %v422_v5 = vadd.f32 %v421_v4, %v420_v3 }
 0x12e   : > { %v423_v6 = vmul.f32 0.015625, %v422_v5 }
 0x130   : > { %v424_v7 = vadd.f32 1e-05, %v423_v6 }
 0x132   : > { %738 = vrsqrt.f32 %v424_v7 }
 0x13c   : > { %v739_v8 = vpop.eup %738 }
 0x13d   : > { %v426_v9 = vmul.f32 %v739_v8, %v394_v41  ;;  %v427_v10 = vmul.f32 %v739_v8, %v395_v42  ;;  %v428_v11 = vmul.f32 %v739_v8, %v396_v43  ;;  %v429_v12 = vmul.f32 %v739_v8, %v397_v44 }
 0x13e   : > { %v430_v13 = vmul.f32 %v739_v8, %v398_v45  ;;  %v431_v14 = vmul.f32 %v739_v8, %v399_v46  ;;  %v432_v15 = vmul.f32 %v739_v8, %v400_v47  ;;  %v433_v16 = vmul.f32 %v739_v8, %v401_v48 }
 0x13f   : > { %vm434_vm2 = vcmp.ge.f32.partialorder %v426_v9, 0.0  ;;  %vm435_vm3 = vcmp.ge.f32.partialorder %v427_v10, 0.0  ;;  %vm436_vm4 = vcmp.ge.f32.partialorder %v428_v11, 0.0  ;;  %vm437_vm5 = vcmp.ge.f32.partialorder %v429_v12, 0.0 }
 0x140   : > { %vm438_vm6 = vcmp.ge.f32.partialorder %v430_v13, 0.0  ;;  %vm439_vm7 = vcmp.ge.f32.partialorder %v431_v14, 0.0  ;;  %vm440_vm8 = vcmp.ge.f32.partialorder %v432_v15, 0.0  ;;  %vm441_vm9 = vcmp.ge.f32.partialorder %v433_v16, 0.0 }
 0x141   : > { %v442_v17 = vmul.f32 0.01, %v426_v9  ;;  %v443_v18 = vmul.f32 0.01, %v427_v10  ;;  %v444_v19 = vmul.f32 0.01, %v428_v11 }
 0x142   : > { %v445_v20 = vmul.f32 0.01, %v429_v12  ;;  %v446_v21 = vmul.f32 0.01, %v430_v13  ;;  %v447_v22 = vmul.f32 0.01, %v431_v14 }
 0x143   : > { %v448_v23 = vmul.f32 0.01, %v432_v15  ;;  %v449_v24 = vmul.f32 0.01, %v433_v16  ;;  %v450_v25 = vsel %vm434_vm2, %v426_v9, %v442_v17  ;;  %v451_v26 = vsel %vm435_vm3, %v427_v10, %v443_v18 }
 0x144   : > { %v452_v27 = vsel %vm436_vm4, %v428_v11, %v444_v19  ;;  %v453_v28 = vsel %vm437_vm5, %v429_v12, %v445_v20  ;;  %v454_v29 = vsel %vm438_vm6, %v430_v13, %v446_v21  ;;  %v455_v30 = vsel %vm439_vm7, %v431_v14, %v447_v22 }
 0x145   : > { %v456_v31 = vsel %vm440_vm8, %v432_v15, %v448_v23  ;;  %v457_v32 = vsel %vm441_vm9, %v433_v16, %v449_v24  ;;  %v646_v33 = vpack.c.bf16 %v451_v26, %v450_v25  ;;  %v651_v34 = vpack.c.bf16 %v453_v28, %v452_v27 }
 0x146   : > { %v656_v35 = vpack.c.bf16 %v455_v30, %v454_v29  ;;  %v661_v36 = vpack.c.bf16 %v457_v32, %v456_v31 }
 0x147   : > { %647 = vst [vmem:[%s223_s8] sm:$0xff] %v646_v33   ;;  %663 = vst [vmem:[%s223_s8 + $0x8] sm:$0xff] %v651_v34  }
 0x148   : > { %664 = vst [vmem:[%s223_s8 + $0x10] sm:$0xff] %v656_v35   ;;  %665 = vst [vmem:[%s223_s8 + $0x18] sm:$0xff] %v661_v36  }
 0x149 PF: > { %s13_s14 = sadd.s32 1, %s762_s14   ;;  %s858_s12 = smov %s758_s13 }
 0x14a   : > { %p10_p5 = scmp.ge.s32.totalorder %s13_s14, 4   ;;  %s859_s13 = smov %s861_s15 }
 0x14c   :  { %12 = sbr.rel (!%p10_p5) target bundleno = 2 (0x2), region = 68 }

// kernel: unet_forward.16
= control target key start
LH: loop header
LB: loop body
LE: loop exit
PB: predicated region body
PF: predicated region fallthrough
CT: control target
= control target key end

     0   :  { %s838_s12 = smov 0   ;;  %s840_s13 = smov 0   ;;  %s927_s0 = inlined_call_operand.vmem [shape: bf16[128,144], index: 0, kind: input, shape index: {}]   ;;  %s928_s1 = inlined_call_operand.vmem [shape: bf16[144,128], index: 1, kind: input, shape index: {}]   ;;  %s929_s2 = inlined_call_operand.vmem [shape: f32[1,128], index: 2, kind: input, shape index: {}]   ;;  %s930_s3 = inlined_call_operand.vmem [shape: bf16[128,128], index: 3, kind: output, shape index: {}]  }
   0x1   :  { %s842_s14 = smov 0  }
   0x2 LB: > { %s25_s15 = sadd.s32 1, %s811_s13  ;;  %p657_p0 = scmp.ge.s32.totalorder %s815_s14, 1  ;;  %s815_s14 = sphi %s842_s14, %s13_s14   ;;  %s811_s13 = sphi %s840_s13, %s932_s13   ;;  %s807_s12 = sphi %s838_s12, %s931_s12  }
   0x3   : > { %p27_p1 = scmp.ge.s32.totalorder %s25_s15, 2  ;;  %p170_p2 = scmp.lt.s32.totalorder %s815_s14, 3 }
   0x5   : > { %s934_s15 = smov (%p27_p1, %s25_s15), 0  ;;  %p171_p3 = pnand %p657_p0, %p170_p2 }
   0x6   : > { %v770_v0 = vld [vmem:[%s928_s1] sm:$0xff] (!%p171_p3)   ;;  %v817_v1 = vmov (!%p171_p3), 0   ;;  %s658_s18 = sshll.u32 (!%p171_p3), %s807_s12, 3  ;;  %v771_v2 = vld [vmem:[%s928_s1 + $0x8] sm:$0xff] (!%p171_p3)   ;;  %v772_v3 = vld [vmem:[%s928_s1 + $0x10] sm:$0xff] (!%p171_p3)   ;;  %vm352_vm0 = vcmask (!%p171_p3), 130048  }
   0x7   : > { %174 = sbr.rel (%p171_p3) target bundleno = 348 (0x15c), region = 32  ;;  %365 = vmatprep.subr.bf16.mxu0 (!%p171_p3), %v817_v1  ;;  %727 = vmatprep.subr.bf16.mxu1 (!%p171_p3), %v817_v1  ;;  %p206_p4 = scmp.lt.s32.totalorder (!%p171_p3), %s658_s18, 15  ;;  %v773_v4 = vld [vmem:[%s928_s1 + $0x18] sm:$0xff] (!%p171_p3)   ;;  %v774_v7 = vld [vmem:[%s928_s1 + $0x20] sm:$0xff] (!%p171_p3)   ;;  %v775_v8 = vld [vmem:[%s928_s1 + $0x28] sm:$0xff] (!%p171_p3)  }
   0x8   : > { %366 = vmatpush1.bf16.msra.mxu0 (!%p171_p3), %v770_v0  ;;  %736 = vmatpush1.bf16.msra.mxu1 (!%p171_p3), %v770_v0  ;;  %v776_v9 = vld [vmem:[%s928_s1 + $0x30] sm:$0xff] (!%p171_p3)   ;;  %v777_v10 = vld [vmem:[%s928_s1 + $0x38] sm:$0xff] (!%p171_p3)   ;;  %v778_v11 = vld [vmem:[%s928_s1 + $0x40] sm:$0xff] (!%p171_p3)  }
   0x9   : > { %367 = vmatprep.subr.bf16.mxu0 (!%p171_p3), %v817_v1  ;;  %728 = vmatprep.subr.bf16.mxu1 (!%p171_p3), %v817_v1  ;;  %v663_v18 = vld [vmem:[%s929_s2] ss:$0 sm:$0xff] (!%p171_p3) }
   0xc   : > { %368 = vmatpush1.bf16.msra.mxu0 (!%p171_p3), %v771_v2  ;;  %737 = vmatpush1.bf16.msra.mxu1 (!%p171_p3), %v771_v2 }
   0xd   : > { %369 = vmatprep.subr.bf16.mxu0 (!%p171_p3), %v817_v1  ;;  %729 = vmatprep.subr.bf16.mxu1 (!%p171_p3), %v817_v1 }
   0xe   : > { %s936_s18 = smov (!%p206_p4, %s658_s18), 15 }
   0xf   : > { %s695_s23 = sshll.u32 %s936_s18, 3  ;;  %s662_s17 = sshll.u32 %s936_s18, 2 }
  0x10   : > { %s871_s26 = scalar_lea.vmem %s927_s0, %s695_s23  ;;  %370 = vmatpush1.bf16.msra.mxu0 %v772_v3  ;;  %738 = vmatpush1.bf16.msra.mxu1 %v772_v3  ;;  %s226_s18 = scalar_lea.vmem %s930_s3, %s662_s17 }
  0x11   : > { %v781_v5 = vld [vmem:[%s871_s26 + $0x4] ss:$8 sps:$4 sm:$0xff]   ;;  %371 = vmatprep.subr.bf16.mxu0 %v817_v1  ;;  %730 = vmatprep.subr.bf16.mxu1 %v817_v1  ;;  %v779_v12 = vld [vmem:[%s871_s26] ss:$8 sps:$4 sm:$0xff]   ;;  %v785_v14 = vld [vmem:[%s871_s26 + $0x14] ss:$8 sps:$4 sm:$0xff]  }
  0x12   : > { %v784_v6 = vld [vmem:[%s871_s26 + $0x24] ss:$8 sps:$4 sm:$0xff]   ;;  %681 = vmatprep.mubr.msk.bf16.mxu0 %vm352_vm0, %v781_v5  ;;  %v782_v13 = vld [vmem:[%s871_s26 + $0x20] ss:$8 sps:$4 sm:$0xff]   ;;  %v788_v15 = vld [vmem:[%s871_s26 + $0x34] ss:$8 sps:$4 sm:$0xff]  }
  0x13   : > { %683 = vmatprep.mubr.msk.bf16.mxu1 %vm352_vm0, %v784_v6  ;;  %v787_v16 = vld [vmem:[%s871_s26 + $0x10] ss:$8 sps:$4 sm:$0xff]  }
  0x14   : > { %372 = vmatpush1.bf16.msra.mxu0 %v773_v4  ;;  %739 = vmatpush1.bf16.msra.mxu1 %v773_v4  ;;  %v790_v17 = vld [vmem:[%s871_s26 + $0x30] ss:$8 sps:$4 sm:$0xff]  }
  0x15   : > { %373 = vmatprep.subr.bf16.mxu0 %v817_v1  ;;  %731 = vmatprep.subr.bf16.mxu1 %v817_v1 }
  0x18   : > { %374 = vmatpush1.bf16.msra.mxu0 %v774_v7  ;;  %740 = vmatpush1.bf16.msra.mxu1 %v774_v7 }
  0x19   : > { %375 = vmatprep.subr.bf16.mxu0 %v817_v1  ;;  %732 = vmatprep.subr.bf16.mxu1 %v817_v1 }
  0x1c   : > { %376 = vmatpush1.bf16.msra.mxu0 %v775_v8  ;;  %741 = vmatpush1.bf16.msra.mxu1 %v775_v8 }
  0x1d   : > { %377 = vmatprep.subr.bf16.mxu0 %v817_v1  ;;  %733 = vmatprep.subr.bf16.mxu1 %v817_v1 }
  0x20   : > { %378 = vmatpush1.bf16.msra.mxu0 %v776_v9  ;;  %742 = vmatpush1.bf16.msra.mxu1 %v776_v9 }
  0x21   : > { %379 = vmatprep.subr.bf16.mxu0 %v817_v1  ;;  %734 = vmatprep.subr.bf16.mxu1 %v817_v1 }
  0x24   : > { %380 = vmatpush1.bf16.msra.mxu0 %v777_v10  ;;  %743 = vmatpush1.bf16.msra.mxu1 %v777_v10 }
  0x25   : > { %381 = vmatprep.subr.bf16.mxu0 %v817_v1  ;;  %735 = vmatprep.subr.bf16.mxu1 %v817_v1 }
  0x28   : > { %382 = vmatpush1.bf16.msra.mxu0 %v778_v11  ;;  %744 = vmatpush1.bf16.msra.mxu1 %v778_v11 }
  0x2b   : > { %398 = vmatmul.mubr.bf16.vlgmr.msra.gmra.mrb[0].mxu0 %v779_v12  ;;  %414 = vmatmul.mubr.bf16.vlgmr.msra.gmra.mrb[0].mxu1 %v782_v13 }
  0x2c   : > { %682 = vmatprep.mubr.msk.bf16.mxu0 %vm352_vm0, %v785_v14  ;;  %684 = vmatprep.mubr.msk.bf16.mxu1 %vm352_vm0, %v788_v15 }
  0x33   : > { %406 = vmatmul.mubr.bf16.gmra.mrb[4].mxu0 %v787_v16  ;;  %422 = vmatmul.mubr.bf16.gmra.mrb[4].mxu1 %v790_v17 }
  0xfe   : > { %v399_v19 = vpop.f32.mrb[0].mxu0  ;;  %v415_v20 = vpop.f32.mrb[0].mxu1 }
  0xff   : > { %v401_v21 = vpop.f32.mrb[1].mxu0  ;;  %v417_v22 = vpop.f32.mrb[1].mxu1  ;;  %v400_v25 = vadd.f32 %v663_v18, %v399_v19  ;;  %v416_v41 = vadd.f32 %v663_v18, %v415_v20 }
 0x100   : > { %v402_v23 = vpop.f32.mrb[2].mxu0  ;;  %v418_v24 = vpop.f32.mrb[2].mxu1 }
 0x101   : > { %v403_v26 = vadd.f32 %v663_v18, %v402_v23  ;;  %v404_v27 = vpop.f32.mrb[3].mxu0  ;;  %v420_v28 = vpop.f32.mrb[3].mxu1  ;;  %v419_v43 = vadd.f32 %v663_v18, %v418_v24 }
 0x103   : > { %v430_v29 = vadd.f32 %v403_v26, %v400_v25 }
 0x106   : > { %v407_v30 = vpop.f32.mrb[4].mxu0  ;;  %v423_v31 = vpop.f32.mrb[4].mxu1 }
 0x107   : > { %v408_v32 = vadd.f32 %v663_v18, %v407_v30  ;;  %v409_v33 = vpop.f32.mrb[5].mxu0  ;;  %v425_v34 = vpop.f32.mrb[5].mxu1  ;;  %v424_v45 = vadd.f32 %v663_v18, %v423_v31 }
 0x108   : > { %v410_v35 = vpop.f32.mrb[6].mxu0  ;;  %v426_v36 = vpop.f32.mrb[6].mxu1 }
 0x109   : > { %v431_v37 = vadd.f32 %v430_v29, %v408_v32  ;;  %v411_v38 = vadd.f32 %v663_v18, %v410_v35  ;;  %v412_v39 = vpop.f32.mrb[7].mxu0  ;;  %v428_v40 = vpop.f32.mrb[7].mxu1  ;;  %v427_v48 = vadd.f32 %v663_v18, %v426_v36 }
 0x10b   : > { %v432_v42 = vadd.f32 %v431_v37, %v411_v38 }
 0x10d   : > { %v433_v44 = vadd.f32 %v432_v42, %v416_v41 }
 0x10f   : > { %v434_v46 = vadd.f32 %v433_v44, %v419_v43 }
 0x111   : > { %v435_v47 = vadd.f32 %v434_v46, %v424_v45 }
 0x113   : > { %v436_v49 = vadd.f32 %v435_v47, %v427_v48 }
 0x115   : > { %v437_v50 = vrot.slane %v436_v49, 4 }
 0x117   : > { %v438_v51 = vadd.f32 %v437_v50, %v436_v49 }
 0x119   : > { %v439_v52 = vrot.slane %v438_v51, 2 }
 0x11b   : > { %v440_v53 = vadd.f32 %v439_v52, %v438_v51 }
 0x11d   : > { %v441_v54 = vrot.slane %v440_v53, 1 }
 0x11f   : > { %v442_v55 = vadd.f32 %v441_v54, %v440_v53 }
 0x121   : > { %v444_v56 = vmul.f32 0.015625, %v442_v55 }
 0x123   : > { %v445_v57 = vsub.f32 %v400_v25, %v444_v56  ;;  %v446_v58 = vsub.f32 %v403_v26, %v444_v56  ;;  %v447_v59 = vsub.f32 %v408_v32, %v444_v56  ;;  %v448_v60 = vsub.f32 %v411_v38, %v444_v56 }
 0x124   : > { %v449_v61 = vsub.f32 %v416_v41, %v444_v56  ;;  %v450_v62 = vsub.f32 %v419_v43, %v444_v56  ;;  %v451_v63 = vsub.f32 %v424_v45, %v444_v56  ;;  %v452_v0 = vsub.f32 %v427_v48, %v444_v56 }
 0x125   : > { %v453_v1 = vmul.f32 %v445_v57, %v445_v57  ;;  %v454_v2 = vmul.f32 %v446_v58, %v446_v58  ;;  %v455_v3 = vmul.f32 %v447_v59, %v447_v59  ;;  %v456_v5 = vmul.f32 %v448_v60, %v448_v60 }
 0x126   : > { %v457_v7 = vmul.f32 %v449_v61, %v449_v61  ;;  %v458_v9 = vmul.f32 %v450_v62, %v450_v62  ;;  %v459_v11 = vmul.f32 %v451_v63, %v451_v63  ;;  %v460_v13 = vmul.f32 %v452_v0, %v452_v0 }
 0x127   : > { %v461_v4 = vadd.f32 %v454_v2, %v453_v1 }
 0x129   : > { %v462_v6 = vadd.f32 %v461_v4, %v455_v3 }
 0x12b   : > { %v463_v8 = vadd.f32 %v462_v6, %v456_v5 }
 0x12d   : > { %v464_v10 = vadd.f32 %v463_v8, %v457_v7 }
 0x12f   : > { %v465_v12 = vadd.f32 %v464_v10, %v458_v9 }
 0x131   : > { %v466_v14 = vadd.f32 %v465_v12, %v459_v11 }
 0x133   : > { %v467_v15 = vadd.f32 %v466_v14, %v460_v13 }
 0x135   : > { %v468_v16 = vrot.slane %v467_v15, 4 }
 0x137   : > { %v469_v17 = vadd.f32 %v468_v16, %v467_v15 }
 0x139   : > { %v470_v18 = vrot.slane %v469_v17, 2 }
 0x13b   : > { %v471_v19 = vadd.f32 %v470_v18, %v469_v17 }
 0x13d   : > { %v472_v20 = vrot.slane %v471_v19, 1 }
 0x13f   : > { %v473_v21 = vadd.f32 %v472_v20, %v471_v19 }
 0x141   : > { %v474_v22 = vmul.f32 0.015625, %v473_v21 }
 0x143   : > { %v475_v23 = vadd.f32 1e-05, %v474_v22 }
 0x145   : > { %791 = vrsqrt.f32 %v475_v23 }
 0x14f   : > { %v792_v24 = vpop.eup %791 }
 0x150   : > { %v477_v25 = vmul.f32 %v792_v24, %v445_v57  ;;  %v478_v26 = vmul.f32 %v792_v24, %v446_v58  ;;  %v479_v27 = vmul.f32 %v792_v24, %v447_v59  ;;  %v480_v28 = vmul.f32 %v792_v24, %v448_v60 }
 0x151   : > { %v481_v29 = vmul.f32 %v792_v24, %v449_v61  ;;  %v482_v30 = vmul.f32 %v792_v24, %v450_v62  ;;  %v483_v31 = vmul.f32 %v792_v24, %v451_v63  ;;  %v484_v32 = vmul.f32 %v792_v24, %v452_v0 }
 0x152   : > { %vm485_vm1 = vcmp.ge.f32.partialorder %v477_v25, 0.0  ;;  %vm486_vm2 = vcmp.ge.f32.partialorder %v478_v26, 0.0  ;;  %vm487_vm3 = vcmp.ge.f32.partialorder %v479_v27, 0.0  ;;  %vm488_vm4 = vcmp.ge.f32.partialorder %v480_v28, 0.0 }
 0x153   : > { %vm489_vm5 = vcmp.ge.f32.partialorder %v481_v29, 0.0  ;;  %vm490_vm6 = vcmp.ge.f32.partialorder %v482_v30, 0.0  ;;  %vm491_vm7 = vcmp.ge.f32.partialorder %v483_v31, 0.0  ;;  %vm492_vm8 = vcmp.ge.f32.partialorder %v484_v32, 0.0 }
 0x154   : > { %v493_v33 = vmul.f32 0.01, %v477_v25  ;;  %v494_v34 = vmul.f32 0.01, %v478_v26  ;;  %v495_v35 = vmul.f32 0.01, %v479_v27 }
 0x155   : > { %v496_v36 = vmul.f32 0.01, %v480_v28  ;;  %v497_v37 = vmul.f32 0.01, %v481_v29  ;;  %v498_v38 = vmul.f32 0.01, %v482_v30 }
 0x156   : > { %v499_v39 = vmul.f32 0.01, %v483_v31  ;;  %v500_v40 = vmul.f32 0.01, %v484_v32  ;;  %v501_v41 = vsel %vm485_vm1, %v477_v25, %v493_v33  ;;  %v502_v42 = vsel %vm486_vm2, %v478_v26, %v494_v34 }
 0x157   : > { %v503_v43 = vsel %vm487_vm3, %v479_v27, %v495_v35  ;;  %v504_v44 = vsel %vm488_vm4, %v480_v28, %v496_v36  ;;  %v505_v45 = vsel %vm489_vm5, %v481_v29, %v497_v37  ;;  %v506_v46 = vsel %vm490_vm6, %v482_v30, %v498_v38 }
 0x158   : > { %v507_v47 = vsel %vm491_vm7, %v483_v31, %v499_v39  ;;  %v508_v48 = vsel %vm492_vm8, %v484_v32, %v500_v40  ;;  %v707_v49 = vpack.c.bf16 %v502_v42, %v501_v41  ;;  %v712_v50 = vpack.c.bf16 %v504_v44, %v503_v43 }
 0x159   : > { %v717_v51 = vpack.c.bf16 %v506_v46, %v505_v45  ;;  %v722_v52 = vpack.c.bf16 %v508_v48, %v507_v47 }
 0x15a   : > { %708 = vst [vmem:[%s226_s18] sm:$0xff] %v707_v49   ;;  %724 = vst [vmem:[%s226_s18 + $0x8] sm:$0xff] %v712_v50  }
 0x15b   : > { %725 = vst [vmem:[%s226_s18 + $0x10] sm:$0xff] %v717_v51   ;;  %726 = vst [vmem:[%s226_s18 + $0x18] sm:$0xff] %v722_v52  }
 0x15c PF: > { %s13_s14 = sadd.s32 1, %s815_s14   ;;  %s931_s12 = smov %s811_s13 }
 0x15d   : > { %p10_p5 = scmp.ge.s32.totalorder %s13_s14, 4   ;;  %s932_s13 = smov %s934_s15 }
 0x15f   :  { %12 = sbr.rel (!%p10_p5) target bundleno = 2 (0x2), region = 68 }

// kernel: unet_forward.17
= control target key start
LH: loop header
LB: loop body
LE: loop exit
PB: predicated region body
PF: predicated region fallthrough
CT: control target
= control target key end

     0   :  { %s628_s12 = smov 0   ;;  %s630_s13 = smov 0   ;;  %s695_s0 = inlined_call_operand.vmem [shape: bf16[32,144], index: 0, kind: input, shape index: {}]   ;;  %s696_s1 = inlined_call_operand.vmem [shape: bf16[144,128], index: 1, kind: input, shape index: {}]   ;;  %s697_s2 = inlined_call_operand.vmem [shape: f32[1,128], index: 2, kind: input, shape index: {}]   ;;  %s698_s3 = inlined_call_operand.vmem [shape: bf16[32,128], index: 3, kind: output, shape index: {}]  }
   0x1   :  { %s632_s14 = smov 0  }
   0x2 LB: > { %s25_s15 = sadd.s32 1, %s601_s13  ;;  %p513_p0 = scmp.ge.s32.totalorder %s605_s14, 1  ;;  %s605_s14 = sphi %s632_s14, %s13_s14   ;;  %s601_s13 = sphi %s630_s13, %s700_s13   ;;  %s597_s12 = sphi %s628_s12, %s699_s12  }
   0x3   : > { %p27_p1 = scmp.ge.s32.totalorder %s25_s15, 2  ;;  %p170_p2 = scmp.lt.s32.totalorder %s605_s14, 3 }
   0x5   : > { %s702_s15 = smov (%p27_p1, %s25_s15), 0  ;;  %p171_p3 = pnand %p513_p0, %p170_p2 }
   0x6   : > { %v569_v0 = vld [vmem:[%s696_s1] sm:$0xff] (!%p171_p3)   ;;  %v607_v1 = vmov (!%p171_p3), 0   ;;  %s514_s18 = sshll.u32 (!%p171_p3), %s597_s12, 1  ;;  %v570_v2 = vld [vmem:[%s696_s1 + $0x8] sm:$0xff] (!%p171_p3)   ;;  %v571_v3 = vld [vmem:[%s696_s1 + $0x10] sm:$0xff] (!%p171_p3)   ;;  %vm319_vm0 = vcmask (!%p171_p3), 130048  }
   0x7   : > { %174 = sbr.rel (%p171_p3) target bundleno = 316 (0x13c), region = 32  ;;  %323 = vmatprep.subr.bf16.mxu0 (!%p171_p3), %v607_v1  ;;  %p206_p4 = scmp.lt.s32.totalorder (!%p171_p3), %s514_s18, 3  ;;  %v572_v4 = vld [vmem:[%s696_s1 + $0x18] sm:$0xff] (!%p171_p3)   ;;  %v573_v6 = vld [vmem:[%s696_s1 + $0x20] sm:$0xff] (!%p171_p3)   ;;  %v574_v7 = vld [vmem:[%s696_s1 + $0x28] sm:$0xff] (!%p171_p3)  }
   0x8   : > { %324 = vmatpush1.bf16.msra.mxu0 (!%p171_p3), %v569_v0  ;;  %v575_v8 = vld [vmem:[%s696_s1 + $0x30] sm:$0xff] (!%p171_p3)   ;;  %v576_v9 = vld [vmem:[%s696_s1 + $0x38] sm:$0xff] (!%p171_p3)   ;;  %v577_v10 = vld [vmem:[%s696_s1 + $0x40] sm:$0xff] (!%p171_p3)  }
   0x9   : > { %325 = vmatprep.subr.bf16.mxu0 (!%p171_p3), %v607_v1  ;;  %v519_v12 = vld [vmem:[%s697_s2] ss:$0 sm:$0xff] (!%p171_p3) }
   0xc   : > { %326 = vmatpush1.bf16.msra.mxu0 (!%p171_p3), %v570_v2 }
   0xd   : > { %327 = vmatprep.subr.bf16.mxu0 (!%p171_p3), %v607_v1 }
   0xe   : > { %s704_s18 = smov (!%p206_p4, %s514_s18), 3 }
   0xf   : > { %s536_s23 = sshll.u32 %s704_s18, 3  ;;  %s518_s17 = sshll.u32 %s704_s18, 2 }
  0x10   : > { %s210_s26 = scalar_lea.vmem %s695_s0, %s536_s23  ;;  %328 = vmatpush1.bf16.msra.mxu0 %v571_v3  ;;  %s226_s21 = scalar_lea.vmem %s698_s3, %s518_s17 }
  0x11   : > { %v580_v5 = vld [vmem:[%s210_s26 + $0x4] ss:$8 sps:$4 sm:$0xff]   ;;  %329 = vmatprep.subr.bf16.mxu0 %v607_v1  ;;  %v578_v11 = vld [vmem:[%s210_s26] ss:$8 sps:$4 sm:$0xff]  }
  0x12   : > { %531 = vmatprep.mubr.msk.bf16.mxu0 %vm319_vm0, %v580_v5 }
  0x14   : > { %330 = vmatpush1.bf16.msra.mxu0 %v572_v4 }
  0x15   : > { %331 = vmatprep.subr.bf16.mxu0 %v607_v1 }
  0x18   : > { %332 = vmatpush1.bf16.msra.mxu0 %v573_v6 }
  0x19   : > { %333 = vmatprep.subr.bf16.mxu0 %v607_v1 }
  0x1c   : > { %334 = vmatpush1.bf16.msra.mxu0 %v574_v7 }
  0x1d   : > { %335 = vmatprep.subr.bf16.mxu0 %v607_v1 }
  0x20   : > { %336 = vmatpush1.bf16.msra.mxu0 %v575_v8 }
  0x21   : > { %337 = vmatprep.subr.bf16.mxu0 %v607_v1 }
  0x24   : > { %338 = vmatpush1.bf16.msra.mxu0 %v576_v9 }
  0x25   : > { %339 = vmatprep.subr.bf16.mxu0 %v607_v1 }
  0x28   : > { %340 = vmatpush1.bf16.msra.mxu0 %v577_v10 }
  0x2b   : > { %356 = vmatmul.mubr.bf16.vlgmr.msra.gmra.mrb[0].mxu0 %v578_v11 }
  0xfe   : > { %v357_v13 = vpop.f32.mrb[0].mxu0 }
  0xff   : > { %v359_v14 = vpop.f32.mrb[1].mxu0  ;;  %v358_v16 = vadd.f32 %v519_v12, %v357_v13 }
 0x100   : > { %v360_v15 = vpop.f32.mrb[2].mxu0 }
 0x101   : > { %v361_v17 = vadd.f32 %v519_v12, %v360_v15  ;;  %v362_v18 = vpop.f32.mrb[3].mxu0 }
 0x103   : > { %v364_v19 = vadd.f32 %v361_v17, %v358_v16 }
 0x105   : > { %v365_v20 = vrot.slane %v364_v19, 4 }
 0x107   : > { %v366_v21 = vadd.f32 %v365_v20, %v364_v19 }
 0x109   : > { %v367_v22 = vrot.slane %v366_v21, 2 }
 0x10b   : > { %v368_v23 = vadd.f32 %v367_v22, %v366_v21 }
 0x10d   : > { %v369_v24 = vrot.slane %v368_v23, 1 }
 0x10f   : > { %v370_v25 = vadd.f32 %v369_v24, %v368_v23 }
 0x111   : > { %v372_v26 = vmul.f32 0.0625, %v370_v25 }
 0x113   : > { %v373_v27 = vsub.f32 %v358_v16, %v372_v26  ;;  %v374_v28 = vsub.f32 %v361_v17, %v372_v26 }
 0x115   : > { %v375_v29 = vmul.f32 %v373_v27, %v373_v27  ;;  %v376_v30 = vmul.f32 %v374_v28, %v374_v28 }
 0x117   : > { %v377_v31 = vadd.f32 %v376_v30, %v375_v29 }
 0x119   : > { %v378_v32 = vrot.slane %v377_v31, 4 }
 0x11b   : > { %v379_v33 = vadd.f32 %v378_v32, %v377_v31 }
 0x11d   : > { %v380_v34 = vrot.slane %v379_v33, 2 }
 0x11f   : > { %v381_v35 = vadd.f32 %v380_v34, %v379_v33 }
 0x121   : > { %v382_v36 = vrot.slane %v381_v35, 1 }
 0x123   : > { %v383_v37 = vadd.f32 %v382_v36, %v381_v35 }
 0x125   : > { %v384_v38 = vmul.f32 0.0625, %v383_v37 }
 0x127   : > { %v385_v39 = vadd.f32 1e-05, %v384_v38 }
 0x129   : > { %581 = vrsqrt.f32 %v385_v39 }
 0x133   : > { %v582_v40 = vpop.eup %581 }
 0x134   : > { %v387_v41 = vmul.f32 %v582_v40, %v373_v27  ;;  %v388_v42 = vmul.f32 %v582_v40, %v374_v28 }
 0x136   : > { %vm389_vm1 = vcmp.ge.f32.partialorder %v387_v41, 0.0  ;;  %vm390_vm2 = vcmp.ge.f32.partialorder %v388_v42, 0.0  ;;  %v391_v43 = vmul.f32 0.01, %v387_v41  ;;  %v392_v44 = vmul.f32 0.01, %v388_v42 }
 0x138   : > { %v393_v45 = vsel %vm389_vm1, %v387_v41, %v391_v43  ;;  %v394_v46 = vsel %vm390_vm2, %v388_v42, %v392_v44 }
 0x139   : > { %v542_v47 = vpack.c.bf16 %v394_v46, %v393_v45 }
 0x13b   : > { %543 = vst [vmem:[%s226_s21] sm:$0xff] %v542_v47  }
 0x13c PF: > { %s13_s14 = sadd.s32 1, %s605_s14   ;;  %s699_s12 = smov %s601_s13 }
 0x13d   : > { %p10_p5 = scmp.ge.s32.totalorder %s13_s14, 4   ;;  %s700_s13 = smov %s702_s15 }
 0x13f   :  { %12 = sbr.rel (!%p10_p5) target bundleno = 2 (0x2), region = 68 }

// kernel: unet_forward.18
= control target key start
LH: loop header
LB: loop body
LE: loop exit
PB: predicated region body
PF: predicated region fallthrough
CT: control target
= control target key end

     0   :  { %s803_s12 = smov 0   ;;  %s805_s13 = smov 0   ;;  %s897_s0 = inlined_call_operand.vmem [shape: bf16[32,288], index: 0, kind: input, shape index: {}]   ;;  %s898_s1 = inlined_call_operand.vmem [shape: bf16[288,128], index: 1, kind: input, shape index: {}]   ;;  %s899_s2 = inlined_call_operand.vmem [shape: f32[1,128], index: 2, kind: input, shape index: {}]   ;;  %s900_s3 = inlined_call_operand.vmem [shape: bf16[32,128], index: 3, kind: output, shape index: {}]  }
   0x1   :  { %s807_s14 = smov 0  }
   0x2 LB: > { %s25_s15 = sadd.s32 1, %s775_s13  ;;  %p634_p0 = scmp.ge.s32.totalorder %s779_s14, 1  ;;  %s779_s14 = sphi %s807_s14, %s13_s14   ;;  %s775_s13 = sphi %s805_s13, %s902_s13   ;;  %s771_s12 = sphi %s803_s12, %s901_s12  }
   0x3   : > { %p27_p1 = scmp.ge.s32.totalorder %s25_s15, 2  ;;  %p170_p2 = scmp.lt.s32.totalorder %s779_s14, 3 }
   0x5   : > { %s904_s15 = smov (%p27_p1, %s25_s15), 0  ;;  %p171_p3 = pnand %p634_p0, %p170_p2 }
   0x6   : > { %v733_v0 = vld [vmem:[%s898_s1 + $0x40] sm:$0xff] (!%p171_p3)   ;;  %v781_v2 = vmov (!%p171_p3), 0.0   ;;  %s635_s20 = sshll.u32 (!%p171_p3), %s771_s12, 1  ;;  %v735_v3 = vld [vmem:[%s898_s1 + $0x48] sm:$0xff] (!%p171_p3)   ;;  %v737_v5 = vld [vmem:[%s898_s1 + $0x50] sm:$0xff] (!%p171_p3)   ;;  %vm782_vm0 = vmmov (!%p171_p3), 0  }
   0x7   : > { %174 = sbr.rel (%p171_p3) target bundleno = 317 (0x13d), region = 32  ;;  %v734_v1 = vld [vmem:[%s898_s1] sm:$0xff] (!%p171_p3)   ;;  %698 = vmatprep.subr.bf16.mxu1 (!%p171_p3), %v781_v2  ;;  %673 = vmatprep.subr.bf16.mxu0 (!%p171_p3), %v733_v0  ;;  %p206_p4 = scmp.lt.s32.totalorder (!%p171_p3), %s635_s20, 3  ;;  %v736_v4 = vld [vmem:[%s898_s1 + $0x8] sm:$0xff] (!%p171_p3)   ;;  %v738_v6 = vld [vmem:[%s898_s1 + $0x10] sm:$0xff] (!%p171_p3)   ;;  %vm399_vm1 = vcmask (!%p171_p3), 261120  }
   0x8   : > { %674 = vmatpush3.bf16.msra.mxu0 (!%p171_p3), %v734_v1  ;;  %702 = vmatprep.mubr.msk.bf16.mxu1 (!%p171_p3), %vm782_vm0, %v781_v2  ;;  %v739_v7 = vld [vmem:[%s898_s1 + $0x58] sm:$0xff] (!%p171_p3)   ;;  %v741_v9 = vld [vmem:[%s898_s1 + $0x60] sm:$0xff] (!%p171_p3)   ;;  %v743_v12 = vld [vmem:[%s898_s1 + $0x68] sm:$0xff] (!%p171_p3)  }
   0x9   : > { %675 = vmatprep.subr.bf16.mxu0 (!%p171_p3), %v735_v3  ;;  %v740_v8 = vld [vmem:[%s898_s1 + $0x18] sm:$0xff] (!%p171_p3)   ;;  %v747_v10 = vld [vmem:[%s898_s1 + $0x80] sm:$0xff] (!%p171_p3)   ;;  %v744_v13 = vld [vmem:[%s898_s1 + $0x28] sm:$0xff] (!%p171_p3)  }
   0xa   : > { %v742_v11 = vld [vmem:[%s898_s1 + $0x20] sm:$0xff] (!%p171_p3)   ;;  %699 = vmatpush3.bf16.msra.mxu1 (!%p171_p3), %v747_v10  ;;  %v753_v15 = vld [vmem:[%s898_s1 + $0x88] sm:$0xff] (!%p171_p3)   ;;  %v745_v16 = vld [vmem:[%s898_s1 + $0x70] sm:$0xff] (!%p171_p3)  }
   0xb   : > { %700 = vmatprep.subr.bf16.mxu1 (!%p171_p3), %v781_v2  ;;  %v746_v18 = vld [vmem:[%s898_s1 + $0x30] sm:$0xff] (!%p171_p3)   ;;  %v748_v19 = vld [vmem:[%s898_s1 + $0x78] sm:$0xff] (!%p171_p3)   ;;  %v639_v28 = vld [vmem:[%s899_s2] ss:$0 sm:$0xff] (!%p171_p3) }
   0xc   : > { %676 = vmatpush3.bf16.msra.mxu0 (!%p171_p3), %v736_v4  ;;  %v749_v20 = vld [vmem:[%s898_s1 + $0x38] sm:$0xff] (!%p171_p3)  }
   0xd   : > { %677 = vmatprep.subr.bf16.mxu0 (!%p171_p3), %v737_v5 }
   0xe   : > { %s906_s20 = smov (!%p206_p4, %s635_s20), 3  ;;  %701 = vmatpush3.bf16.msra.mxu1 %v753_v15 }
   0xf   : > { %s706_s6 = smul.u32 12, %s906_s20  ;;  %s638_s9 = sshll.u32 %s906_s20, 2 }
  0x10   : > { %678 = vmatpush3.bf16.msra.mxu0 %v738_v6  ;;  %s226_s12 = scalar_lea.vmem %s900_s3, %s638_s9 }
  0x11   : > { %679 = vmatprep.subr.bf16.mxu0 %v739_v7  ;;  %s210_s18 = scalar_lea.vmem %s897_s0, %s706_s6 }
  0x12   : > { %v752_v14 = vld [vmem:[%s210_s18 + $0x4] ss:$12 sps:$4 sm:$0xff]   ;;  %v754_v17 = vld [vmem:[%s210_s18 + $0x8] ss:$12 sps:$4 sm:$0xff]   ;;  %v750_v21 = vld [vmem:[%s210_s18] ss:$12 sps:$4 sm:$0xff]  }
  0x13   : > { %435 = vmatprep.mubr.bf16.mxu0 %v752_v14  ;;  %703 = vmatmul.mubr.msk.bf16.vlgmr.msra.gmra.mrb[0].mxu1 %vm399_vm1, %v754_v17 }
  0x14   : > { %680 = vmatpush3.bf16.msra.mxu0 %v740_v8 }
  0x15   : > { %681 = vmatprep.subr.bf16.mxu0 %v741_v9 }
  0x18   : > { %682 = vmatpush3.bf16.msra.mxu0 %v742_v11 }
  0x19   : > { %683 = vmatprep.subr.bf16.mxu0 %v743_v12 }
  0x1c   : > { %684 = vmatpush3.bf16.msra.mxu0 %v744_v13 }
  0x1d   : > { %685 = vmatprep.subr.bf16.mxu0 %v745_v16 }
  0x20   : > { %686 = vmatpush3.bf16.msra.mxu0 %v746_v18 }
  0x21   : > { %687 = vmatprep.subr.bf16.mxu0 %v748_v19 }
  0x24   : > { %688 = vmatpush3.bf16.msra.mxu0 %v749_v20 }
  0x27   : > { %436 = vmatmul.mubr.bf16.vlgmr.msra.gmra.mrb[0].mxu0 %v750_v21 }
  0xe6   : > { %v478_v22 = vpop.f32.mrb[0].mxu1 }
  0xe7   : > { %v704_v23 = vpop.f32.mrb[1].mxu1 }
  0xe8   : > { %v481_v24 = vpop.f32.mrb[2].mxu1 }
  0xe9   : > { %v705_v25 = vpop.f32.mrb[3].mxu1 }
  0xfa   : > { %v689_v26 = vpop.f32.mrb[0].mxu0 }
  0xfb   : > { %v690_v27 = vpop.f32.mrb[1].mxu0 }
  0xfc   : > { %v691_v29 = vadd.f32 %v690_v27, %v689_v26  ;;  %v692_v30 = vpop.f32.mrb[2].mxu0 }
  0xfd   : > { %v693_v31 = vpop.f32.mrb[3].mxu0 }
  0xfe   : > { %v438_v32 = vadd.f32 %v691_v29, %v639_v28  ;;  %v694_v33 = vadd.f32 %v693_v31, %v692_v30 }
 0x100   : > { %v479_v34 = vadd.f32 %v478_v22, %v438_v32  ;;  %v441_v35 = vadd.f32 %v694_v33, %v639_v28 }
 0x102   : > { %v482_v36 = vadd.f32 %v481_v24, %v441_v35 }
 0x104   : > { %v485_v37 = vadd.f32 %v482_v36, %v479_v34 }
 0x106   : > { %v486_v38 = vrot.slane %v485_v37, 4 }
 0x108   : > { %v487_v39 = vadd.f32 %v486_v38, %v485_v37 }
 0x10a   : > { %v488_v40 = vrot.slane %v487_v39, 2 }
 0x10c   : > { %v489_v41 = vadd.f32 %v488_v40, %v487_v39 }
 0x10e   : > { %v490_v42 = vrot.slane %v489_v41, 1 }
 0x110   : > { %v491_v43 = vadd.f32 %v490_v42, %v489_v41 }
 0x112   : > { %v493_v44 = vmul.f32 0.0625, %v491_v43 }
 0x114   : > { %v494_v45 = vsub.f32 %v479_v34, %v493_v44  ;;  %v495_v46 = vsub.f32 %v482_v36, %v493_v44 }
 0x116   : > { %v496_v47 = vmul.f32 %v494_v45, %v494_v45  ;;  %v497_v48 = vmul.f32 %v495_v46, %v495_v46 }
 0x118   : > { %v498_v49 = vadd.f32 %v497_v48, %v496_v47 }
 0x11a   : > { %v499_v50 = vrot.slane %v498_v49, 4 }
 0x11c   : > { %v500_v51 = vadd.f32 %v499_v50, %v498_v49 }
 0x11e   : > { %v501_v52 = vrot.slane %v500_v51, 2 }
 0x120   : > { %v502_v53 = vadd.f32 %v501_v52, %v500_v51 }
 0x122   : > { %v503_v54 = vrot.slane %v502_v53, 1 }
 0x124   : > { %v504_v55 = vadd.f32 %v503_v54, %v502_v53 }
 0x126   : > { %v505_v56 = vmul.f32 0.0625, %v504_v55 }
 0x128   : > { %v506_v57 = vadd.f32 1e-05, %v505_v56 }
 0x12a   : > { %755 = vrsqrt.f32 %v506_v57 }
 0x134   : > { %v756_v58 = vpop.eup %755 }
 0x135   : > { %v508_v59 = vmul.f32 %v756_v58, %v494_v45  ;;  %v509_v60 = vmul.f32 %v756_v58, %v495_v46 }
 0x137   : > { %vm510_vm2 = vcmp.ge.f32.partialorder %v508_v59, 0.0  ;;  %vm511_vm3 = vcmp.ge.f32.partialorder %v509_v60, 0.0  ;;  %v512_v61 = vmul.f32 0.01, %v508_v59  ;;  %v513_v62 = vmul.f32 0.01, %v509_v60 }
 0x139   : > { %v514_v63 = vsel %vm510_vm2, %v508_v59, %v512_v61  ;;  %v515_v0 = vsel %vm511_vm3, %v509_v60, %v513_v62 }
 0x13a   : > { %v671_v1 = vpack.c.bf16 %v515_v0, %v514_v63 }
 0x13c   : > { %672 = vst [vmem:[%s226_s12] sm:$0xff] %v671_v1  }
 0x13d PF: > { %s13_s14 = sadd.s32 1, %s779_s14   ;;  %s901_s12 = smov %s775_s13 }
 0x13e   : > { %p10_p5 = scmp.ge.s32.totalorder %s13_s14, 4   ;;  %s902_s13 = smov %s904_s15 }
 0x140   :  { %12 = sbr.rel (!%p10_p5) target bundleno = 2 (0x2), region = 68 }

// kernel: unet_forward.19
= control target key start
LH: loop header
LB: loop body
LE: loop exit
PB: predicated region body
PF: predicated region fallthrough
CT: control target
= control target key end

     0   :  { %s526_s12 = smov 0   ;;  %s528_s13 = smov 0   ;;  %s568_s0 = inlined_call_operand.vmem [shape: bf16[32,32], index: 0, kind: input, shape index: {}]   ;;  %s569_s1 = inlined_call_operand.vmem [shape: bf16[32,128], index: 1, kind: input, shape index: {}]   ;;  %s570_s2 = inlined_call_operand.vmem [shape: f32[1,128], index: 2, kind: input, shape index: {}]   ;;  %s571_s3 = inlined_call_operand.vmem [shape: bf16[32,128], index: 3, kind: output, shape index: {}]  }
   0x1   :  { %s530_s14 = smov 0  }
   0x2 LB: > { %s25_s15 = sadd.s32 1, %s498_s13  ;;  %p419_p0 = scmp.ge.s32.totalorder %s502_s14, 1  ;;  %s502_s14 = sphi %s530_s14, %s13_s14   ;;  %s498_s13 = sphi %s528_s13, %s573_s13   ;;  %s494_s12 = sphi %s526_s12, %s572_s12  }
   0x3   : > { %p27_p1 = scmp.ge.s32.totalorder %s25_s15, 2  ;;  %p169_p2 = scmp.lt.s32.totalorder %s502_s14, 3 }
   0x5   : > { %s575_s15 = smov (%p27_p1, %s25_s15), 0  ;;  %p170_p3 = pnand %p419_p0, %p169_p2 }
   0x6   : > { %v477_v0 = vld [vmem:[%s569_s1] sm:$0xff] (!%p170_p3)   ;;  %v504_v1 = vmov (!%p170_p3), 0.0   ;;  %v478_v2 = vld [vmem:[%s569_s1 + $0x8] sm:$0xff] (!%p170_p3)   ;;  %vm505_vm0 = vmmov (!%p170_p3), 0   ;;  %s420_s20 = sshll.u32 (!%p170_p3), %s494_s12, 1  ;;  %vm256_vm1 = vcmask (!%p170_p3), 261120  }
   0x7   : > { %173 = sbr.rel (%p170_p3) target bundleno = 237 (0xed), region = 32  ;;  %443 = vmatprep.subr.bf16.mxu0 (!%p170_p3), %v504_v1  ;;  %447 = vmatprep.mubr.msk.bf16.mxu0 (!%p170_p3), %vm505_vm0, %v504_v1  ;;  %p204_p4 = scmp.lt.s32.totalorder (!%p170_p3), %s420_s20, 3  ;;  %v424_v4 = vld [vmem:[%s570_s2] ss:$0 sm:$0xff] (!%p170_p3) }
   0x8   : > { %444 = vmatpush3.bf16.msra.mxu0 (!%p170_p3), %v477_v0 }
   0x9   : > { %445 = vmatprep.subr.bf16.mxu0 (!%p170_p3), %v504_v1 }
   0xc   : > { %446 = vmatpush3.bf16.msra.mxu0 (!%p170_p3), %v478_v2 }
   0xe   : > { %s577_s20 = smov (!%p204_p4, %s420_s20), 3 }
   0xf   : > { %s421_s21 = sshll.u32 %s577_s20, 2 }
  0x10   : > { %s207_s24 = scalar_lea.vmem %s568_s0, %s421_s21  ;;  %s223_s29 = scalar_lea.vmem %s571_s3, %s421_s21 }
  0x11   : > { %v479_v3 = vld [vmem:[%s207_s24] sm:$0xff]  }
  0x12   : > { %448 = vmatmul.mubr.msk.bf16.vlgmr.msra.gmra.mrb[0].mxu0 %vm256_vm1, %v479_v3 }
  0xe5   : > { %v294_v5 = vpop.f32.mrb[0].mxu0 }
  0xe6   : > { %v449_v6 = vpop.f32.mrb[1].mxu0  ;;  %v295_v8 = vadd.f32 %v424_v4, %v294_v5 }
  0xe7   : > { %v297_v7 = vpop.f32.mrb[2].mxu0 }
  0xe8   : > { %v298_v9 = vadd.f32 %v424_v4, %v297_v7  ;;  %v450_v10 = vpop.f32.mrb[3].mxu0 }
  0xea   : > { %v438_v11 = vpack.c.bf16 %v298_v9, %v295_v8 }
  0xec   : > { %439 = vst [vmem:[%s223_s29] sm:$0xff] %v438_v11  }
  0xed PF: > { %s13_s14 = sadd.s32 1, %s502_s14   ;;  %s572_s12 = smov %s498_s13 }
  0xee   : > { %p10_p5 = scmp.ge.s32.totalorder %s13_s14, 4   ;;  %s573_s13 = smov %s575_s15 }
  0xf0   :  { %12 = sbr.rel (!%p10_p5) target bundleno = 2 (0x2), region = 68 }

// kernel: unet_forward.22
= control target key start
LH: loop header
LB: loop body
LE: loop exit
PB: predicated region body
PF: predicated region fallthrough
CT: control target
= control target key end

     0   :  { %s641_s12 = smov 0   ;;  %s643_s13 = smov 0   ;;  %s680_s0 = inlined_call_operand.vmem [shape: bf16[128,16], index: 0, kind: input, shape index: {}]   ;;  %s681_s1 = inlined_call_operand.vmem [shape: bf16[16,128], index: 1, kind: input, shape index: {}]   ;;  %s682_s2 = inlined_call_operand.vmem [shape: f32[1,128], index: 2, kind: input, shape index: {}]   ;;  %s683_s3 = inlined_call_operand.vmem [shape: bf16[128,128], index: 3, kind: output, shape index: {}]  }
   0x1   :  { %s645_s14 = smov 0  }
   0x2 LB: > { %s25_s15 = sadd.s32 1, %s615_s13  ;;  %p495_p0 = scmp.ge.s32.totalorder %s619_s14, 1  ;;  %s619_s14 = sphi %s645_s14, %s13_s14   ;;  %s615_s13 = sphi %s643_s13, %s685_s13   ;;  %s611_s12 = sphi %s641_s12, %s684_s12  }
   0x3   : > { %p27_p1 = scmp.ge.s32.totalorder %s25_s15, 2  ;;  %p169_p2 = scmp.lt.s32.totalorder %s619_s14, 3 }
   0x5   : > { %s687_s15 = smov (%p27_p1, %s25_s15), 0  ;;  %p170_p3 = pnand %p495_p0, %p169_p2 }
   0x6   : > { %v592_v0 = vld [vmem:[%s681_s1] sm:$0xff] (!%p170_p3)   ;;  %s496_s18 = sshll.u32 (!%p170_p3), %s611_s12, 3  ;;  %vm269_vm0 = vcmask (!%p170_p3), 130048  }
   0x7   : > { %173 = sbr.rel (%p170_p3) target bundleno = 239 (0xef), region = 32  ;;  %p204_p4 = scmp.lt.s32.totalorder (!%p170_p3), %s496_s18, 15  ;;  %556 = vmatprep.subr.bf16.mxu0 (!%p170_p3), %v592_v0  ;;  %566 = vmatprep.subr.bf16.mxu1 (!%p170_p3), %v592_v0  ;;  %v500_v6 = vld [vmem:[%s682_s2] ss:$0 sm:$0xff] (!%p170_p3) }
   0x8   : > { %557 = vmatpush3.bf16.msra.mxu0 (!%p170_p3), %v592_v0  ;;  %567 = vmatpush3.bf16.msra.mxu1 (!%p170_p3), %v592_v0 }
   0xe   : > { %s689_s18 = smov (!%p204_p4, %s496_s18), 15 }
   0xf   : > { %s497_s19 = sshll.u32 %s689_s18, 2 }
  0x10   : > { %s207_s22 = scalar_lea.vmem %s680_s0, %s497_s19  ;;  %s223_s27 = scalar_lea.vmem %s683_s3, %s497_s19 }
  0x11   : > { %v593_v1 = vld [vmem:[%s207_s22] sm:$0xff]   ;;  %v594_v2 = vld [vmem:[%s207_s22 + $0x10] sm:$0xff]   ;;  %v595_v3 = vld [vmem:[%s207_s22 + $0x8] sm:$0xff]  }
  0x12   : > { %558 = vmatprep.mubr.msk.bf16.mxu0 %vm269_vm0, %v593_v1  ;;  %562 = vmatprep.mubr.msk.bf16.mxu1 %vm269_vm0, %v594_v2  ;;  %v596_v4 = vld [vmem:[%s207_s22 + $0x18] sm:$0xff]  }
  0x13   : > { %559 = vmatmul.mubr.msk.bf16.vlgmr.msra.gmra.mrb[0].mxu0 %vm269_vm0, %v595_v3  ;;  %563 = vmatmul.mubr.msk.bf16.vlgmr.msra.gmra.mrb[0].mxu1 %vm269_vm0, %v596_v4 }
  0xe6   : > { %v560_v5 = vpop.f32.mrb[0].mxu0  ;;  %v564_v7 = vpop.f32.mrb[0].mxu1 }
  0xe7   : > { %v316_v8 = vpop.f32.mrb[1].mxu0  ;;  %v332_v9 = vpop.f32.mrb[1].mxu1  ;;  %v325_v11 = vadd.f32 %v560_v5, %v500_v6  ;;  %v341_v15 = vadd.f32 %v564_v7, %v500_v6 }
  0xe8   : > { %v561_v10 = vpop.f32.mrb[2].mxu0  ;;  %v565_v13 = vpop.f32.mrb[2].mxu1  ;;  %v317_v16 = vadd.f32 %v500_v6, %v316_v8  ;;  %v333_v20 = vadd.f32 %v500_v6, %v332_v9 }
  0xe9   : > { %v328_v12 = vadd.f32 %v561_v10, %v500_v6  ;;  %v319_v14 = vpop.f32.mrb[3].mxu0  ;;  %v344_v17 = vadd.f32 %v565_v13, %v500_v6  ;;  %v335_v19 = vpop.f32.mrb[3].mxu1 }
  0xea   : > { %v320_v18 = vadd.f32 %v500_v6, %v319_v14  ;;  %v336_v22 = vadd.f32 %v500_v6, %v335_v19 }
  0xeb   : > { %v536_v21 = vpack.c.bf16 %v328_v12, %v325_v11  ;;  %v546_v23 = vpack.c.bf16 %v344_v17, %v341_v15 }
  0xec   : > { %v531_v24 = vpack.c.bf16 %v320_v18, %v317_v16  ;;  %v541_v25 = vpack.c.bf16 %v336_v22, %v333_v20 }
  0xed   : > { %548 = vst [vmem:[%s223_s27 + $0x8] sm:$0xff] %v536_v21   ;;  %550 = vst [vmem:[%s223_s27 + $0x18] sm:$0xff] %v546_v23  }
  0xee   : > { %532 = vst [vmem:[%s223_s27] sm:$0xff] %v531_v24   ;;  %549 = vst [vmem:[%s223_s27 + $0x10] sm:$0xff] %v541_v25  }
  0xef PF: > { %s13_s14 = sadd.s32 1, %s619_s14   ;;  %s684_s12 = smov %s615_s13 }
  0xf0   : > { %p10_p5 = scmp.ge.s32.totalorder %s13_s14, 4   ;;  %s685_s13 = smov %s687_s15 }
  0xf2   :  { %12 = sbr.rel (!%p10_p5) target bundleno = 2 (0x2), region = 68 }

// kernel: unet_forward.20
= control target key start
LH: loop header
LB: loop body
LE: loop exit
PB: predicated region body
PF: predicated region fallthrough
CT: control target
= control target key end

     0   :  { %s1086_s12 = smov 0   ;;  %s1088_s13 = smov 0   ;;  %s1206_s0 = inlined_call_operand.vmem [shape: bf16[128,288], index: 0, kind: input, shape index: {}]   ;;  %s1207_s1 = inlined_call_operand.vmem [shape: bf16[288,128], index: 1, kind: input, shape index: {}]   ;;  %s1208_s2 = inlined_call_operand.vmem [shape: f32[1,128], index: 2, kind: input, shape index: {}]   ;;  %s1209_s3 = inlined_call_operand.vmem [shape: bf16[128,128], index: 3, kind: output, shape index: {}]  }
   0x1   :  { %s1090_s14 = smov 0  }
   0x2 LB: > { %s25_s15 = sadd.s32 1, %s1060_s13  ;;  %p826_p0 = scmp.ge.s32.totalorder %s1064_s14, 1  ;;  %s1064_s14 = sphi %s1090_s14, %s13_s14   ;;  %s1060_s13 = sphi %s1088_s13, %s1211_s13   ;;  %s1056_s12 = sphi %s1086_s12, %s1210_s12  }
   0x3   : > { %p27_p1 = scmp.ge.s32.totalorder %s25_s15, 2  ;;  %p170_p2 = scmp.lt.s32.totalorder %s1064_s14, 3 }
   0x5   : > { %s1213_s15 = smov (%p27_p1, %s25_s15), 0  ;;  %p171_p3 = pnand %p826_p0, %p170_p2 }
   0x6   : > { %v1006_v0 = vld [vmem:[%s1207_s1 + $0x40] sm:$0xff] (!%p171_p3)   ;;  %s827_s18 = sshll.u32 (!%p171_p3), %s1056_s12, 3  ;;  %v1008_v2 = vld [vmem:[%s1207_s1 + $0x48] sm:$0xff] (!%p171_p3)   ;;  %v1010_v4 = vld [vmem:[%s1207_s1 + $0x50] sm:$0xff] (!%p171_p3)   ;;  %vm456_vm0 = vcmask (!%p171_p3), 261120  }
   0x7   : > { %174 = sbr.rel (%p171_p3) target bundleno = 353 (0x161), region = 32  ;;  %v1007_v1 = vld [vmem:[%s1207_s1] sm:$0xff] (!%p171_p3)   ;;  %907 = vmatprep.subr.bf16.mxu0 (!%p171_p3), %v1006_v0  ;;  %965 = vmatprep.subr.bf16.mxu1 (!%p171_p3), %v1006_v0  ;;  %p206_p4 = scmp.lt.s32.totalorder (!%p171_p3), %s827_s18, 15  ;;  %v1009_v3 = vld [vmem:[%s1207_s1 + $0x8] sm:$0xff] (!%p171_p3)   ;;  %v1011_v5 = vld [vmem:[%s1207_s1 + $0x10] sm:$0xff] (!%p171_p3)  }
   0x8   : > { %908 = vmatpush3.bf16.msra.mxu0 (!%p171_p3), %v1007_v1  ;;  %973 = vmatpush3.bf16.msra.mxu1 (!%p171_p3), %v1007_v1  ;;  %v1012_v6 = vld [vmem:[%s1207_s1 + $0x58] sm:$0xff] (!%p171_p3)   ;;  %v1014_v8 = vld [vmem:[%s1207_s1 + $0x60] sm:$0xff] (!%p171_p3)   ;;  %v1016_v10 = vld [vmem:[%s1207_s1 + $0x68] sm:$0xff] (!%p171_p3)  }
   0x9   : > { %909 = vmatprep.subr.bf16.mxu0 (!%p171_p3), %v1008_v2  ;;  %966 = vmatprep.subr.bf16.mxu1 (!%p171_p3), %v1008_v2  ;;  %v1013_v7 = vld [vmem:[%s1207_s1 + $0x18] sm:$0xff] (!%p171_p3)   ;;  %v1015_v9 = vld [vmem:[%s1207_s1 + $0x20] sm:$0xff] (!%p171_p3)   ;;  %v1017_v13 = vld [vmem:[%s1207_s1 + $0x28] sm:$0xff] (!%p171_p3)  }
   0xa   : > { %v1018_v14 = vld [vmem:[%s1207_s1 + $0x70] sm:$0xff] (!%p171_p3)   ;;  %v1020_v16 = vld [vmem:[%s1207_s1 + $0x78] sm:$0xff] (!%p171_p3)   ;;  %v1028_v18 = vld [vmem:[%s1207_s1 + $0x80] sm:$0xff] (!%p171_p3)  }
   0xb   : > { %v1019_v15 = vld [vmem:[%s1207_s1 + $0x30] sm:$0xff] (!%p171_p3)   ;;  %v1021_v17 = vld [vmem:[%s1207_s1 + $0x38] sm:$0xff] (!%p171_p3)   ;;  %v1029_v22 = vld [vmem:[%s1207_s1 + $0x88] sm:$0xff] (!%p171_p3)  }
   0xc   : > { %910 = vmatpush3.bf16.msra.mxu0 (!%p171_p3), %v1009_v3  ;;  %974 = vmatpush3.bf16.msra.mxu1 (!%p171_p3), %v1009_v3  ;;  %v831_v42 = vld [vmem:[%s1208_s2] ss:$0 sm:$0xff] (!%p171_p3) }
   0xd   : > { %911 = vmatprep.subr.bf16.mxu0 (!%p171_p3), %v1010_v4  ;;  %967 = vmatprep.subr.bf16.mxu1 (!%p171_p3), %v1010_v4 }
   0xe   : > { %s1215_s18 = smov (!%p206_p4, %s827_s18), 15 }
   0xf   : > { %s981_s4 = smul.u32 12, %s1215_s18  ;;  %s830_s9 = sshll.u32 %s1215_s18, 2 }
  0x10   : > { %912 = vmatpush3.bf16.msra.mxu0 %v1011_v5  ;;  %975 = vmatpush3.bf16.msra.mxu1 %v1011_v5  ;;  %s226_s18 = scalar_lea.vmem %s1209_s3, %s830_s9 }
  0x11   : > { %913 = vmatprep.subr.bf16.mxu0 %v1012_v6  ;;  %968 = vmatprep.subr.bf16.mxu1 %v1012_v6  ;;  %s1137_s11 = scalar_lea.vmem %s1206_s0, %s981_s4 }
  0x12   : > { %v1024_v11 = vld [vmem:[%s1137_s11 + $0x4] ss:$12 sps:$4 sm:$0xff]   ;;  %v1027_v12 = vld [vmem:[%s1137_s11 + $0x4c] ss:$12 sps:$4 sm:$0xff]   ;;  %v1025_v20 = vld [vmem:[%s1137_s11 + $0x48] ss:$12 sps:$4 sm:$0xff]  }
  0x13   : > { %501 = vmatprep.mubr.bf16.mxu0 %v1024_v11  ;;  %525 = vmatprep.mubr.bf16.mxu1 %v1027_v12  ;;  %v1022_v19 = vld [vmem:[%s1137_s11] ss:$12 sps:$4 sm:$0xff]   ;;  %v1030_v21 = vld [vmem:[%s1137_s11 + $0x1c] ss:$12 sps:$4 sm:$0xff]   ;;  %v1033_v24 = vld [vmem:[%s1137_s11 + $0x18] ss:$12 sps:$4 sm:$0xff]  }
  0x14   : > { %914 = vmatpush3.bf16.msra.mxu0 %v1013_v7  ;;  %976 = vmatpush3.bf16.msra.mxu1 %v1013_v7  ;;  %v1032_v23 = vld [vmem:[%s1137_s11 + $0x8] ss:$12 sps:$4 sm:$0xff]   ;;  %v1034_v25 = vld [vmem:[%s1137_s11 + $0x20] ss:$12 sps:$4 sm:$0xff]   ;;  %v1037_v27 = vld [vmem:[%s1137_s11 + $0x38] ss:$12 sps:$4 sm:$0xff]  }
  0x15   : > { %915 = vmatprep.subr.bf16.mxu0 %v1014_v8  ;;  %969 = vmatprep.subr.bf16.mxu1 %v1014_v8  ;;  %v1035_v26 = vld [vmem:[%s1137_s11 + $0x34] ss:$12 sps:$4 sm:$0xff]   ;;  %v1038_v28 = vld [vmem:[%s1137_s11 + $0x30] ss:$12 sps:$4 sm:$0xff]  }
  0x16   : > { %v1039_v29 = vld [vmem:[%s1137_s11 + $0x50] ss:$12 sps:$4 sm:$0xff]  }
  0x18   : > { %916 = vmatpush3.bf16.msra.mxu0 %v1015_v9  ;;  %977 = vmatpush3.bf16.msra.mxu1 %v1015_v9 }
  0x19   : > { %917 = vmatprep.subr.bf16.mxu0 %v1016_v10  ;;  %970 = vmatprep.subr.bf16.mxu1 %v1016_v10 }
  0x1c   : > { %918 = vmatpush3.bf16.msra.mxu0 %v1017_v13  ;;  %978 = vmatpush3.bf16.msra.mxu1 %v1017_v13 }
  0x1d   : > { %919 = vmatprep.subr.bf16.mxu0 %v1018_v14  ;;  %971 = vmatprep.subr.bf16.mxu1 %v1018_v14 }
  0x20   : > { %920 = vmatpush3.bf16.msra.mxu0 %v1019_v15  ;;  %979 = vmatpush3.bf16.msra.mxu1 %v1019_v15 }
  0x21   : > { %921 = vmatprep.subr.bf16.mxu0 %v1020_v16  ;;  %972 = vmatprep.subr.bf16.mxu1 %v1020_v16 }
  0x24   : > { %922 = vmatpush3.bf16.msra.mxu0 %v1021_v17  ;;  %980 = vmatpush3.bf16.msra.mxu1 %v1021_v17 }
  0x25   : > { %953 = vmatprep.subr.bf16.mxu1 %v1028_v18 }
  0x27   : > { %502 = vmatmul.mubr.bf16.vlgmr.msra.gmra.mrb[0].mxu0 %v1022_v19  ;;  %526 = vmatmul.mubr.bf16.vlgmr.msra.gmra.mrb[0].mxu1 %v1025_v20 }
  0x28   : > { %954 = vmatpush3.bf16.msra.mxu1 %v1028_v18  ;;  %509 = vmatprep.mubr.bf16.mxu0 %v1030_v21 }
  0x29   : > { %955 = vmatprep.subr.bf16.mxu1 %v1029_v22  ;;  %957 = vmatprep.mubr.msk.bf16.mxu1 %vm456_vm0, %v1032_v23 }
  0x2c   : > { %956 = vmatpush3.bf16.msra.mxu1 %v1029_v22 }
  0x2f   : > { %510 = vmatmul.mubr.bf16.gmra.mrb[4].mxu0 %v1033_v24  ;;  %958 = vmatmul.mubr.msk.bf16.vlgmr.msra.gmra.mrb[4].mxu1 %vm456_vm0, %v1034_v25 }
  0x30   : > { %517 = vmatprep.mubr.bf16.mxu0 %v1035_v26  ;;  %961 = vmatprep.mubr.msk.bf16.mxu1 %vm456_vm0, %v1037_v27 }
  0x37   : > { %518 = vmatmul.mubr.bf16.gmra.mrb[8].mxu0 %v1038_v28  ;;  %962 = vmatmul.mubr.msk.bf16.gmra.mrb[8].mxu1 %vm456_vm0, %v1039_v29 }
  0xfa   : > { %v923_v30 = vpop.f32.mrb[0].mxu0  ;;  %v941_v31 = vpop.f32.mrb[0].mxu1 }
  0xfb   : > { %v924_v32 = vpop.f32.mrb[1].mxu0  ;;  %v942_v33 = vpop.f32.mrb[1].mxu1 }
  0xfc   : > { %v925_v34 = vadd.f32 %v924_v32, %v923_v30  ;;  %v926_v35 = vpop.f32.mrb[2].mxu0  ;;  %v943_v36 = vadd.f32 %v942_v33, %v941_v31  ;;  %v944_v37 = vpop.f32.mrb[2].mxu1 }
  0xfd   : > { %v927_v38 = vpop.f32.mrb[3].mxu0  ;;  %v945_v39 = vpop.f32.mrb[3].mxu1 }
  0xfe   : > { %v928_v40 = vadd.f32 %v927_v38, %v926_v35  ;;  %v946_v41 = vadd.f32 %v945_v39, %v944_v37  ;;  %v504_v45 = vadd.f32 %v925_v34, %v831_v42  ;;  %v528_v61 = vadd.f32 %v943_v36, %v831_v42 }
 0x100   : > { %v507_v52 = vadd.f32 %v928_v40, %v831_v42  ;;  %v531_v5 = vadd.f32 %v946_v41, %v831_v42 }
 0x102   : > { %v929_v43 = vpop.f32.mrb[4].mxu0  ;;  %v959_v44 = vpop.f32.mrb[4].mxu1 }
 0x103   : > { %v930_v46 = vpop.f32.mrb[5].mxu0  ;;  %v568_v47 = vpop.f32.mrb[5].mxu1 }
 0x104   : > { %v931_v48 = vadd.f32 %v930_v46, %v929_v43  ;;  %v569_v49 = vadd.f32 %v568_v47, %v504_v45  ;;  %v932_v50 = vpop.f32.mrb[6].mxu0  ;;  %v960_v51 = vpop.f32.mrb[6].mxu1 }
 0x105   : > { %v933_v53 = vpop.f32.mrb[7].mxu0  ;;  %v571_v54 = vpop.f32.mrb[7].mxu1 }
 0x106   : > { %v512_v55 = vadd.f32 %v931_v48, %v831_v42  ;;  %v934_v56 = vadd.f32 %v933_v53, %v932_v50  ;;  %v572_v57 = vadd.f32 %v571_v54, %v507_v52 }
 0x108   : > { %v577_v58 = vadd.f32 %v959_v44, %v512_v55  ;;  %v515_v59 = vadd.f32 %v934_v56, %v831_v42  ;;  %v599_v60 = vadd.f32 %v572_v57, %v569_v49 }
 0x10a   : > { %v580_v62 = vadd.f32 %v960_v51, %v515_v59  ;;  %v600_v63 = vadd.f32 %v599_v60, %v577_v58  ;;  %v935_v0 = vpop.f32.mrb[8].mxu0  ;;  %v963_v1 = vpop.f32.mrb[8].mxu1 }
 0x10b   : > { %v593_v2 = vadd.f32 %v963_v1, %v528_v61  ;;  %v936_v3 = vpop.f32.mrb[9].mxu0  ;;  %v584_v4 = vpop.f32.mrb[9].mxu1 }
 0x10c   : > { %v937_v6 = vadd.f32 %v936_v3, %v935_v0  ;;  %v601_v7 = vadd.f32 %v600_v63, %v580_v62  ;;  %v938_v8 = vpop.f32.mrb[10].mxu0  ;;  %v964_v9 = vpop.f32.mrb[10].mxu1 }
 0x10d   : > { %v596_v10 = vadd.f32 %v964_v9, %v531_v5  ;;  %v939_v11 = vpop.f32.mrb[11].mxu0  ;;  %v587_v12 = vpop.f32.mrb[11].mxu1 }
 0x10e   : > { %v520_v13 = vadd.f32 %v937_v6, %v831_v42  ;;  %v940_v14 = vadd.f32 %v939_v11, %v938_v8 }
 0x110   : > { %v585_v15 = vadd.f32 %v584_v4, %v520_v13  ;;  %v523_v16 = vadd.f32 %v940_v14, %v831_v42 }
 0x112   : > { %v602_v17 = vadd.f32 %v601_v7, %v585_v15  ;;  %v588_v18 = vadd.f32 %v587_v12, %v523_v16 }
 0x114   : > { %v603_v19 = vadd.f32 %v602_v17, %v588_v18 }
 0x116   : > { %v604_v20 = vadd.f32 %v603_v19, %v593_v2 }
 0x118   : > { %v605_v21 = vadd.f32 %v604_v20, %v596_v10 }
 0x11a   : > { %v606_v22 = vrot.slane %v605_v21, 4 }
 0x11c   : > { %v607_v23 = vadd.f32 %v606_v22, %v605_v21 }
 0x11e   : > { %v608_v24 = vrot.slane %v607_v23, 2 }
 0x120   : > { %v609_v25 = vadd.f32 %v608_v24, %v607_v23 }
 0x122   : > { %v610_v26 = vrot.slane %v609_v25, 1 }
 0x124   : > { %v611_v27 = vadd.f32 %v610_v26, %v609_v25 }
 0x126   : > { %v613_v28 = vmul.f32 0.015625, %v611_v27 }
 0x128   : > { %v614_v29 = vsub.f32 %v569_v49, %v613_v28  ;;  %v615_v30 = vsub.f32 %v572_v57, %v613_v28  ;;  %v616_v31 = vsub.f32 %v577_v58, %v613_v28  ;;  %v617_v32 = vsub.f32 %v580_v62, %v613_v28 }
 0x129   : > { %v618_v33 = vsub.f32 %v585_v15, %v613_v28  ;;  %v619_v34 = vsub.f32 %v588_v18, %v613_v28  ;;  %v620_v35 = vsub.f32 %v593_v2, %v613_v28  ;;  %v621_v36 = vsub.f32 %v596_v10, %v613_v28 }
 0x12a   : > { %v622_v37 = vmul.f32 %v614_v29, %v614_v29  ;;  %v623_v38 = vmul.f32 %v615_v30, %v615_v30  ;;  %v624_v39 = vmul.f32 %v616_v31, %v616_v31  ;;  %v625_v41 = vmul.f32 %v617_v32, %v617_v32 }
 0x12b   : > { %v626_v43 = vmul.f32 %v618_v33, %v618_v33  ;;  %v627_v45 = vmul.f32 %v619_v34, %v619_v34  ;;  %v628_v47 = vmul.f32 %v620_v35, %v620_v35  ;;  %v629_v49 = vmul.f32 %v621_v36, %v621_v36 }
 0x12c   : > { %v630_v40 = vadd.f32 %v623_v38, %v622_v37 }
 0x12e   : > { %v631_v42 = vadd.f32 %v630_v40, %v624_v39 }
 0x130   : > { %v632_v44 = vadd.f32 %v631_v42, %v625_v41 }
 0x132   : > { %v633_v46 = vadd.f32 %v632_v44, %v626_v43 }
 0x134   : > { %v634_v48 = vadd.f32 %v633_v46, %v627_v45 }
 0x136   : > { %v635_v50 = vadd.f32 %v634_v48, %v628_v47 }
 0x138   : > { %v636_v51 = vadd.f32 %v635_v50, %v629_v49 }
 0x13a   : > { %v637_v52 = vrot.slane %v636_v51, 4 }
 0x13c   : > { %v638_v53 = vadd.f32 %v637_v52, %v636_v51 }
 0x13e   : > { %v639_v54 = vrot.slane %v638_v53, 2 }
 0x140   : > { %v640_v55 = vadd.f32 %v639_v54, %v638_v53 }
 0x142   : > { %v641_v56 = vrot.slane %v640_v55, 1 }
 0x144   : > { %v642_v57 = vadd.f32 %v641_v56, %v640_v55 }
 0x146   : > { %v643_v58 = vmul.f32 0.015625, %v642_v57 }
 0x148   : > { %v644_v59 = vadd.f32 1e-05, %v643_v58 }
 0x14a   : > { %1040 = vrsqrt.f32 %v644_v59 }
 0x154   : > { %v1041_v60 = vpop.eup %1040 }
 0x155   : > { %v646_v61 = vmul.f32 %v1041_v60, %v614_v29  ;;  %v647_v62 = vmul.f32 %v1041_v60, %v615_v30  ;;  %v648_v63 = vmul.f32 %v1041_v60, %v616_v31  ;;  %v649_v0 = vmul.f32 %v1041_v60, %v617_v32 }
 0x156   : > { %v650_v1 = vmul.f32 %v1041_v60, %v618_v33  ;;  %v651_v2 = vmul.f32 %v1041_v60, %v619_v34  ;;  %v652_v3 = vmul.f32 %v1041_v60, %v620_v35  ;;  %v653_v4 = vmul.f32 %v1041_v60, %v621_v36 }
 0x157   : > { %vm654_vm1 = vcmp.ge.f32.partialorder %v646_v61, 0.0  ;;  %vm655_vm2 = vcmp.ge.f32.partialorder %v647_v62, 0.0  ;;  %vm656_vm3 = vcmp.ge.f32.partialorder %v648_v63, 0.0  ;;  %vm657_vm4 = vcmp.ge.f32.partialorder %v649_v0, 0.0 }
 0x158   : > { %vm658_vm5 = vcmp.ge.f32.partialorder %v650_v1, 0.0  ;;  %vm659_vm6 = vcmp.ge.f32.partialorder %v651_v2, 0.0  ;;  %vm660_vm7 = vcmp.ge.f32.partialorder %v652_v3, 0.0  ;;  %vm661_vm8 = vcmp.ge.f32.partialorder %v653_v4, 0.0 }
 0x159   : > { %v662_v5 = vmul.f32 0.01, %v646_v61  ;;  %v663_v6 = vmul.f32 0.01, %v647_v62  ;;  %v664_v7 = vmul.f32 0.01, %v648_v63 }
 0x15a   : > { %v665_v8 = vmul.f32 0.01, %v649_v0  ;;  %v666_v9 = vmul.f32 0.01, %v650_v1  ;;  %v667_v10 = vmul.f32 0.01, %v651_v2 }
 0x15b   : > { %v668_v11 = vmul.f32 0.01, %v652_v3  ;;  %v669_v12 = vmul.f32 0.01, %v653_v4  ;;  %v670_v13 = vsel %vm654_vm1, %v646_v61, %v662_v5  ;;  %v671_v14 = vsel %vm655_vm2, %v647_v62, %v663_v6 }
 0x15c   : > { %v672_v15 = vsel %vm656_vm3, %v648_v63, %v664_v7  ;;  %v673_v16 = vsel %vm657_vm4, %v649_v0, %v665_v8  ;;  %v674_v17 = vsel %vm658_vm5, %v650_v1, %v666_v9  ;;  %v675_v18 = vsel %vm659_vm6, %v651_v2, %v667_v10 }
 0x15d   : > { %v676_v19 = vsel %vm660_vm7, %v652_v3, %v668_v11  ;;  %v677_v20 = vsel %vm661_vm8, %v653_v4, %v669_v12  ;;  %v887_v21 = vpack.c.bf16 %v671_v14, %v670_v13  ;;  %v892_v22 = vpack.c.bf16 %v673_v16, %v672_v15 }
 0x15e   : > { %v897_v23 = vpack.c.bf16 %v675_v18, %v674_v17  ;;  %v902_v24 = vpack.c.bf16 %v677_v20, %v676_v19 }
 0x15f   : > { %888 = vst [vmem:[%s226_s18] sm:$0xff] %v887_v21   ;;  %904 = vst [vmem:[%s226_s18 + $0x8] sm:$0xff] %v892_v22  }
 0x160   : > { %905 = vst [vmem:[%s226_s18 + $0x10] sm:$0xff] %v897_v23   ;;  %906 = vst [vmem:[%s226_s18 + $0x18] sm:$0xff] %v902_v24  }
 0x161 PF: > { %s13_s14 = sadd.s32 1, %s1064_s14   ;;  %s1210_s12 = smov %s1060_s13 }
 0x162   : > { %p10_p5 = scmp.ge.s32.totalorder %s13_s14, 4   ;;  %s1211_s13 = smov %s1213_s15 }
 0x164   :  { %12 = sbr.rel (!%p10_p5) target bundleno = 2 (0x2), region = 68 }

// kernel: unet_forward.25
= control target key start
LH: loop header
LB: loop body
LE: loop exit
PB: predicated region body
PF: predicated region fallthrough
CT: control target
= control target key end

     0   :  { %s879_s12 = smov 0   ;;  %s881_s13 = smov 0   ;;  %s1024_s0 = inlined_call_operand.vmem [shape: bf16[512,8], index: 0, kind: input, shape index: {}]   ;;  %s1025_s1 = inlined_call_operand.vmem [shape: bf16[8,128], index: 1, kind: input, shape index: {}]   ;;  %s1026_s2 = inlined_call_operand.vmem [shape: f32[1,128], index: 2, kind: input, shape index: {}]   ;;  %s1027_s3 = inlined_call_operand.vmem [shape: f32[512,128], index: 3, kind: output, shape index: {}]  }
   0x1   :  { %s883_s14 = smov 0  }
   0x2 LB: > { %s25_s15 = sadd.s32 1, %s853_s13  ;;  %p700_p0 = scmp.ge.s32.totalorder %s857_s14, 1  ;;  %s857_s14 = sphi %s883_s14, %s13_s14   ;;  %s853_s13 = sphi %s881_s13, %s1029_s13   ;;  %s849_s12 = sphi %s879_s12, %s1028_s12  }
   0x3   : > { %p27_p1 = scmp.ge.s32.totalorder %s25_s15, 2  ;;  %p169_p2 = scmp.lt.s32.totalorder %s857_s14, 3 }
   0x5   : > { %s1031_s15 = smov (%p27_p1, %s25_s15), 0  ;;  %p170_p3 = pnand %p700_p0, %p169_p2 }
   0x6   : > { %v258_v0 = vld [vmem:[%s1025_s1] sm:$0xf] (!%p170_p3)  ;;  %vm395_vm0 = vcmask (!%p170_p3), 1043456   ;;  %s701_s18 = sshll.u32 (!%p170_p3), %s849_s12, 5  ;;  %vm346_vm1 = vcmask (!%p170_p3), 64512  }
   0x7   : > { %173 = sbr.rel (%p170_p3) target bundleno = 262 (0x106), region = 32  ;;  %793 = vmatprep.subr.msk.bf16.mxu0 (!%p170_p3), %vm395_vm0, %v258_v0  ;;  %794 = vmatprep.subr.msk.bf16.mxu1 (!%p170_p3), %vm395_vm0, %v258_v0  ;;  %v397_v1 = vsel (!%p170_p3), %vm395_vm0, %v258_v0, 0  ;;  %p204_p4 = scmp.lt.s32.totalorder (!%p170_p3), %s701_s18, 63  ;;  %v944_v18 = vld [vmem:[%s1026_s2] ss:$0 sm:$0xff] (!%p170_p3) }
   0x8   : > { %758 = vmatpush3.bf16.msra.mxu0 (!%p170_p3), %v397_v1  ;;  %792 = vmatpush3.bf16.msra.mxu1 (!%p170_p3), %v397_v1 }
   0xe   : > { %s1033_s18 = smov (!%p204_p4, %s701_s18), 63 }
   0xf   : > { %s702_s19 = sshll.u32 %s1033_s18, 2  ;;  %s704_s23 = sshll.u32 %s1033_s18, 3 }
  0x10   : > { %s906_s22 = scalar_lea.vmem %s1024_s0, %s702_s19  ;;  %s949_s28 = scalar_lea.vmem %s1027_s3, %s704_s23 }
  0x11   : > { %v819_v2 = vld [vmem:[%s906_s22] sm:$0xff]   ;;  %v821_v4 = vld [vmem:[%s906_s22 + $0x8] sm:$0xff]   ;;  %v823_v6 = vld [vmem:[%s906_s22 + $0x10] sm:$0xff]  }
  0x12   : > { %v820_v3 = vld [vmem:[%s906_s22 + $0x40] sm:$0xff]   ;;  %759 = vmatprep.mubr.msk.bf16.mxu0 %vm346_vm1, %v819_v2  ;;  %v822_v5 = vld [vmem:[%s906_s22 + $0x48] sm:$0xff]   ;;  %v824_v7 = vld [vmem:[%s906_s22 + $0x50] sm:$0xff]  }
  0x13   : > { %775 = vmatprep.mubr.msk.bf16.mxu1 %vm346_vm1, %v820_v3  ;;  %760 = vmatmul.mubr.msk.bf16.vlgmr.msra.gmra.mrb[0].mxu0 %vm346_vm1, %v821_v4  ;;  %v825_v8 = vld [vmem:[%s906_s22 + $0x18] sm:$0xff]   ;;  %v827_v10 = vld [vmem:[%s906_s22 + $0x20] sm:$0xff]   ;;  %v829_v12 = vld [vmem:[%s906_s22 + $0x28] sm:$0xff]  }
  0x14   : > { %776 = vmatmul.mubr.msk.bf16.vlgmr.msra.gmra.mrb[0].mxu1 %vm346_vm1, %v822_v5  ;;  %763 = vmatprep.mubr.msk.bf16.mxu0 %vm346_vm1, %v823_v6  ;;  %v826_v9 = vld [vmem:[%s906_s22 + $0x58] sm:$0xff]   ;;  %v828_v11 = vld [vmem:[%s906_s22 + $0x60] sm:$0xff]   ;;  %v830_v13 = vld [vmem:[%s906_s22 + $0x68] sm:$0xff]  }
  0x15   : > { %779 = vmatprep.mubr.msk.bf16.mxu1 %vm346_vm1, %v824_v7  ;;  %v831_v14 = vld [vmem:[%s906_s22 + $0x30] sm:$0xff]   ;;  %v833_v16 = vld [vmem:[%s906_s22 + $0x38] sm:$0xff]  }
  0x16   : > { %v832_v15 = vld [vmem:[%s906_s22 + $0x70] sm:$0xff]   ;;  %v834_v17 = vld [vmem:[%s906_s22 + $0x78] sm:$0xff]  }
  0x1b   : > { %764 = vmatmul.mubr.msk.bf16.gmra.mrb[4].mxu0 %vm346_vm1, %v825_v8 }
  0x1c   : > { %780 = vmatmul.mubr.msk.bf16.gmra.mrb[4].mxu1 %vm346_vm1, %v826_v9  ;;  %767 = vmatprep.mubr.msk.bf16.mxu0 %vm346_vm1, %v827_v10 }
  0x1d   : > { %783 = vmatprep.mubr.msk.bf16.mxu1 %vm346_vm1, %v828_v11 }
  0x23   : > { %768 = vmatmul.mubr.msk.bf16.gmra.mrb[8].mxu0 %vm346_vm1, %v829_v12 }
  0x24   : > { %784 = vmatmul.mubr.msk.bf16.gmra.mrb[8].mxu1 %vm346_vm1, %v830_v13  ;;  %771 = vmatprep.mubr.msk.bf16.mxu0 %vm346_vm1, %v831_v14 }
  0x25   : > { %787 = vmatprep.mubr.msk.bf16.mxu1 %vm346_vm1, %v832_v15 }
  0x2b   : > { %772 = vmatmul.mubr.msk.bf16.gmra.mrb[12].mxu0 %vm346_vm1, %v833_v16 }
  0x2c   : > { %788 = vmatmul.mubr.msk.bf16.gmra.mrb[12].mxu1 %vm346_vm1, %v834_v17 }
  0xe6   : > { %v761_v19 = vpop.f32.mrb[0].mxu0 }
  0xe7   : > { %v442_v20 = vadd.f32 %v761_v19, %v944_v18  ;;  %v777_v21 = vpop.f32.mrb[0].mxu1  ;;  %v433_v22 = vpop.f32.mrb[1].mxu0 }
  0xe8   : > { %v506_v23 = vadd.f32 %v777_v21, %v944_v18  ;;  %v434_v24 = vadd.f32 %v944_v18, %v433_v22  ;;  %v497_v25 = vpop.f32.mrb[1].mxu1  ;;  %v762_v26 = vpop.f32.mrb[2].mxu0 }
  0xe9   : > { %562 = vst [vmem:[%s949_s28 + $0x10] sm:$0xff] %v442_v20  ;;  %v498_v27 = vadd.f32 %v944_v18, %v497_v25  ;;  %v445_v28 = vadd.f32 %v762_v26, %v944_v18  ;;  %v778_v29 = vpop.f32.mrb[2].mxu1  ;;  %v436_v30 = vpop.f32.mrb[3].mxu0 }
  0xea   : > { %578 = vst [vmem:[%s949_s28 + $0x90] sm:$0xff] %v506_v23  ;;  %560 = vst [vmem:[%s949_s28] sm:$0xff] %v434_v24  ;;  %v509_v31 = vadd.f32 %v778_v29, %v944_v18  ;;  %v437_v32 = vadd.f32 %v944_v18, %v436_v30  ;;  %v500_v33 = vpop.f32.mrb[3].mxu1 }
  0xeb   : > { %576 = vst [vmem:[%s949_s28 + $0x80] sm:$0xff] %v498_v27  ;;  %563 = vst [vmem:[%s949_s28 + $0x18] sm:$0xff] %v445_v28  ;;  %v501_v34 = vadd.f32 %v944_v18, %v500_v33 }
  0xec   : > { %579 = vst [vmem:[%s949_s28 + $0x98] sm:$0xff] %v509_v31  ;;  %561 = vst [vmem:[%s949_s28 + $0x8] sm:$0xff] %v437_v32 }
  0xed   : > { %577 = vst [vmem:[%s949_s28 + $0x88] sm:$0xff] %v501_v34 }
  0xee   : > { %v765_v35 = vpop.f32.mrb[4].mxu0 }
  0xef   : > { %v458_v36 = vadd.f32 %v765_v35, %v944_v18  ;;  %v781_v37 = vpop.f32.mrb[4].mxu1  ;;  %v449_v38 = vpop.f32.mrb[5].mxu0 }
  0xf0   : > { %v522_v39 = vadd.f32 %v781_v37, %v944_v18  ;;  %v450_v40 = vadd.f32 %v944_v18, %v449_v38  ;;  %v513_v41 = vpop.f32.mrb[5].mxu1  ;;  %v766_v42 = vpop.f32.mrb[6].mxu0 }
  0xf1   : > { %566 = vst [vmem:[%s949_s28 + $0x30] sm:$0xff] %v458_v36  ;;  %v514_v43 = vadd.f32 %v944_v18, %v513_v41  ;;  %v461_v44 = vadd.f32 %v766_v42, %v944_v18  ;;  %v782_v45 = vpop.f32.mrb[6].mxu1  ;;  %v452_v46 = vpop.f32.mrb[7].mxu0 }
  0xf2   : > { %582 = vst [vmem:[%s949_s28 + $0xb0] sm:$0xff] %v522_v39  ;;  %564 = vst [vmem:[%s949_s28 + $0x20] sm:$0xff] %v450_v40  ;;  %v525_v47 = vadd.f32 %v782_v45, %v944_v18  ;;  %v453_v48 = vadd.f32 %v944_v18, %v452_v46  ;;  %v516_v49 = vpop.f32.mrb[7].mxu1 }
  0xf3   : > { %580 = vst [vmem:[%s949_s28 + $0xa0] sm:$0xff] %v514_v43  ;;  %567 = vst [vmem:[%s949_s28 + $0x38] sm:$0xff] %v461_v44  ;;  %v517_v50 = vadd.f32 %v944_v18, %v516_v49 }
  0xf4   : > { %583 = vst [vmem:[%s949_s28 + $0xb8] sm:$0xff] %v525_v47  ;;  %565 = vst [vmem:[%s949_s28 + $0x28] sm:$0xff] %v453_v48 }
  0xf5   : > { %581 = vst [vmem:[%s949_s28 + $0xa8] sm:$0xff] %v517_v50 }
  0xf6   : > { %v769_v51 = vpop.f32.mrb[8].mxu0 }
  0xf7   : > { %v474_v52 = vadd.f32 %v769_v51, %v944_v18  ;;  %v785_v53 = vpop.f32.mrb[8].mxu1  ;;  %v465_v54 = vpop.f32.mrb[9].mxu0 }
  0xf8   : > { %v538_v55 = vadd.f32 %v785_v53, %v944_v18  ;;  %v466_v56 = vadd.f32 %v944_v18, %v465_v54  ;;  %v529_v57 = vpop.f32.mrb[9].mxu1  ;;  %v770_v58 = vpop.f32.mrb[10].mxu0 }
  0xf9   : > { %570 = vst [vmem:[%s949_s28 + $0x50] sm:$0xff] %v474_v52  ;;  %v530_v59 = vadd.f32 %v944_v18, %v529_v57  ;;  %v477_v60 = vadd.f32 %v770_v58, %v944_v18  ;;  %v786_v61 = vpop.f32.mrb[10].mxu1  ;;  %v468_v62 = vpop.f32.mrb[11].mxu0 }
  0xfa   : > { %586 = vst [vmem:[%s949_s28 + $0xd0] sm:$0xff] %v538_v55  ;;  %568 = vst [vmem:[%s949_s28 + $0x40] sm:$0xff] %v466_v56  ;;  %v541_v63 = vadd.f32 %v786_v61, %v944_v18  ;;  %v469_v0 = vadd.f32 %v944_v18, %v468_v62  ;;  %v532_v1 = vpop.f32.mrb[11].mxu1 }
  0xfb   : > { %584 = vst [vmem:[%s949_s28 + $0xc0] sm:$0xff] %v530_v59  ;;  %571 = vst [vmem:[%s949_s28 + $0x58] sm:$0xff] %v477_v60  ;;  %v533_v2 = vadd.f32 %v944_v18, %v532_v1 }
  0xfc   : > { %587 = vst [vmem:[%s949_s28 + $0xd8] sm:$0xff] %v541_v63  ;;  %569 = vst [vmem:[%s949_s28 + $0x48] sm:$0xff] %v469_v0 }
  0xfd   : > { %585 = vst [vmem:[%s949_s28 + $0xc8] sm:$0xff] %v533_v2 }
  0xfe   : > { %v773_v3 = vpop.f32.mrb[12].mxu0 }
  0xff   : > { %v490_v4 = vadd.f32 %v773_v3, %v944_v18  ;;  %v789_v5 = vpop.f32.mrb[12].mxu1  ;;  %v481_v6 = vpop.f32.mrb[13].mxu0 }
 0x100   : > { %v554_v7 = vadd.f32 %v789_v5, %v944_v18  ;;  %v482_v8 = vadd.f32 %v944_v18, %v481_v6  ;;  %v545_v9 = vpop.f32.mrb[13].mxu1  ;;  %v774_v10 = vpop.f32.mrb[14].mxu0 }
 0x101   : > { %574 = vst [vmem:[%s949_s28 + $0x70] sm:$0xff] %v490_v4  ;;  %v546_v11 = vadd.f32 %v944_v18, %v545_v9  ;;  %v493_v12 = vadd.f32 %v774_v10, %v944_v18  ;;  %v790_v13 = vpop.f32.mrb[14].mxu1  ;;  %v484_v14 = vpop.f32.mrb[15].mxu0 }
 0x102   : > { %590 = vst [vmem:[%s949_s28 + $0xf0] sm:$0xff] %v554_v7  ;;  %572 = vst [vmem:[%s949_s28 + $0x60] sm:$0xff] %v482_v8  ;;  %v557_v15 = vadd.f32 %v790_v13, %v944_v18  ;;  %v485_v16 = vadd.f32 %v944_v18, %v484_v14  ;;  %v548_v17 = vpop.f32.mrb[15].mxu1 }
 0x103   : > { %588 = vst [vmem:[%s949_s28 + $0xe0] sm:$0xff] %v546_v11  ;;  %575 = vst [vmem:[%s949_s28 + $0x78] sm:$0xff] %v493_v12  ;;  %v549_v19 = vadd.f32 %v944_v18, %v548_v17 }
 0x104   : > { %591 = vst [vmem:[%s949_s28 + $0xf8] sm:$0xff] %v557_v15  ;;  %573 = vst [vmem:[%s949_s28 + $0x68] sm:$0xff] %v485_v16 }
 0x105   : > { %589 = vst [vmem:[%s949_s28 + $0xe8] sm:$0xff] %v549_v19 }
 0x106 PF: > { %s13_s14 = sadd.s32 1, %s857_s14   ;;  %s1028_s12 = smov %s853_s13 }
 0x107   : > { %p10_p5 = scmp.ge.s32.totalorder %s13_s14, 4   ;;  %s1029_s13 = smov %s1031_s15 }
 0x109   :  { %12 = sbr.rel (!%p10_p5) target bundleno = 2 (0x2), region = 68 }

// kernel: unet_forward.23
= control target key start
LH: loop header
LB: loop body
LE: loop exit
PB: predicated region body
PF: predicated region fallthrough
CT: control target
= control target key end

     0   :  { %s1606_s12 = smov 0   ;;  %s1608_s13 = smov 0   ;;  %s2222_s0 = inlined_call_operand.vmem [shape: bf16[512,144], index: 0, kind: input, shape index: {}]   ;;  %s2223_s1 = inlined_call_operand.vmem [shape: bf16[144,128], index: 1, kind: input, shape index: {}]   ;;  %s2224_s2 = inlined_call_operand.vmem [shape: f32[1,128], index: 2, kind: input, shape index: {}]   ;;  %s2225_s3 = inlined_call_operand.vmem [shape: bf16[512,128], index: 3, kind: output, shape index: {}]  }
   0x1   :  { %s1610_s14 = smov 0  }
   0x2 LB: > { %s25_s15 = sadd.s32 1, %s1579_s13  ;;  %p1233_p0 = scmp.ge.s32.totalorder %s1583_s14, 1  ;;  %s1583_s14 = sphi %s1610_s14, %s13_s14   ;;  %s1579_s13 = sphi %s1608_s13, %s2241_s13   ;;  %s1575_s12 = sphi %s1606_s12, %s2240_s12  }
   0x3   : > { %p27_p1 = scmp.ge.s32.totalorder %s25_s15, 2  ;;  %p170_p2 = scmp.lt.s32.totalorder %s1583_s14, 3 }
   0x5   : > { %s2243_s15 = smov (%p27_p1, %s25_s15), 0  ;;  %p171_p3 = pnand %p1233_p0, %p170_p2 }
   0x6   : > { %v1502_v0 = vld [vmem:[%s2223_s1] sm:$0xff] (!%p171_p3)   ;;  %v1585_v1 = vmov (!%p171_p3), 0   ;;  %s1234_s18 = sshll.u32 (!%p171_p3), %s1575_s12, 5  ;;  %v1503_v2 = vld [vmem:[%s2223_s1 + $0x8] sm:$0xff] (!%p171_p3)   ;;  %v1504_v3 = vld [vmem:[%s2223_s1 + $0x10] sm:$0xff] (!%p171_p3)   ;;  %vm484_vm0 = vcmask (!%p171_p3), 130048  }
   0x7   : > { %174 = sbr.rel (%p171_p3) target bundleno = 503 (0x1f7), region = 32  ;;  %533 = vmatprep.subr.bf16.mxu0 (!%p171_p3), %v1585_v1  ;;  %1459 = vmatprep.subr.bf16.mxu1 (!%p171_p3), %v1585_v1  ;;  %p206_p4 = scmp.lt.s32.totalorder (!%p171_p3), %s1234_s18, 63  ;;  %v1505_v4 = vld [vmem:[%s2223_s1 + $0x18] sm:$0xff] (!%p171_p3)   ;;  %v1506_v6 = vld [vmem:[%s2223_s1 + $0x20] sm:$0xff] (!%p171_p3)   ;;  %v1507_v8 = vld [vmem:[%s2223_s1 + $0x28] sm:$0xff] (!%p171_p3)  }
   0x8   : > { %534 = vmatpush1.bf16.msra.mxu0 (!%p171_p3), %v1502_v0  ;;  %1468 = vmatpush1.bf16.msra.mxu1 (!%p171_p3), %v1502_v0  ;;  %v1508_v9 = vld [vmem:[%s2223_s1 + $0x30] sm:$0xff] (!%p171_p3)   ;;  %v1509_v10 = vld [vmem:[%s2223_s1 + $0x38] sm:$0xff] (!%p171_p3)   ;;  %v1510_v11 = vld [vmem:[%s2223_s1 + $0x40] sm:$0xff] (!%p171_p3)  }
   0x9   : > { %535 = vmatprep.subr.bf16.mxu0 (!%p171_p3), %v1585_v1  ;;  %1460 = vmatprep.subr.bf16.mxu1 (!%p171_p3), %v1585_v1  ;;  %v1718_v58 = vld [vmem:[%s2224_s2] ss:$0 sm:$0xff] (!%p171_p3) }
   0xc   : > { %536 = vmatpush1.bf16.msra.mxu0 (!%p171_p3), %v1503_v2  ;;  %1469 = vmatpush1.bf16.msra.mxu1 (!%p171_p3), %v1503_v2 }
   0xd   : > { %537 = vmatprep.subr.bf16.mxu0 (!%p171_p3), %v1585_v1  ;;  %1461 = vmatprep.subr.bf16.mxu1 (!%p171_p3), %v1585_v1 }
   0xe   : > { %s2245_s18 = smov (!%p206_p4, %s1234_s18), 63 }
   0xf   : > { %s1331_s23 = sshll.u32 %s2245_s18, 3  ;;  %s1238_s17 = sshll.u32 %s2245_s18, 2 }
  0x10   : > { %s1639_s26 = scalar_lea.vmem %s2222_s0, %s1331_s23  ;;  %538 = vmatpush1.bf16.msra.mxu0 %v1504_v3  ;;  %1470 = vmatpush1.bf16.msra.mxu1 %v1504_v3  ;;  %s2175_s20 = scalar_lea.vmem %s2225_s3, %s1238_s17 }
  0x11   : > { %v1513_v5 = vld [vmem:[%s1639_s26 + $0x4] ss:$8 sps:$4 sm:$0xff]   ;;  %539 = vmatprep.subr.bf16.mxu0 %v1585_v1  ;;  %1462 = vmatprep.subr.bf16.mxu1 %v1585_v1  ;;  %v1511_v12 = vld [vmem:[%s1639_s26] ss:$8 sps:$4 sm:$0xff]   ;;  %v1514_v14 = vld [vmem:[%s1639_s26 + $0x14] ss:$8 sps:$4 sm:$0xff]  }
  0x12   : > { %1281 = vmatprep.mubr.msk.bf16.mxu0 %vm484_vm0, %v1513_v5  ;;  %v1525_v7 = vld [vmem:[%s1639_s26 + $0x84] ss:$8 sps:$4 sm:$0xff]   ;;  %v1523_v13 = vld [vmem:[%s1639_s26 + $0x80] ss:$8 sps:$4 sm:$0xff]   ;;  %v1529_v15 = vld [vmem:[%s1639_s26 + $0x94] ss:$8 sps:$4 sm:$0xff]  }
  0x13   : > { %1289 = vmatprep.mubr.msk.bf16.mxu1 %vm484_vm0, %v1525_v7  ;;  %v1516_v16 = vld [vmem:[%s1639_s26 + $0x10] ss:$8 sps:$4 sm:$0xff]   ;;  %v1517_v18 = vld [vmem:[%s1639_s26 + $0x24] ss:$8 sps:$4 sm:$0xff]   ;;  %v1519_v20 = vld [vmem:[%s1639_s26 + $0x20] ss:$8 sps:$4 sm:$0xff]  }
  0x14   : > { %540 = vmatpush1.bf16.msra.mxu0 %v1505_v4  ;;  %1471 = vmatpush1.bf16.msra.mxu1 %v1505_v4  ;;  %v1531_v17 = vld [vmem:[%s1639_s26 + $0x90] ss:$8 sps:$4 sm:$0xff]   ;;  %v1535_v19 = vld [vmem:[%s1639_s26 + $0xa4] ss:$8 sps:$4 sm:$0xff]   ;;  %v1537_v21 = vld [vmem:[%s1639_s26 + $0xa0] ss:$8 sps:$4 sm:$0xff]  }
  0x15   : > { %541 = vmatprep.subr.bf16.mxu0 %v1585_v1  ;;  %1463 = vmatprep.subr.bf16.mxu1 %v1585_v1  ;;  %v1520_v22 = vld [vmem:[%s1639_s26 + $0x34] ss:$8 sps:$4 sm:$0xff]   ;;  %v1522_v24 = vld [vmem:[%s1639_s26 + $0x30] ss:$8 sps:$4 sm:$0xff]   ;;  %v1526_v26 = vld [vmem:[%s1639_s26 + $0x44] ss:$8 sps:$4 sm:$0xff]  }
  0x16   : > { %v1541_v23 = vld [vmem:[%s1639_s26 + $0xb4] ss:$8 sps:$4 sm:$0xff]   ;;  %v1543_v25 = vld [vmem:[%s1639_s26 + $0xb0] ss:$8 sps:$4 sm:$0xff]   ;;  %v1547_v27 = vld [vmem:[%s1639_s26 + $0xc4] ss:$8 sps:$4 sm:$0xff]  }
  0x17   : > { %v1528_v28 = vld [vmem:[%s1639_s26 + $0x40] ss:$8 sps:$4 sm:$0xff]   ;;  %v1532_v30 = vld [vmem:[%s1639_s26 + $0x54] ss:$8 sps:$4 sm:$0xff]   ;;  %v1534_v32 = vld [vmem:[%s1639_s26 + $0x50] ss:$8 sps:$4 sm:$0xff]  }
  0x18   : > { %542 = vmatpush1.bf16.msra.mxu0 %v1506_v6  ;;  %1472 = vmatpush1.bf16.msra.mxu1 %v1506_v6  ;;  %v1549_v29 = vld [vmem:[%s1639_s26 + $0xc0] ss:$8 sps:$4 sm:$0xff]   ;;  %v1550_v31 = vld [vmem:[%s1639_s26 + $0xd4] ss:$8 sps:$4 sm:$0xff]   ;;  %v1552_v33 = vld [vmem:[%s1639_s26 + $0xd0] ss:$8 sps:$4 sm:$0xff]  }
  0x19   : > { %543 = vmatprep.subr.bf16.mxu0 %v1585_v1  ;;  %1464 = vmatprep.subr.bf16.mxu1 %v1585_v1  ;;  %v1538_v34 = vld [vmem:[%s1639_s26 + $0x64] ss:$8 sps:$4 sm:$0xff]   ;;  %v1540_v36 = vld [vmem:[%s1639_s26 + $0x60] ss:$8 sps:$4 sm:$0xff]   ;;  %v1544_v38 = vld [vmem:[%s1639_s26 + $0x74] ss:$8 sps:$4 sm:$0xff]  }
  0x1a   : > { %v1553_v35 = vld [vmem:[%s1639_s26 + $0xe4] ss:$8 sps:$4 sm:$0xff]   ;;  %v1555_v37 = vld [vmem:[%s1639_s26 + $0xe0] ss:$8 sps:$4 sm:$0xff]   ;;  %v1556_v39 = vld [vmem:[%s1639_s26 + $0xf4] ss:$8 sps:$4 sm:$0xff]  }
  0x1b   : > { %v1546_v40 = vld [vmem:[%s1639_s26 + $0x70] ss:$8 sps:$4 sm:$0xff]  }
  0x1c   : > { %544 = vmatpush1.bf16.msra.mxu0 %v1507_v8  ;;  %1473 = vmatpush1.bf16.msra.mxu1 %v1507_v8  ;;  %v1558_v41 = vld [vmem:[%s1639_s26 + $0xf0] ss:$8 sps:$4 sm:$0xff]  }
  0x1d   : > { %545 = vmatprep.subr.bf16.mxu0 %v1585_v1  ;;  %1465 = vmatprep.subr.bf16.mxu1 %v1585_v1 }
  0x20   : > { %546 = vmatpush1.bf16.msra.mxu0 %v1508_v9  ;;  %1474 = vmatpush1.bf16.msra.mxu1 %v1508_v9 }
  0x21   : > { %547 = vmatprep.subr.bf16.mxu0 %v1585_v1  ;;  %1466 = vmatprep.subr.bf16.mxu1 %v1585_v1 }
  0x24   : > { %548 = vmatpush1.bf16.msra.mxu0 %v1509_v10  ;;  %1475 = vmatpush1.bf16.msra.mxu1 %v1509_v10 }
  0x25   : > { %549 = vmatprep.subr.bf16.mxu0 %v1585_v1  ;;  %1467 = vmatprep.subr.bf16.mxu1 %v1585_v1 }
  0x28   : > { %550 = vmatpush1.bf16.msra.mxu0 %v1510_v11  ;;  %1476 = vmatpush1.bf16.msra.mxu1 %v1510_v11 }
  0x2b   : > { %566 = vmatmul.mubr.bf16.vlgmr.msra.gmra.mrb[0].mxu0 %v1511_v12  ;;  %630 = vmatmul.mubr.bf16.vlgmr.msra.gmra.mrb[0].mxu1 %v1523_v13 }
  0x2c   : > { %1282 = vmatprep.mubr.msk.bf16.mxu0 %vm484_vm0, %v1514_v14  ;;  %1290 = vmatprep.mubr.msk.bf16.mxu1 %vm484_vm0, %v1529_v15 }
  0x33   : > { %574 = vmatmul.mubr.bf16.gmra.mrb[4].mxu0 %v1516_v16  ;;  %638 = vmatmul.mubr.bf16.gmra.mrb[4].mxu1 %v1531_v17 }
  0x34   : > { %1283 = vmatprep.mubr.msk.bf16.mxu0 %vm484_vm0, %v1517_v18  ;;  %1291 = vmatprep.mubr.msk.bf16.mxu1 %vm484_vm0, %v1535_v19 }
  0x3b   : > { %582 = vmatmul.mubr.bf16.gmra.mrb[8].mxu0 %v1519_v20  ;;  %646 = vmatmul.mubr.bf16.gmra.mrb[8].mxu1 %v1537_v21 }
  0x3c   : > { %1284 = vmatprep.mubr.msk.bf16.mxu0 %vm484_vm0, %v1520_v22  ;;  %1292 = vmatprep.mubr.msk.bf16.mxu1 %vm484_vm0, %v1541_v23 }
  0x43   : > { %590 = vmatmul.mubr.bf16.gmra.mrb[12].mxu0 %v1522_v24  ;;  %654 = vmatmul.mubr.bf16.gmra.mrb[12].mxu1 %v1543_v25 }
  0x44   : > { %1285 = vmatprep.mubr.msk.bf16.mxu0 %vm484_vm0, %v1526_v26  ;;  %1293 = vmatprep.mubr.msk.bf16.mxu1 %vm484_vm0, %v1547_v27 }
  0x4b   : > { %598 = vmatmul.mubr.bf16.gmra.mrb[16].mxu0 %v1528_v28  ;;  %662 = vmatmul.mubr.bf16.gmra.mrb[16].mxu1 %v1549_v29 }
  0x4c   : > { %1286 = vmatprep.mubr.msk.bf16.mxu0 %vm484_vm0, %v1532_v30  ;;  %1294 = vmatprep.mubr.msk.bf16.mxu1 %vm484_vm0, %v1550_v31 }
  0x53   : > { %606 = vmatmul.mubr.bf16.gmra.mrb[20].mxu0 %v1534_v32  ;;  %670 = vmatmul.mubr.bf16.gmra.mrb[20].mxu1 %v1552_v33 }
  0x54   : > { %1287 = vmatprep.mubr.msk.bf16.mxu0 %vm484_vm0, %v1538_v34  ;;  %1295 = vmatprep.mubr.msk.bf16.mxu1 %vm484_vm0, %v1553_v35 }
  0x5b   : > { %614 = vmatmul.mubr.bf16.gmra.mrb[24].mxu0 %v1540_v36  ;;  %678 = vmatmul.mubr.bf16.gmra.mrb[24].mxu1 %v1555_v37 }
  0x5c   : > { %1288 = vmatprep.mubr.msk.bf16.mxu0 %vm484_vm0, %v1544_v38  ;;  %1296 = vmatprep.mubr.msk.bf16.mxu1 %vm484_vm0, %v1556_v39 }
  0x63   : > { %622 = vmatmul.mubr.bf16.gmra.mrb[28].mxu0 %v1546_v40  ;;  %686 = vmatmul.mubr.bf16.gmra.mrb[28].mxu1 %v1558_v41 }
  0xfe   : > { %v567_v42 = vpop.f32.mrb[0].mxu0  ;;  %v1707_v43 = vpop.f32.mrb[0].mxu1 }
  0xff   : > { %v569_v44 = vpop.f32.mrb[1].mxu0  ;;  %v633_v45 = vpop.f32.mrb[1].mxu1  ;;  %v1726_v62 = vadd.f32 %v1718_v58, %v567_v42 }
 0x100   : > { %v570_v46 = vpop.f32.mrb[2].mxu0  ;;  %v1709_v47 = vpop.f32.mrb[2].mxu1 }
 0x101   : > { %v572_v48 = vpop.f32.mrb[3].mxu0  ;;  %v636_v49 = vpop.f32.mrb[3].mxu1  ;;  %v1721_v59 = vadd.f32 %v1718_v58, %v570_v46 }
 0x103   : > { %v694_v4 = vadd.f32 %v1721_v59, %v1726_v62 }
 0x106   : > { %v575_v50 = vpop.f32.mrb[4].mxu0  ;;  %v1711_v51 = vpop.f32.mrb[4].mxu1 }
 0x107   : > { %v577_v52 = vpop.f32.mrb[5].mxu0  ;;  %v641_v53 = vpop.f32.mrb[5].mxu1  ;;  %v1729_v63 = vadd.f32 %v1718_v58, %v575_v50 }
 0x108   : > { %v578_v54 = vpop.f32.mrb[6].mxu0  ;;  %v1713_v55 = vpop.f32.mrb[6].mxu1 }
 0x109   : > { %v580_v56 = vpop.f32.mrb[7].mxu0  ;;  %v644_v57 = vpop.f32.mrb[7].mxu1  ;;  %v695_v7 = vadd.f32 %v694_v4, %v1729_v63  ;;  %v1737_v8 = vadd.f32 %v1718_v58, %v578_v54 }
 0x10b   : > { %v696_v12 = vadd.f32 %v695_v7, %v1737_v8 }
 0x10e   : > { %v583_v60 = vpop.f32.mrb[8].mxu0  ;;  %v1723_v61 = vpop.f32.mrb[8].mxu1 }
 0x10f   : > { %v585_v0 = vpop.f32.mrb[9].mxu0  ;;  %v649_v1 = vpop.f32.mrb[9].mxu1  ;;  %v1740_v9 = vadd.f32 %v1718_v58, %v583_v60 }
 0x110   : > { %v586_v2 = vpop.f32.mrb[10].mxu0  ;;  %v1731_v3 = vpop.f32.mrb[10].mxu1 }
 0x111   : > { %v588_v5 = vpop.f32.mrb[11].mxu0  ;;  %v652_v6 = vpop.f32.mrb[11].mxu1  ;;  %v697_v17 = vadd.f32 %v696_v12, %v1740_v9  ;;  %v1749_v18 = vadd.f32 %v1718_v58, %v586_v2 }
 0x113   : > { %v698_v22 = vadd.f32 %v697_v17, %v1749_v18 }
 0x116   : > { %v591_v10 = vpop.f32.mrb[12].mxu0  ;;  %v1742_v11 = vpop.f32.mrb[12].mxu1 }
 0x117   : > { %v593_v13 = vpop.f32.mrb[13].mxu0  ;;  %v657_v14 = vpop.f32.mrb[13].mxu1  ;;  %v1752_v21 = vadd.f32 %v1718_v58, %v591_v10 }
 0x118   : > { %v594_v15 = vpop.f32.mrb[14].mxu0  ;;  %v1745_v16 = vpop.f32.mrb[14].mxu1 }
 0x119   : > { %v596_v19 = vpop.f32.mrb[15].mxu0  ;;  %v660_v20 = vpop.f32.mrb[15].mxu1  ;;  %v699_v25 = vadd.f32 %v698_v22, %v1752_v21  ;;  %v1759_v26 = vadd.f32 %v1718_v58, %v594_v15 }
 0x11b   : > { %v700_v34 = vadd.f32 %v699_v25, %v1759_v26 }
 0x11e   : > { %v599_v23 = vpop.f32.mrb[16].mxu0  ;;  %v1755_v24 = vpop.f32.mrb[16].mxu1 }
 0x11f   : > { %v601_v27 = vpop.f32.mrb[17].mxu0  ;;  %v665_v28 = vpop.f32.mrb[17].mxu1  ;;  %v1762_v31 = vadd.f32 %v1718_v58, %v599_v23 }
 0x120   : > { %v602_v29 = vpop.f32.mrb[18].mxu0  ;;  %v666_v30 = vpop.f32.mrb[18].mxu1  ;;  %v632_v27 = vadd.f32 %v1718_v58, %v1707_v43  ;;  %v651_v43 = vadd.f32 %v1718_v58, %v1731_v3 }
 0x121   : > { %v604_v32 = vpop.f32.mrb[19].mxu0  ;;  %v668_v33 = vpop.f32.mrb[19].mxu1  ;;  %v701_v35 = vadd.f32 %v700_v34, %v1762_v31  ;;  %v1767_v36 = vadd.f32 %v1718_v58, %v602_v29  ;;  %v635_v29 = vadd.f32 %v1718_v58, %v1709_v47  ;;  %v656_v47 = vadd.f32 %v1718_v58, %v1742_v11 }
 0x122   : > { %v640_v33 = vadd.f32 %v1718_v58, %v1711_v51  ;;  %v659_v51 = vadd.f32 %v1718_v58, %v1745_v16 }
 0x123   : > { %v702_v45 = vadd.f32 %v701_v35, %v1767_v36  ;;  %v643_v35 = vadd.f32 %v1718_v58, %v1713_v55  ;;  %v664_v55 = vadd.f32 %v1718_v58, %v1755_v24 }
 0x126   : > { %v607_v37 = vpop.f32.mrb[20].mxu0  ;;  %v671_v38 = vpop.f32.mrb[20].mxu1 }
 0x127   : > { %v1770_v39 = vadd.f32 %v1718_v58, %v607_v37  ;;  %v609_v40 = vpop.f32.mrb[21].mxu0  ;;  %v673_v41 = vpop.f32.mrb[21].mxu1 }
 0x128   : > { %v610_v42 = vpop.f32.mrb[22].mxu0  ;;  %v674_v44 = vpop.f32.mrb[22].mxu1  ;;  %v648_v40 = vadd.f32 %v1718_v58, %v1723_v61  ;;  %v667_v61 = vadd.f32 %v1718_v58, %v666_v30 }
 0x129   : > { %v612_v46 = vpop.f32.mrb[23].mxu0  ;;  %v676_v48 = vpop.f32.mrb[23].mxu1  ;;  %v703_v49 = vadd.f32 %v702_v45, %v1770_v39  ;;  %v1775_v50 = vadd.f32 %v1718_v58, %v610_v42 }
 0x12b   : > { %v704_v54 = vadd.f32 %v703_v49, %v1775_v50 }
 0x12e   : > { %v615_v52 = vpop.f32.mrb[24].mxu0  ;;  %v679_v53 = vpop.f32.mrb[24].mxu1 }
 0x12f   : > { %v616_v56 = vadd.f32 %v1718_v58, %v615_v52  ;;  %v617_v57 = vpop.f32.mrb[25].mxu0  ;;  %v681_v60 = vpop.f32.mrb[25].mxu1  ;;  %v680_v11 = vadd.f32 %v1718_v58, %v679_v53 }
 0x130   : > { %v618_v0 = vpop.f32.mrb[26].mxu0  ;;  %v682_v1 = vpop.f32.mrb[26].mxu1  ;;  %v675_v57 = vadd.f32 %v1718_v58, %v674_v44 }
 0x131   : > { %v705_v2 = vadd.f32 %v704_v54, %v616_v56  ;;  %v619_v4 = vadd.f32 %v1718_v58, %v618_v0  ;;  %v620_v5 = vpop.f32.mrb[27].mxu0  ;;  %v684_v6 = vpop.f32.mrb[27].mxu1  ;;  %v672_v54 = vadd.f32 %v1718_v58, %v671_v38  ;;  %v683_v16 = vadd.f32 %v1718_v58, %v682_v1 }
 0x133   : > { %v706_v7 = vadd.f32 %v705_v2, %v619_v4 }
 0x136   : > { %v623_v10 = vpop.f32.mrb[28].mxu0  ;;  %v687_v12 = vpop.f32.mrb[28].mxu1 }
 0x137   : > { %v624_v13 = vadd.f32 %v1718_v58, %v623_v10  ;;  %v625_v14 = vpop.f32.mrb[29].mxu0  ;;  %v689_v15 = vpop.f32.mrb[29].mxu1  ;;  %v688_v2 = vadd.f32 %v1718_v58, %v687_v12 }
 0x138   : > { %v626_v17 = vpop.f32.mrb[30].mxu0  ;;  %v690_v19 = vpop.f32.mrb[30].mxu1 }
 0x139   : > { %v707_v20 = vadd.f32 %v706_v7, %v624_v13  ;;  %v627_v22 = vadd.f32 %v1718_v58, %v626_v17  ;;  %v628_v23 = vpop.f32.mrb[31].mxu0  ;;  %v692_v25 = vpop.f32.mrb[31].mxu1  ;;  %v691_v6 = vadd.f32 %v1718_v58, %v690_v19 }
 0x13b   : > { %v708_v28 = vadd.f32 %v707_v20, %v627_v22 }
 0x13d   : > { %v709_v32 = vadd.f32 %v708_v28, %v632_v27 }
 0x13f   : > { %v710_v34 = vadd.f32 %v709_v32, %v635_v29 }
 0x141   : > { %v711_v37 = vadd.f32 %v710_v34, %v640_v33 }
 0x143   : > { %v712_v41 = vadd.f32 %v711_v37, %v643_v35 }
 0x145   : > { %v713_v42 = vadd.f32 %v712_v41, %v648_v40 }
 0x147   : > { %v714_v45 = vadd.f32 %v713_v42, %v651_v43 }
 0x149   : > { %v715_v46 = vadd.f32 %v714_v45, %v656_v47 }
 0x14b   : > { %v716_v48 = vadd.f32 %v715_v46, %v659_v51 }
 0x14d   : > { %v717_v49 = vadd.f32 %v716_v48, %v664_v55 }
 0x14f   : > { %v718_v52 = vadd.f32 %v717_v49, %v667_v61 }
 0x151   : > { %v719_v3 = vadd.f32 %v718_v52, %v672_v54 }
 0x153   : > { %v720_v60 = vadd.f32 %v719_v3, %v675_v57 }
 0x155   : > { %v721_v0 = vadd.f32 %v720_v60, %v680_v11 }
 0x157   : > { %v722_v5 = vadd.f32 %v721_v0, %v683_v16 }
 0x159   : > { %v723_v24 = vadd.f32 %v722_v5, %v688_v2 }
 0x15b   : > { %v724_v7 = vadd.f32 %v723_v24, %v691_v6 }
 0x15d   : > { %v725_v30 = vrot.slane %v724_v7, 4 }
 0x15f   : > { %v726_v10 = vadd.f32 %v725_v30, %v724_v7 }
 0x161   : > { %v727_v14 = vrot.slane %v726_v10, 2 }
 0x163   : > { %v728_v38 = vadd.f32 %v727_v14, %v726_v10 }
 0x165   : > { %v729_v15 = vrot.slane %v728_v38, 1 }
 0x167   : > { %v730_v17 = vadd.f32 %v729_v15, %v728_v38 }
 0x169   : > { %v732_v44 = vmul.f32 0.00390625, %v730_v17 }
 0x16b   : > { %v1807_v20 = vsub.f32 %v616_v56, %v732_v44  ;;  %v1809_v53 = vsub.f32 %v619_v4, %v732_v44  ;;  %v1811_v23 = vsub.f32 %v624_v13, %v732_v44  ;;  %v1813_v1 = vsub.f32 %v627_v22, %v732_v44 }
 0x16c   : > { %v1815_v12 = vsub.f32 %v632_v27, %v732_v44  ;;  %v1817_v25 = vsub.f32 %v635_v29, %v732_v44  ;;  %v1819_v58 = vsub.f32 %v640_v33, %v732_v44  ;;  %v1821_v19 = vsub.f32 %v643_v35, %v732_v44 }
 0x16d   : > { %v1823_v28 = vsub.f32 %v648_v40, %v732_v44  ;;  %v1825_v32 = vsub.f32 %v651_v43, %v732_v44  ;;  %v1827_v56 = vsub.f32 %v656_v47, %v732_v44  ;;  %v1829_v4 = vsub.f32 %v659_v51, %v732_v44 }
 0x16e   : > { %v1831_v13 = vsub.f32 %v664_v55, %v732_v44  ;;  %v1833_v22 = vsub.f32 %v667_v61, %v732_v44  ;;  %v1835_v27 = vsub.f32 %v672_v54, %v732_v44  ;;  %v1837_v29 = vsub.f32 %v675_v57, %v732_v44 }
 0x16f   : > { %v1839_v33 = vsub.f32 %v680_v11, %v732_v44  ;;  %v1841_v34 = vsub.f32 %v683_v16, %v732_v44  ;;  %v1843_v35 = vsub.f32 %v688_v2, %v732_v44  ;;  %v1845_v37 = vsub.f32 %v691_v6, %v732_v44 }
 0x170   : > { %v1848_v40 = vsub.f32 %v1726_v62, %v732_v44  ;;  %v1851_v41 = vsub.f32 %v1721_v59, %v732_v44  ;;  %v1854_v43 = vsub.f32 %v1729_v63, %v732_v44  ;;  %v1861_v45 = vsub.f32 %v1737_v8, %v732_v44 }
 0x171   : > { %v1864_v51 = vsub.f32 %v1740_v9, %v732_v44  ;;  %v1869_v46 = vsub.f32 %v1749_v18, %v732_v44  ;;  %v1874_v48 = vsub.f32 %v1752_v21, %v732_v44  ;;  %v1879_v9 = vsub.f32 %v1759_v26, %v732_v44 }
 0x172   : > { %v765_v42 = vmul.f32 %v1848_v40, %v1848_v40  ;;  %v766_v47 = vmul.f32 %v1851_v41, %v1851_v41  ;;  %v767_v62 = vmul.f32 %v1854_v43, %v1854_v43  ;;  %v768_v63 = vmul.f32 %v1861_v45, %v1861_v45 }
 0x173   : > { %v769_v8 = vmul.f32 %v1864_v51, %v1864_v51  ;;  %v770_v61 = vmul.f32 %v1869_v46, %v1869_v46  ;;  %v1884_v18 = vsub.f32 %v1762_v31, %v732_v44  ;;  %v771_v54 = vmul.f32 %v1874_v48, %v1874_v48 }
 0x174   : > { %v797_v59 = vadd.f32 %v766_v47, %v765_v42  ;;  %v1889_v21 = vsub.f32 %v1767_v36, %v732_v44  ;;  %v772_v57 = vmul.f32 %v1879_v9, %v1879_v9  ;;  %v1894_v26 = vsub.f32 %v1770_v39, %v732_v44 }
 0x175   : > { %v773_v11 = vmul.f32 %v1884_v18, %v1884_v18  ;;  %v1899_v31 = vsub.f32 %v1775_v50, %v732_v44  ;;  %v777_v6 = vmul.f32 %v1807_v20, %v1807_v20  ;;  %v778_v50 = vmul.f32 %v1809_v53, %v1809_v53 }
 0x176   : > { %v798_v55 = vadd.f32 %v797_v59, %v767_v62  ;;  %v774_v16 = vmul.f32 %v1889_v21, %v1889_v21  ;;  %v775_v36 = vmul.f32 %v1894_v26, %v1894_v26  ;;  %v779_v10 = vmul.f32 %v1811_v23, %v1811_v23 }
 0x177   : > { %v776_v24 = vmul.f32 %v1899_v31, %v1899_v31  ;;  %v780_v38 = vmul.f32 %v1813_v1, %v1813_v1  ;;  %v781_v17 = vmul.f32 %v1815_v12, %v1815_v12  ;;  %v782_v42 = vmul.f32 %v1817_v25, %v1817_v25 }
 0x178   : > { %v799_v49 = vadd.f32 %v798_v55, %v768_v63  ;;  %v783_v62 = vmul.f32 %v1819_v58, %v1819_v58  ;;  %v784_v63 = vmul.f32 %v1821_v19, %v1821_v19 }
 0x17a   : > { %v800_v52 = vadd.f32 %v799_v49, %v769_v8  ;;  %v785_v8 = vmul.f32 %v1823_v28, %v1823_v28 }
 0x17c   : > { %v801_v3 = vadd.f32 %v800_v52, %v770_v61  ;;  %v786_v61 = vmul.f32 %v1825_v32, %v1825_v32 }
 0x17e   : > { %v802_v60 = vadd.f32 %v801_v3, %v771_v54  ;;  %v787_v54 = vmul.f32 %v1827_v56, %v1827_v56 }
 0x180   : > { %v803_v0 = vadd.f32 %v802_v60, %v772_v57  ;;  %v788_v57 = vmul.f32 %v1829_v4, %v1829_v4 }
 0x182   : > { %v804_v2 = vadd.f32 %v803_v0, %v773_v11  ;;  %v789_v11 = vmul.f32 %v1831_v13, %v1831_v13 }
 0x184   : > { %v805_v5 = vadd.f32 %v804_v2, %v774_v16  ;;  %v790_v16 = vmul.f32 %v1833_v22, %v1833_v22 }
 0x186   : > { %v806_v39 = vadd.f32 %v805_v5, %v775_v36  ;;  %v791_v36 = vmul.f32 %v1835_v27, %v1835_v27 }
 0x188   : > { %v807_v7 = vadd.f32 %v806_v39, %v776_v24  ;;  %v792_v24 = vmul.f32 %v1837_v29, %v1837_v29 }
 0x18a   : > { %v808_v30 = vadd.f32 %v807_v7, %v777_v6  ;;  %v793_v6 = vmul.f32 %v1839_v33, %v1839_v33 }
 0x18c   : > { %v809_v14 = vadd.f32 %v808_v30, %v778_v50  ;;  %v794_v50 = vmul.f32 %v1841_v34, %v1841_v34 }
 0x18e   : > { %v810_v15 = vadd.f32 %v809_v14, %v779_v10  ;;  %v795_v10 = vmul.f32 %v1843_v35, %v1843_v35 }
 0x190   : > { %v811_v44 = vadd.f32 %v810_v15, %v780_v38  ;;  %v796_v38 = vmul.f32 %v1845_v37, %v1845_v37 }
 0x192   : > { %v812_v47 = vadd.f32 %v811_v44, %v781_v17 }
 0x194   : > { %v813_v59 = vadd.f32 %v812_v47, %v782_v42 }
 0x196   : > { %v814_v55 = vadd.f32 %v813_v59, %v783_v62 }
 0x198   : > { %v815_v49 = vadd.f32 %v814_v55, %v784_v63 }
 0x19a   : > { %v816_v52 = vadd.f32 %v815_v49, %v785_v8 }
 0x19c   : > { %v817_v3 = vadd.f32 %v816_v52, %v786_v61 }
 0x19e   : > { %v818_v60 = vadd.f32 %v817_v3, %v787_v54 }
 0x1a0   : > { %v819_v0 = vadd.f32 %v818_v60, %v788_v57 }
 0x1a2   : > { %v820_v2 = vadd.f32 %v819_v0, %v789_v11 }
 0x1a4   : > { %v821_v5 = vadd.f32 %v820_v2, %v790_v16 }
 0x1a6   : > { %v822_v39 = vadd.f32 %v821_v5, %v791_v36 }
 0x1a8   : > { %v823_v7 = vadd.f32 %v822_v39, %v792_v24 }
 0x1aa   : > { %v824_v30 = vadd.f32 %v823_v7, %v793_v6 }
 0x1ac   : > { %v825_v14 = vadd.f32 %v824_v30, %v794_v50 }
 0x1ae   : > { %v826_v15 = vadd.f32 %v825_v14, %v795_v10 }
 0x1b0   : > { %v827_v17 = vadd.f32 %v826_v15, %v796_v38 }
 0x1b2   : > { %v828_v44 = vrot.slane %v827_v17, 4 }
 0x1b4   : > { %v829_v42 = vadd.f32 %v828_v44, %v827_v17 }
 0x1b6   : > { %v830_v47 = vrot.slane %v829_v42, 2 }
 0x1b8   : > { %v831_v62 = vadd.f32 %v830_v47, %v829_v42 }
 0x1ba   : > { %v832_v59 = vrot.slane %v831_v62, 1 }
 0x1bc   : > { %v833_v63 = vadd.f32 %v832_v59, %v831_v62 }
 0x1be   : > { %v834_v55 = vmul.f32 0.00390625, %v833_v63 }
 0x1c0   : > { %v835_v8 = vadd.f32 1e-05, %v834_v55 }
 0x1c2   : > { %1559 = vrsqrt.f32 %v835_v8 }
 0x1cc   : > { %v1560_v49 = vpop.eup %1559 }
 0x1cd   : > { %v1948_v61 = vmul.f32 %v1560_v49, %v1815_v12  ;;  %v1951_v52 = vmul.f32 %v1560_v49, %v1817_v25  ;;  %v1954_v54 = vmul.f32 %v1560_v49, %v1819_v58  ;;  %v1957_v3 = vmul.f32 %v1560_v49, %v1821_v19 }
 0x1ce   : > { %v1960_v57 = vmul.f32 %v1560_v49, %v1823_v28  ;;  %v1963_v60 = vmul.f32 %v1560_v49, %v1825_v32  ;;  %v1966_v11 = vmul.f32 %v1560_v49, %v1827_v56  ;;  %v1969_v12 = vmul.f32 %v1560_v49, %v1829_v4 }
 0x1cf   : > { %v1972_v25 = vmul.f32 %v1560_v49, %v1831_v13  ;;  %v1975_v58 = vmul.f32 %v1560_v49, %v1833_v22  ;;  %v1978_v19 = vmul.f32 %v1560_v49, %v1835_v27  ;;  %v1981_v28 = vmul.f32 %v1560_v49, %v1837_v29 }
 0x1d0   : > { %v1984_v32 = vmul.f32 %v1560_v49, %v1839_v33  ;;  %v1987_v56 = vmul.f32 %v1560_v49, %v1841_v34  ;;  %v1990_v4 = vmul.f32 %v1560_v49, %v1843_v35  ;;  %v1993_v13 = vmul.f32 %v1560_v49, %v1845_v37 }
 0x1d1   : > { %v837_v22 = vmul.f32 %v1560_v49, %v1848_v40  ;;  %v838_v27 = vmul.f32 %v1560_v49, %v1851_v41  ;;  %v839_v0 = vmul.f32 %v1560_v49, %v1854_v43  ;;  %v1999_v29 = vmul.f32 %v1560_v49, %v1861_v45 }
 0x1d2   : > { %v2002_v33 = vmul.f32 %v1560_v49, %v1864_v51  ;;  %v2005_v34 = vmul.f32 %v1560_v49, %v1869_v46  ;;  %v2008_v35 = vmul.f32 %v1560_v49, %v1874_v48  ;;  %v2011_v37 = vmul.f32 %v1560_v49, %v1879_v9 }
 0x1d3   : > { %v2014_v40 = vmul.f32 %v1560_v49, %v1884_v18  ;;  %v2017_v41 = vmul.f32 %v1560_v49, %v1889_v21  ;;  %v2020_v43 = vmul.f32 %v1560_v49, %v1894_v26  ;;  %v2023_v45 = vmul.f32 %v1560_v49, %v1899_v31 }
 0x1d4   : > { %v2026_v51 = vmul.f32 %v1560_v49, %v1807_v20  ;;  %v2029_v46 = vmul.f32 %v1560_v49, %v1809_v53  ;;  %v2032_v48 = vmul.f32 %v1560_v49, %v1811_v23  ;;  %v2035_v9 = vmul.f32 %v1560_v49, %v1813_v1 }
 0x1d5   : > { %vm869_vm1 = vcmp.ge.f32.partialorder %v837_v22, 0.0  ;;  %vm870_vm2 = vcmp.ge.f32.partialorder %v838_v27, 0.0  ;;  %vm871_vm3 = vcmp.ge.f32.partialorder %v839_v0, 0.0  ;;  %vm872_vm4 = vcmp.ge.f32.partialorder %v1999_v29, 0.0 }
 0x1d6   : > { %vm873_vm5 = vcmp.ge.f32.partialorder %v2002_v33, 0.0  ;;  %vm874_vm6 = vcmp.ge.f32.partialorder %v2005_v34, 0.0  ;;  %vm875_vm7 = vcmp.ge.f32.partialorder %v2008_v35, 0.0  ;;  %vm878_vm10 = vcmp.ge.f32.partialorder %v2017_v41, 0.0 }
 0x1d7   : > { %vm879_vm11 = vcmp.ge.f32.partialorder %v2020_v43, 0.0  ;;  %v901_v20 = vmul.f32 0.01, %v837_v22  ;;  %v902_v53 = vmul.f32 0.01, %v838_v27  ;;  %vm884_vm0 = vcmp.ge.f32.partialorder %v2035_v9, 0.0 }
 0x1d8   : > { %v903_v23 = vmul.f32 0.01, %v839_v0  ;;  %v904_v1 = vmul.f32 0.01, %v1999_v29  ;;  %v905_v18 = vmul.f32 0.01, %v2002_v33 }
 0x1d9   : > { %v906_v21 = vmul.f32 0.01, %v2005_v34  ;;  %vm889_vm12 = vcmp.ge.f32.partialorder %v1960_v57, 0.0  ;;  %v907_v26 = vmul.f32 0.01, %v2008_v35  ;;  %v2063_v2 = vsel %vm869_vm1, %v837_v22, %v901_v20 }
 0x1da   : > { %v908_v31 = vmul.f32 0.01, %v2011_v37  ;;  %v909_v16 = vmul.f32 0.01, %v2014_v40  ;;  %vm893_vm13 = vcmp.ge.f32.partialorder %v1972_v25, 0.0  ;;  %v2073_v39 = vsel %vm870_vm2, %v838_v27, %v902_v53 }
 0x1db   : > { %v910_v36 = vmul.f32 0.01, %v2017_v41  ;;  %v911_v5 = vmul.f32 0.01, %v2020_v43  ;;  %v912_v24 = vmul.f32 0.01, %v2023_v45  ;;  %v935_v30 = vsel %vm871_vm3, %v839_v0, %v903_v23 }
 0x1dc   : > { %vm895_vm1 = vcmp.ge.f32.partialorder %v1978_v19, 0.0  ;;  %vm896_vm15 = vcmp.ge.f32.partialorder %v1981_v28, 0.0  ;;  %vm897_vm9 = vcmp.ge.f32.partialorder %v1984_v32, 0.0  ;;  %vm898_vm8 = vcmp.ge.f32.partialorder %v1987_v56, 0.0 }
 0x1dd   : > { %v913_v6 = vmul.f32 0.01, %v2026_v51  ;;  %v914_v7 = vmul.f32 0.01, %v2029_v46  ;;  %v915_v50 = vmul.f32 0.01, %v2032_v48  ;;  %v936_v15 = vsel %vm872_vm4, %v1999_v29, %v904_v1 }
 0x1de   : > { %vm899_vm14 = vcmp.ge.f32.partialorder %v1990_v4, 0.0  ;;  %vm900_vm2 = vcmp.ge.f32.partialorder %v1993_v13, 0.0  ;;  %v916_v10 = vmul.f32 0.01, %v2035_v9  ;;  %v917_v14 = vmul.f32 0.01, %v1948_v61 }
 0x1df   : > { %v918_v38 = vmul.f32 0.01, %v1951_v52  ;;  %v919_v17 = vmul.f32 0.01, %v1954_v54  ;;  %v920_v44 = vmul.f32 0.01, %v1957_v3  ;;  %v937_v47 = vsel %vm873_vm5, %v2002_v33, %v905_v18 }
 0x1e0   : > { %v921_v42 = vmul.f32 0.01, %v1960_v57  ;;  %v922_v62 = vmul.f32 0.01, %v1963_v60  ;;  %v923_v59 = vmul.f32 0.01, %v1966_v11  ;;  %v938_v55 = vsel %vm874_vm6, %v2005_v34, %v906_v21 }
 0x1e1   : > { %v924_v63 = vmul.f32 0.01, %v1969_v12  ;;  %v925_v8 = vmul.f32 0.01, %v1972_v25  ;;  %v926_v49 = vmul.f32 0.01, %v1975_v58  ;;  %v939_v27 = vsel %vm875_vm7, %v2008_v35, %v907_v26 }
 0x1e2   : > { %v927_v22 = vmul.f32 0.01, %v1978_v19  ;;  %v928_v0 = vmul.f32 0.01, %v1981_v28  ;;  %v929_v29 = vmul.f32 0.01, %v1984_v32  ;;  %v942_v35 = vsel %vm878_vm10, %v2017_v41, %v910_v36 }
 0x1e3   : > { %v930_v33 = vmul.f32 0.01, %v1987_v56  ;;  %vm2226_vm3 = vcmp.ge.f32.partialorder %v2011_v37, 0.0  ;;  %v931_v20 = vmul.f32 0.01, %v1990_v4  ;;  %vm2227_vm4 = vcmp.ge.f32.partialorder %v2014_v40, 0.0 }
 0x1e4   : > { %v940_v34 = vsel %vm2226_vm3, %v2011_v37, %v908_v31  ;;  %v932_v53 = vmul.f32 0.01, %v1993_v13  ;;  %v941_v23 = vsel %vm2227_vm4, %v2014_v40, %v909_v16  ;;  %v943_v1 = vsel %vm879_vm11, %v2020_v43, %v911_v5 }
 0x1e5   : > { %vm2228_vm5 = vcmp.ge.f32.partialorder %v2023_v45, 0.0  ;;  %vm2229_vm6 = vcmp.ge.f32.partialorder %v2026_v51, 0.0  ;;  %vm2230_vm7 = vcmp.ge.f32.partialorder %v2029_v46, 0.0  ;;  %vm2231_vm10 = vcmp.ge.f32.partialorder %v2032_v48, 0.0 }
 0x1e6   : > { %v944_v37 = vsel %vm2228_vm5, %v2023_v45, %v912_v24  ;;  %v945_v18 = vsel %vm2229_vm6, %v2026_v51, %v913_v6  ;;  %v946_v40 = vsel %vm2230_vm7, %v2029_v46, %v914_v7  ;;  %v947_v41 = vsel %vm2231_vm10, %v2032_v48, %v915_v50 }
 0x1e7   : > { %v948_v43 = vsel %vm884_vm0, %v2035_v9, %v916_v10  ;;  %vm2232_vm11 = vcmp.ge.f32.partialorder %v1948_v61, 0.0  ;;  %vm2233_vm3 = vcmp.ge.f32.partialorder %v1951_v52, 0.0  ;;  %vm2234_vm4 = vcmp.ge.f32.partialorder %v1954_v54, 0.0 }
 0x1e8   : > { %v949_v45 = vsel %vm2232_vm11, %v1948_v61, %v917_v14  ;;  %v950_v51 = vsel %vm2233_vm3, %v1951_v52, %v918_v38  ;;  %v951_v46 = vsel %vm2234_vm4, %v1954_v54, %v919_v17  ;;  %vm2235_vm5 = vcmp.ge.f32.partialorder %v1957_v3, 0.0 }
 0x1e9   : > { %v952_v48 = vsel %vm2235_vm5, %v1957_v3, %v920_v44  ;;  %v953_v9 = vsel %vm889_vm12, %v1960_v57, %v921_v42  ;;  %vm2236_vm0 = vcmp.ge.f32.partialorder %v1963_v60, 0.0  ;;  %vm2237_vm6 = vcmp.ge.f32.partialorder %v1966_v11, 0.0 }
 0x1ea   : > { %v954_v61 = vsel %vm2236_vm0, %v1963_v60, %v922_v62  ;;  %v955_v52 = vsel %vm2237_vm6, %v1966_v11, %v923_v59  ;;  %vm2238_vm7 = vcmp.ge.f32.partialorder %v1969_v12, 0.0  ;;  %v957_v3 = vsel %vm893_vm13, %v1972_v25, %v925_v8 }
 0x1eb   : > { %v956_v54 = vsel %vm2238_vm7, %v1969_v12, %v924_v63  ;;  %vm2239_vm10 = vcmp.ge.f32.partialorder %v1975_v58, 0.0  ;;  %v959_v60 = vsel %vm895_vm1, %v1978_v19, %v927_v22  ;;  %v960_v11 = vsel %vm896_vm15, %v1981_v28, %v928_v0 }
 0x1ec   : > { %v958_v57 = vsel %vm2239_vm10, %v1975_v58, %v926_v49  ;;  %v961_v12 = vsel %vm897_vm9, %v1984_v32, %v929_v29  ;;  %v962_v25 = vsel %vm898_vm8, %v1987_v56, %v930_v33  ;;  %v963_v58 = vsel %vm899_vm14, %v1990_v4, %v931_v20 }
 0x1ed   : > { %v964_v19 = vsel %vm900_vm2, %v1993_v13, %v932_v53  ;;  %v1367_v28 = vpack.c.bf16 %v2073_v39, %v2063_v2  ;;  %v1372_v32 = vpack.c.bf16 %v936_v15, %v935_v30  ;;  %v1377_v21 = vpack.c.bf16 %v938_v55, %v937_v47 }
 0x1ee   : > { %v1382_v26 = vpack.c.bf16 %v940_v34, %v939_v27  ;;  %v1387_v31 = vpack.c.bf16 %v942_v35, %v941_v23  ;;  %v1392_v56 = vpack.c.bf16 %v944_v37, %v943_v1  ;;  %v1397_v4 = vpack.c.bf16 %v946_v40, %v945_v18 }
 0x1ef   : > { %1368 = vst [vmem:[%s2175_s20] sm:$0xff] %v1367_v28   ;;  %1444 = vst [vmem:[%s2175_s20 + $0x8] sm:$0xff] %v1372_v32   ;;  %v1402_v16 = vpack.c.bf16 %v948_v43, %v947_v41  ;;  %v1407_v36 = vpack.c.bf16 %v950_v51, %v949_v45  ;;  %v1412_v13 = vpack.c.bf16 %v952_v48, %v951_v46 }
 0x1f0   : > { %1445 = vst [vmem:[%s2175_s20 + $0x10] sm:$0xff] %v1377_v21   ;;  %1446 = vst [vmem:[%s2175_s20 + $0x18] sm:$0xff] %v1382_v26   ;;  %v1417_v2 = vpack.c.bf16 %v954_v61, %v953_v9  ;;  %v1422_v5 = vpack.c.bf16 %v956_v54, %v955_v52  ;;  %v1427_v24 = vpack.c.bf16 %v958_v57, %v957_v3 }
 0x1f1   : > { %1447 = vst [vmem:[%s2175_s20 + $0x20] sm:$0xff] %v1387_v31   ;;  %1448 = vst [vmem:[%s2175_s20 + $0x28] sm:$0xff] %v1392_v56   ;;  %v1432_v39 = vpack.c.bf16 %v960_v11, %v959_v60  ;;  %v1437_v6 = vpack.c.bf16 %v962_v25, %v961_v12  ;;  %v1442_v7 = vpack.c.bf16 %v964_v19, %v963_v58 }
 0x1f2   : > { %1449 = vst [vmem:[%s2175_s20 + $0x30] sm:$0xff] %v1397_v4   ;;  %1450 = vst [vmem:[%s2175_s20 + $0x38] sm:$0xff] %v1402_v16  }
 0x1f3   : > { %1451 = vst [vmem:[%s2175_s20 + $0x40] sm:$0xff] %v1407_v36   ;;  %1452 = vst [vmem:[%s2175_s20 + $0x48] sm:$0xff] %v1412_v13  }
 0x1f4   : > { %1453 = vst [vmem:[%s2175_s20 + $0x50] sm:$0xff] %v1417_v2   ;;  %1454 = vst [vmem:[%s2175_s20 + $0x58] sm:$0xff] %v1422_v5  }
 0x1f5   : > { %1455 = vst [vmem:[%s2175_s20 + $0x60] sm:$0xff] %v1427_v24   ;;  %1456 = vst [vmem:[%s2175_s20 + $0x68] sm:$0xff] %v1432_v39  }
 0x1f6   : > { %1457 = vst [vmem:[%s2175_s20 + $0x70] sm:$0xff] %v1437_v6   ;;  %1458 = vst [vmem:[%s2175_s20 + $0x78] sm:$0xff] %v1442_v7  }
 0x1f7 PF: > { %s13_s14 = sadd.s32 1, %s1583_s14   ;;  %s2240_s12 = smov %s1579_s13 }
 0x1f8   : > { %p10_p5 = scmp.ge.s32.totalorder %s13_s14, 4   ;;  %s2241_s13 = smov %s2243_s15 }
 0x1fa   :  { %12 = sbr.rel (!%p10_p5) target bundleno = 2 (0x2), region = 68 }

</bundles_post_ra>
